<compile_context>
chip_gen: v5e
topology: v5e:2x2
jax: 0.10.0
libtpu: 0.0.40
codegen_flags: <defaults>
</compile_context>

<pallas_src>
import jax
import jax.numpy as jnp
from jax.experimental import pallas as pl
from jax.experimental.pallas import tpu as pltpu

# Small, TPU-friendly shapes consistent with the module (ViT-style MLP).
B = 2
SEQ = 64
IN_FEATURES = 128
HIDDEN_FEATURES = 4 * IN_FEATURES        # 512
OUT_FEATURES = IN_FEATURES               # Mlp default: out_features = in_features

_SQRT1_2 = 0.70710678118654752440


def _round_up(a, b):
    return (a + b - 1) // b * b


def _erf(z):
    # Abramowitz & Stegun 7.1.26 rational approximation, |err| <= 1.5e-7.
    # exp and the reciprocal both run on the EUP (separate bundle slot), so the
    # VALU only sees mul/add; one Newton step restores the approx-recip accuracy.
    a1, a2, a3, a4, a5 = (0.254829592, -0.284496736, 1.421413741,
                          -1.453152027, 1.061405429)
    p = 0.3275911
    za = jnp.abs(z)
    denom = 1.0 + p * za
    t = pl.reciprocal(denom, approx=True)     # EUP vrcp
    t = t * (2.0 - denom * t)                 # one NR refinement (cheap VPU)
    poly = ((((a5 * t + a4) * t + a3) * t + a2) * t + a1) * t
    y = 1.0 - poly * jnp.exp(-za * za)        # exp on EUP
    return jnp.where(z >= 0, y, -y)


def _gelu_exact(x):
    # PyTorch nn.GELU() default ("exact" erf form).
    return 0.5 * x * (1.0 + _erf(x * _SQRT1_2))


# ----------------------------------------------------------------------------
# Fused MLP kernel: o = gelu(x @ W1 + b1) @ W2 + b2   for one row tile of x.
# ----------------------------------------------------------------------------
def _mlp_kernel(x_ref, w1_ref, b1_ref, w2_ref, b2_ref, o_ref):
    h = jnp.dot(x_ref[...], w1_ref[...], preferred_element_type=jnp.float32)
    h = _gelu_exact(h + b1_ref[...])          # f32 accumulator + f32 bias
    o = jnp.dot(h.astype(w2_ref.dtype), w2_ref[...],
                preferred_element_type=jnp.float32)
    o_ref[...] = (o + b2_ref[...]).astype(o_ref.dtype)


def _num_tensorcores():
    # v7x has 2 TensorCores per chip; v5e/v6e have 1.
    try:
        kind = jax.devices()[0].device_kind.lower()
        if "v7" in kind:
            return 2
    except Exception:
        pass
    return 1


def mlp_forward(x, params, *, row_tile=None):
    """params: dict with w1 (in,hidden), b1 (1,hidden), w2 (hidden,out), b2 (1,out).

    Weights are used in whatever dtype they are stored in (bf16 by default from
    prepare_params); activations are cast to match.  Accumulation is always f32.
    """
    w1, b1, w2, b2 = params["w1"], params["b1"], params["w2"], params["b2"]
    *lead, C = x.shape
    K, H = w1.shape
    H2, N = w2.shape
    assert C == K and H2 == H and b1.shape == (1, H) and b2.shape == (1, N)

    out_dtype = x.dtype
    x2 = x.reshape(-1, C).astype(w1.dtype)    # tiny cast; weights already at rest dtype
    M = x2.shape[0]

    itemsize = jnp.dtype(w1.dtype).itemsize
    out_itemsize = jnp.dtype(out_dtype).itemsize
    if row_tile is None:
        row_tile = 1024 if itemsize <= 2 else 512

    min_rows = 16                              # sublane-friendly for f32 and bf16
    n_cores = _num_tensorcores()
    if M <= row_tile:
        if n_cores >= 2 and M >= 2 * min_rows:
            # Split the parallel row axis so both v7x TensorCores get work.
            tm = _round_up(pl.cdiv(M, n_cores), min_rows)
        else:
            tm = M                             # single full block, no pipeline steps
    else:
        tm = _round_up(min(row_tile, M), min_rows)
    grid = (pl.cdiv(M, tm),)                   # partial last block is masked by Pallas

    # VMEM budget: double-buffered act/out tiles + resident weights/biases +
    # the f32 fc1/GELU intermediate.
    vmem_bytes = (2 * tm * K * itemsize
                  + 2 * tm * N * out_itemsize
                  + (K * H + H * N) * itemsize
                  + (H + N) * 4
                  + tm * H * 4)
    compiler_kwargs = dict(dimension_semantics=("parallel",))
    if vmem_bytes > 24 * 1024 * 1024:
        # TODO(synk): for very large hidden dims, add an H grid axis ("arbitrary", last)
        # with an f32 accumulator scratch so the weights need not be fully resident
        # (v7x only has 64 MiB physical VMEM).
        compiler_kwargs["vmem_limit_bytes"] = int(vmem_bytes * 1.25)

    cost = pl.CostEstimate(
        flops=2 * M * K * H + 2 * M * H * N,
        transcendentals=2 * M * H,             # exp + approx-recip per hidden element
        bytes_accessed=(M * K * itemsize
                        + (K * H + H * N) * itemsize
                        + (H + N) * 4
                        + M * N * out_itemsize),
    )

    out = pl.pallas_call(
        _mlp_kernel,
        out_shape=jax.ShapeDtypeStruct((M, N), out_dtype),
        grid_spec=pltpu.PrefetchScalarGridSpec(
            num_scalar_prefetch=0,
            grid=grid,
            in_specs=[
                pl.BlockSpec((tm, K), lambda i: (i, 0)),   # activation row tile
                pl.BlockSpec((K, H), lambda i: (0, 0)),    # fc1 weight (resident)
                pl.BlockSpec((1, H), lambda i: (0, 0)),    # fc1 bias (f32)
                pl.BlockSpec((H, N), lambda i: (0, 0)),    # fc2 weight (resident)
                pl.BlockSpec((1, N), lambda i: (0, 0)),    # fc2 bias (f32)
            ],
            out_specs=pl.BlockSpec((tm, N), lambda i: (i, 0)),
        ),
        compiler_params=pltpu.CompilerParams(**compiler_kwargs),
        cost_estimate=cost,
    )(x2, w1, b1, w2, b2)

    return out.reshape(*lead, N)


# ----------------------------------------------------------------------------
# Parameters (PyTorch nn.Linear layout) + one-time layout / dtype prep.
# ----------------------------------------------------------------------------
def init_params_torch_layout(key):
    k1, k2, k3, k4 = jax.random.split(key, 4)
    s = 0.05
    return {
        "fc1.weight": jax.random.normal(k1, (HIDDEN_FEATURES, IN_FEATURES), jnp.float32) * s,
        "fc1.bias":   jax.random.normal(k2, (HIDDEN_FEATURES,), jnp.float32) * s,
        "fc2.weight": jax.random.normal(k3, (OUT_FEATURES, HIDDEN_FEATURES), jnp.float32) * s,
        "fc2.bias":   jax.random.normal(k4, (OUT_FEATURES,), jnp.float32) * s,
    }


def prepare_params(torch_params, compute_dtype=jnp.bfloat16):
    # Hoisted out of the forward pass (done once):
    #  - nn.Linear stores weight as (out,in) and computes x @ W.T + b;
    #    pre-transpose to (in,out) so the kernel's dots are lane-dense.
    #  - weights are stored at rest in the MXU-native compute dtype (bf16 default):
    #    no per-call cast and half the weight DMA bytes.
    #  - biases stay f32 (added onto the f32 MXU accumulator before GELU / store).
    return {
        "w1": jnp.transpose(torch_params["fc1.weight"]).astype(compute_dtype),
        "b1": torch_params["fc1.bias"].reshape(1, -1).astype(jnp.float32),
        "w2": jnp.transpose(torch_params["fc2.weight"]).astype(compute_dtype),
        "b2": torch_params["fc2.bias"].reshape(1, -1).astype(jnp.float32),
    }


def mlp_reference(x, torch_params):
    # Pure-JAX mirror of the PyTorch Mlp.forward: fc1 -> exact (erf) GELU -> fc2.
    h = x @ torch_params["fc1.weight"].T + torch_params["fc1.bias"]
    h = jax.nn.gelu(h, approximate=False)
    return h @ torch_params["fc2.weight"].T + torch_params["fc2.bias"]


if __name__ == "__main__":
    key = jax.random.PRNGKey(0)
    kx, kp = jax.random.split(key)
    x = jax.random.normal(kx, (B, SEQ, IN_FEATURES), jnp.float32)
    torch_params = init_params_torch_layout(kp)

    y_ref = jax.block_until_ready(mlp_reference(x, torch_params))

    # f32 weight path: matches the exact PyTorch-semantics reference closely
    # (A&S erf + EUP reciprocal with one Newton step).
    params_f32 = prepare_params(torch_params, compute_dtype=jnp.float32)
    y_f32 = jax.block_until_ready(mlp_forward(x, params_f32))
    assert y_f32.shape == (B, SEQ, OUT_FEATURES), y_f32.shape
    max_err = float(jnp.max(jnp.abs(y_f32 - y_ref)))
    assert jnp.allclose(y_f32, y_ref, atol=1e-3, rtol=1e-3), max_err

    # Default bf16 weight path (MXU-native on v5e/v6e/v7x); f32 accumulation.
    params_bf16 = prepare_params(torch_params)
    y_bf16 = jax.block_until_ready(mlp_forward(x, params_bf16))
    assert y_bf16.shape == (B, SEQ, OUT_FEATURES), y_bf16.shape
    assert jnp.allclose(y_bf16, y_ref, atol=5e-2, rtol=5e-2)

    print("KERNEL_OK")
</pallas_src>

<mosaic_0001>
module attributes {stable_mosaic.version = 11 : i64} {
  func.func @_mlp_kernel(%arg0: i32, %arg1: memref<128x128xf32, #tpu.memory_space<vmem>>, %arg2: memref<128x512xf32, #tpu.memory_space<vmem>>, %arg3: memref<1x512xf32, #tpu.memory_space<vmem>>, %arg4: memref<512x128xf32, #tpu.memory_space<vmem>>, %arg5: memref<1x128xf32, #tpu.memory_space<vmem>>, %arg6: memref<128x128xf32, #tpu.memory_space<vmem>>) attributes {dimension_semantics = [#tpu.dimension_semantics<parallel>], iteration_bounds = array<i64: 1>, scalar_prefetch = 0 : i64, scratch_operands = 0 : i64, tpu.core_type = #tpu.core_type<tc>, window_params = [{transform_indices = @transform_0, window_bounds = array<i64: 128, 128>}, {pipeline_mode = #tpu.pipeline_mode<synchronous>, transform_indices = @transform_1, window_bounds = array<i64: 128, 512>}, {pipeline_mode = #tpu.pipeline_mode<synchronous>, transform_indices = @transform_2, window_bounds = array<i64: 1, 512>}, {pipeline_mode = #tpu.pipeline_mode<synchronous>, transform_indices = @transform_3, window_bounds = array<i64: 512, 128>}, {pipeline_mode = #tpu.pipeline_mode<synchronous>, transform_indices = @transform_4, window_bounds = array<i64: 1, 128>}, {transform_indices = @transform_5, window_bounds = array<i64: 128, 128>}]} {
    %c0 = arith.constant 0 : index
    %c0_0 = arith.constant 0 : index
    %0 = vector.load %arg1[%c0, %c0_0] : memref<128x128xf32, #tpu.memory_space<vmem>>, vector<128x128xf32>
    %c0_1 = arith.constant 0 : index
    %c0_2 = arith.constant 0 : index
    %1 = vector.load %arg2[%c0_1, %c0_2] : memref<128x512xf32, #tpu.memory_space<vmem>>, vector<128x512xf32>
    %cst = arith.constant dense<0.000000e+00> : vector<128x512xf32>
    %2 = tpu.matmul %0, %1, %cst {dimension_numbers = #tpu.dot_dimension_numbers<[1], [0], [0], [1], [0, 0, 1, 1], [], []>} : vector<128x128xf32>, vector<128x512xf32>, vector<128x512xf32> -> vector<128x512xf32>
    %c0_3 = arith.constant 0 : index
    %c0_4 = arith.constant 0 : index
    %3 = vector.load %arg3[%c0_3, %c0_4] : memref<1x512xf32, #tpu.memory_space<vmem>>, vector<1x512xf32>
    %4 = vector.broadcast %3 : vector<1x512xf32> to vector<128x512xf32>
    %5 = arith.addf %2, %4 : vector<128x512xf32>
    %cst_5 = arith.constant 5.000000e-01 : f32
    %6 = vector.broadcast %cst_5 : f32 to vector<128x512xf32>
    %7 = arith.mulf %6, %5 : vector<128x512xf32>
    %cst_6 = arith.constant 0.707106769 : f32
    %8 = vector.broadcast %cst_6 : f32 to vector<128x512xf32>
    %9 = arith.mulf %5, %8 : vector<128x512xf32>
    %10 = math.absf %9 : vector<128x512xf32>
    %cst_7 = arith.constant 0.327591091 : f32
    %11 = vector.broadcast %cst_7 : f32 to vector<128x512xf32>
    %12 = arith.mulf %11, %10 : vector<128x512xf32>
    %cst_8 = arith.constant 1.000000e+00 : f32
    %13 = vector.broadcast %cst_8 : f32 to vector<128x512xf32>
    %14 = arith.addf %13, %12 : vector<128x512xf32>
    %15 = tpu.reciprocal %14 {approx = true} : vector<128x512xf32> -> vector<128x512xf32>
    %16 = arith.mulf %14, %15 : vector<128x512xf32>
    %cst_9 = arith.constant 2.000000e+00 : f32
    %17 = vector.broadcast %cst_9 : f32 to vector<128x512xf32>
    %18 = arith.subf %17, %16 : vector<128x512xf32>
    %19 = arith.mulf %15, %18 : vector<128x512xf32>
    %cst_10 = arith.constant 1.06140542 : f32
    %20 = vector.broadcast %cst_10 : f32 to vector<128x512xf32>
    %21 = arith.mulf %20, %19 : vector<128x512xf32>
    %cst_11 = arith.constant -1.45315206 : f32
    %22 = vector.broadcast %cst_11 : f32 to vector<128x512xf32>
    %23 = arith.addf %21, %22 : vector<128x512xf32>
    %24 = arith.mulf %23, %19 : vector<128x512xf32>
    %cst_12 = arith.constant 1.42141378 : f32
    %25 = vector.broadcast %cst_12 : f32 to vector<128x512xf32>
    %26 = arith.addf %24, %25 : vector<128x512xf32>
    %27 = arith.mulf %26, %19 : vector<128x512xf32>
    %cst_13 = arith.constant -0.284496725 : f32
    %28 = vector.broadcast %cst_13 : f32 to vector<128x512xf32>
    %29 = arith.addf %27, %28 : vector<128x512xf32>
    %30 = arith.mulf %29, %19 : vector<128x512xf32>
    %cst_14 = arith.constant 0.254829586 : f32
    %31 = vector.broadcast %cst_14 : f32 to vector<128x512xf32>
    %32 = arith.addf %30, %31 : vector<128x512xf32>
    %33 = arith.mulf %32, %19 : vector<128x512xf32>
    %cst_15 = arith.constant 0.000000e+00 : f32
    %34 = vector.broadcast %cst_15 : f32 to vector<128x512xf32>
    %35 = arith.subf %34, %10 : vector<128x512xf32>
    %36 = arith.mulf %35, %10 : vector<128x512xf32>
    %37 = math.exp %36 : vector<128x512xf32>
    %38 = arith.mulf %33, %37 : vector<128x512xf32>
    %cst_16 = arith.constant 1.000000e+00 : f32
    %39 = vector.broadcast %cst_16 : f32 to vector<128x512xf32>
    %40 = arith.subf %39, %38 : vector<128x512xf32>
    %cst_17 = arith.constant 0.000000e+00 : f32
    %41 = vector.broadcast %cst_17 : f32 to vector<128x512xf32>
    %42 = arith.cmpf oge, %9, %41 : vector<128x512xf32>
    %cst_18 = arith.constant 0.000000e+00 : f32
    %43 = vector.broadcast %cst_18 : f32 to vector<128x512xf32>
    %44 = arith.subf %43, %40 : vector<128x512xf32>
    %45 = arith.select %42, %40, %44 : vector<128x512xi1>, vector<128x512xf32>
    %cst_19 = arith.constant 1.000000e+00 : f32
    %46 = vector.broadcast %cst_19 : f32 to vector<128x512xf32>
    %47 = arith.addf %46, %45 : vector<128x512xf32>
    %48 = arith.mulf %7, %47 : vector<128x512xf32>
    %c0_20 = arith.constant 0 : index
    %c0_21 = arith.constant 0 : index
    %49 = vector.load %arg4[%c0_20, %c0_21] : memref<512x128xf32, #tpu.memory_space<vmem>>, vector<512x128xf32>
    %cst_22 = arith.constant dense<0.000000e+00> : vector<128x128xf32>
    %50 = tpu.matmul %48, %49, %cst_22 {dimension_numbers = #tpu.dot_dimension_numbers<[1], [0], [0], [1], [0, 0, 1, 1], [], []>} : vector<128x512xf32>, vector<512x128xf32>, vector<128x128xf32> -> vector<128x128xf32>
    %c0_23 = arith.constant 0 : index
    %c0_24 = arith.constant 0 : index
    %51 = vector.load %arg5[%c0_23, %c0_24] : memref<1x128xf32, #tpu.memory_space<vmem>>, vector<1x128xf32>
    %52 = vector.broadcast %51 : vector<1x128xf32> to vector<128x128xf32>
    %53 = arith.addf %50, %52 : vector<128x128xf32>
    %c0_25 = arith.constant 0 : index
    %c0_26 = arith.constant 0 : index
    %54 = vector.load %arg6[%c0_25, %c0_26] : memref<128x128xf32, #tpu.memory_space<vmem>>, vector<128x128xf32>
    tpu.vector_store %arg6[%c0_25, %c0_26], %53 {strides = array<i32>} : memref<128x128xf32, #tpu.memory_space<vmem>>, vector<128x128xf32>,
    return
  }
  func.func @transform_0(%arg0: i32) -> (i32, i32) {
    %c0_i32 = arith.constant 0 : i32
    %c0_i32_0 = arith.constant 0 : i32
    return %arg0, %c0_i32 : i32, i32
  }
  func.func @transform_1(%arg0: i32) -> (i32, i32) {
    %c0_i32 = arith.constant 0 : i32
    %c0_i32_0 = arith.constant 0 : i32
    %c0_i32_1 = arith.constant 0 : i32
    return %c0_i32, %c0_i32_0 : i32, i32
  }
  func.func @transform_2(%arg0: i32) -> (i32, i32) {
    %c0_i32 = arith.constant 0 : i32
    %c0_i32_0 = arith.constant 0 : i32
    %c0_i32_1 = arith.constant 0 : i32
    return %c0_i32, %c0_i32_0 : i32, i32
  }
  func.func @transform_3(%arg0: i32) -> (i32, i32) {
    %c0_i32 = arith.constant 0 : i32
    %c0_i32_0 = arith.constant 0 : i32
    %c0_i32_1 = arith.constant 0 : i32
    return %c0_i32, %c0_i32_0 : i32, i32
  }
  func.func @transform_4(%arg0: i32) -> (i32, i32) {
    %c0_i32 = arith.constant 0 : i32
    %c0_i32_0 = arith.constant 0 : i32
    %c0_i32_1 = arith.constant 0 : i32
    return %c0_i32, %c0_i32_0 : i32, i32
  }
  func.func @transform_5(%arg0: i32) -> (i32, i32) {
    %c0_i32 = arith.constant 0 : i32
    %c0_i32_0 = arith.constant 0 : i32
    return %arg0, %c0_i32 : i32, i32
  }
}

</mosaic_0001>

<bundles_post_ra>
// kernel: tpu_custom_call.1
= control target key start
LH: loop header
LB: loop body
LE: loop exit
PB: predicated region body
PF: predicated region fallthrough
CT: control target
= control target key end

     0   :  { %10 = vsyncpa [#allocation3], 0  ;;  %s4917_s0 = inlined_call_operand.hbm [shape: f32[128,128], index: 0, kind: input, shape index: {}]   ;;  %s4918_s1 = inlined_call_operand.hbm [shape: f32[128,512], index: 1, kind: input, shape index: {}]   ;;  %s4919_s2 = inlined_call_operand.hbm [shape: f32[1,512], index: 2, kind: input, shape index: {}]   ;;  %s4920_s3 = inlined_call_operand.hbm [shape: f32[512,128], index: 3, kind: input, shape index: {}]   ;;  %s4921_s4 = inlined_call_operand.vmem [shape: f32[1,128], index: 4, kind: input, shape index: {}]   ;;  %s4922_s5 = inlined_call_operand.hbm [shape: f32[128,128], index: 5, kind: output, shape index: {}]  }
   0x1   :  { %11 = vsyncpa [#allocation6], 0 }
   0x2   :  { %12 = vsyncpa [#allocation9], 0  ;;  %s31_s20 = sshll.u32 %s4918_s1, 4  ;;  %s32_s20 = int_to_ptr.hbm [resolvable:$true] %s31_s20 }
   0x3   :  { %13 = vsyncpa [#allocation4], 0  ;;  %s3047_s21 = smov [#allocation5]   ;;  %s18_s25 = sshll.u32 %s4917_s0, 4  ;;  %s19_s25 = int_to_ptr.hbm [resolvable:$true] %s18_s25 }
   0x4   :  { %s33_s22 = sshll.u32 %s3047_s21, 4  ;;  %s3048_s26 = smov 512   ;;  %s34_s22 = int_to_ptr.vmem [resolvable:$true] %s33_s22 }
   0x5   :  { %s3049_s27 = smov 32   ;;  %s3050_s28 = smov [#allocation2]  }
   0x6   :  { %39 = dma.hbm_to_vmem [thread:$0]  %s32_s20, 8192, %s34_s22, [#allocation6], %s3048_s26, %s3048_s26, %s3049_s27  }
   0x7   :  { %s20_s29 = sshll.u32 %s3050_s28, 4  ;;  %s3051_s30 = smov 128   ;;  %s21_s29 = int_to_ptr.vmem [resolvable:$true] %s20_s29 }
   0x8   :  { %s3052_s6 = smov 8   ;;  %s45_s8 = sshll.u32 %s4919_s2, 4  ;;  %s46_s8 = int_to_ptr.hbm [resolvable:$true] %s45_s8 }
   0x9   :  { %26 = dma.hbm_to_vmem [thread:$0]  %s19_s25, 2048, %s21_s29, [#allocation3], %s3051_s30, %s3051_s30, %s3052_s6  }
   0xa   :  { %s3053_s9 = smov [#allocation7]   ;;  %s55_s12 = sshll.u32 %s4920_s3, 4  ;;  %s56_s12 = int_to_ptr.hbm [resolvable:$true] %s55_s12 }
   0xb   :  { %s47_s0 = sshll.u32 %s3053_s9, 4  ;;  %s3054_s13 = smov [#allocation8]   ;;  %s48_s0 = int_to_ptr.vmem [resolvable:$true] %s47_s0 }
   0xc   :  { %50 = dma.hbm_to_vmem [thread:$0]  %s46_s8, 64, %s48_s0, [#allocation6]  }
   0xd   :  { %s57_s14 = sshll.u32 %s3054_s13, 4  ;;  %s58_s14 = int_to_ptr.vmem [resolvable:$true] %s57_s14 }
   0xe   :  { %63 = dma.hbm_to_vmem [thread:$0]  %s56_s12, 8192, %s58_s14, [#allocation9], %s3051_s30, %s3051_s30, %s3052_s6  }
   0xf   :  { %3039 = dma.done.wait [#allocation3], 2048  }
  0x10   :  { %3040 = vsyncadd [#allocation3], 4294965248 }
  0x11   :  { %3041 = dma.done.wait [#allocation6], 8256  }
  0x12   :  { %3042 = vsyncadd [#allocation6], 4294959040 }
  0x13   :  { %3043 = dma.done.wait [#allocation9], 8192  }
  0x14   :  { %3044 = vsyncadd [#allocation9], 4294959104  ;;  %v158_v0 = vld [vmem:[#allocation5 + $0x1e0] sm:$0xff]  ;;  %v159_v1 = vld [vmem:[#allocation5 + $0x1e8] sm:$0xff]  ;;  %s2638_s18 = sshll.u32 %s4922_s5, 4  ;;  %s2639_s18 = int_to_ptr.hbm [resolvable:$true] %s2638_s18 }
  0x15   :  { %v160_v2 = vld [vmem:[#allocation5 + $0x1f0] sm:$0xff]  ;;  %172 = vmatpush.msra.mxu0 %v158_v0  ;;  %237 = vmatpush.msra.mxu1 %v159_v1  ;;  %v161_v3 = vld [vmem:[#allocation5 + $0x1f8] sm:$0xff]  ;;  %v154_v4 = vld [vmem:[#allocation5 + $0x1c0] sm:$0xff] }
  0x16   :  { %v155_v5 = vld [vmem:[#allocation5 + $0x1c8] sm:$0xff]  ;;  %302 = vmatpush.msra.mxu2 %v160_v2  ;;  %367 = vmatpush.msra.mxu3 %v161_v3  ;;  %v156_v6 = vld [vmem:[#allocation5 + $0x1d0] sm:$0xff]  ;;  %v157_v7 = vld [vmem:[#allocation5 + $0x1d8] sm:$0xff] }
  0x17   :  { %v150_v8 = vld [vmem:[#allocation5 + $0x1a0] sm:$0xff]  ;;  %173 = vmatpush.msra.mxu0 %v154_v4  ;;  %238 = vmatpush.msra.mxu1 %v155_v5  ;;  %v151_v9 = vld [vmem:[#allocation5 + $0x1a8] sm:$0xff]  ;;  %v152_v10 = vld [vmem:[#allocation5 + $0x1b0] sm:$0xff] }
  0x18   :  { %v153_v11 = vld [vmem:[#allocation5 + $0x1b8] sm:$0xff]  ;;  %303 = vmatpush.msra.mxu2 %v156_v6  ;;  %368 = vmatpush.msra.mxu3 %v157_v7  ;;  %v146_v12 = vld [vmem:[#allocation5 + $0x180] sm:$0xff]  ;;  %v147_v13 = vld [vmem:[#allocation5 + $0x188] sm:$0xff] }
  0x19   :  { %174 = vmatpush.msra.mxu0 %v150_v8  ;;  %239 = vmatpush.msra.mxu1 %v151_v9  ;;  %v148_v14 = vld [vmem:[#allocation5 + $0x190] sm:$0xff]  ;;  %v149_v15 = vld [vmem:[#allocation5 + $0x198] sm:$0xff]  ;;  %v142_v16 = vld [vmem:[#allocation5 + $0x160] sm:$0xff] }
  0x1a   :  { %304 = vmatpush.msra.mxu2 %v152_v10  ;;  %369 = vmatpush.msra.mxu3 %v153_v11  ;;  %v143_v17 = vld [vmem:[#allocation5 + $0x168] sm:$0xff]  ;;  %v144_v18 = vld [vmem:[#allocation5 + $0x170] sm:$0xff]  ;;  %v145_v19 = vld [vmem:[#allocation5 + $0x178] sm:$0xff] }
  0x1b   :  { %175 = vmatpush.msra.mxu0 %v146_v12  ;;  %240 = vmatpush.msra.mxu1 %v147_v13  ;;  %v138_v20 = vld [vmem:[#allocation5 + $0x140] sm:$0xff]  ;;  %v139_v21 = vld [vmem:[#allocation5 + $0x148] sm:$0xff]  ;;  %v140_v22 = vld [vmem:[#allocation5 + $0x150] sm:$0xff] }
  0x1c   :  { %305 = vmatpush.msra.mxu2 %v148_v14  ;;  %370 = vmatpush.msra.mxu3 %v149_v15  ;;  %v141_v23 = vld [vmem:[#allocation5 + $0x158] sm:$0xff]  ;;  %v134_v24 = vld [vmem:[#allocation5 + $0x120] sm:$0xff]  ;;  %v135_v25 = vld [vmem:[#allocation5 + $0x128] sm:$0xff] }
  0x1d   :  { %176 = vmatpush.msra.mxu0 %v142_v16  ;;  %241 = vmatpush.msra.mxu1 %v143_v17  ;;  %v136_v26 = vld [vmem:[#allocation5 + $0x130] sm:$0xff]  ;;  %v137_v27 = vld [vmem:[#allocation5 + $0x138] sm:$0xff]  ;;  %v130_v28 = vld [vmem:[#allocation5 + $0x100] sm:$0xff] }
  0x1e   :  { %306 = vmatpush.msra.mxu2 %v144_v18  ;;  %371 = vmatpush.msra.mxu3 %v145_v19  ;;  %v131_v29 = vld [vmem:[#allocation5 + $0x108] sm:$0xff]  ;;  %v132_v30 = vld [vmem:[#allocation5 + $0x110] sm:$0xff]  ;;  %v133_v31 = vld [vmem:[#allocation5 + $0x118] sm:$0xff] }
  0x1f   :  { %177 = vmatpush.msra.mxu0 %v138_v20  ;;  %242 = vmatpush.msra.mxu1 %v139_v21  ;;  %v126_v32 = vld [vmem:[#allocation5 + $0xe0] sm:$0xff]  ;;  %v127_v33 = vld [vmem:[#allocation5 + $0xe8] sm:$0xff]  ;;  %v128_v34 = vld [vmem:[#allocation5 + $0xf0] sm:$0xff] }
  0x20   :  { %307 = vmatpush.msra.mxu2 %v140_v22  ;;  %372 = vmatpush.msra.mxu3 %v141_v23  ;;  %v129_v35 = vld [vmem:[#allocation5 + $0xf8] sm:$0xff]  ;;  %v122_v36 = vld [vmem:[#allocation5 + $0xc0] sm:$0xff]  ;;  %v123_v37 = vld [vmem:[#allocation5 + $0xc8] sm:$0xff] }
  0x21   :  { %178 = vmatpush.msra.mxu0 %v134_v24  ;;  %243 = vmatpush.msra.mxu1 %v135_v25  ;;  %v124_v38 = vld [vmem:[#allocation5 + $0xd0] sm:$0xff]  ;;  %v125_v39 = vld [vmem:[#allocation5 + $0xd8] sm:$0xff]  ;;  %v118_v40 = vld [vmem:[#allocation5 + $0xa0] sm:$0xff] }
  0x22   :  { %308 = vmatpush.msra.mxu2 %v136_v26  ;;  %373 = vmatpush.msra.mxu3 %v137_v27  ;;  %v119_v41 = vld [vmem:[#allocation5 + $0xa8] sm:$0xff]  ;;  %v120_v42 = vld [vmem:[#allocation5 + $0xb0] sm:$0xff]  ;;  %v121_v43 = vld [vmem:[#allocation5 + $0xb8] sm:$0xff] }
  0x23   :  { %179 = vmatpush.msra.mxu0 %v130_v28  ;;  %244 = vmatpush.msra.mxu1 %v131_v29  ;;  %v114_v44 = vld [vmem:[#allocation5 + $0x80] sm:$0xff]  ;;  %v115_v45 = vld [vmem:[#allocation5 + $0x88] sm:$0xff]  ;;  %v116_v46 = vld [vmem:[#allocation5 + $0x90] sm:$0xff] }
  0x24   :  { %309 = vmatpush.msra.mxu2 %v132_v30  ;;  %374 = vmatpush.msra.mxu3 %v133_v31  ;;  %v117_v47 = vld [vmem:[#allocation5 + $0x98] sm:$0xff]  ;;  %v110_v48 = vld [vmem:[#allocation5 + $0x60] sm:$0xff]  ;;  %v111_v49 = vld [vmem:[#allocation5 + $0x68] sm:$0xff] }
  0x25   :  { %180 = vmatpush.msra.mxu0 %v126_v32  ;;  %245 = vmatpush.msra.mxu1 %v127_v33  ;;  %v112_v50 = vld [vmem:[#allocation5 + $0x70] sm:$0xff]  ;;  %v113_v51 = vld [vmem:[#allocation5 + $0x78] sm:$0xff]  ;;  %v106_v52 = vld [vmem:[#allocation5 + $0x40] sm:$0xff] }
  0x26   :  { %310 = vmatpush.msra.mxu2 %v128_v34  ;;  %375 = vmatpush.msra.mxu3 %v129_v35  ;;  %v107_v53 = vld [vmem:[#allocation5 + $0x48] sm:$0xff]  ;;  %v108_v54 = vld [vmem:[#allocation5 + $0x50] sm:$0xff]  ;;  %v109_v55 = vld [vmem:[#allocation5 + $0x58] sm:$0xff] }
  0x27   :  { %181 = vmatpush.msra.mxu0 %v122_v36  ;;  %246 = vmatpush.msra.mxu1 %v123_v37  ;;  %v102_v56 = vld [vmem:[#allocation5 + $0x20] sm:$0xff]  ;;  %v103_v57 = vld [vmem:[#allocation5 + $0x28] sm:$0xff]  ;;  %v104_v58 = vld [vmem:[#allocation5 + $0x30] sm:$0xff] }
  0x28   :  { %311 = vmatpush.msra.mxu2 %v124_v38  ;;  %376 = vmatpush.msra.mxu3 %v125_v39  ;;  %v105_v59 = vld [vmem:[#allocation5 + $0x38] sm:$0xff]  ;;  %v98_v60 = vld [vmem:[#allocation5] sm:$0xff]  ;;  %v99_v61 = vld [vmem:[#allocation5 + $0x8] sm:$0xff] }
  0x29   :  { %182 = vmatpush.msra.mxu0 %v118_v40  ;;  %247 = vmatpush.msra.mxu1 %v119_v41  ;;  %v100_v62 = vld [vmem:[#allocation5 + $0x10] sm:$0xff]  ;;  %v101_v63 = vld [vmem:[#allocation5 + $0x18] sm:$0xff]  ;;  %v82_v0 = vld [vmem:[#allocation2] sm:$0xff] }
  0x2a   :  { %312 = vmatpush.msra.mxu2 %v120_v42  ;;  %377 = vmatpush.msra.mxu3 %v121_v43  ;;  %v83_v1 = vld [vmem:[#allocation2 + $0x8] sm:$0xff]  ;;  %v84_v2 = vld [vmem:[#allocation2 + $0x10] sm:$0xff]  ;;  %v85_v3 = vld [vmem:[#allocation2 + $0x18] sm:$0xff] }
  0x2b   :  { %183 = vmatpush.msra.mxu0 %v114_v44  ;;  %248 = vmatpush.msra.mxu1 %v115_v45  ;;  %v2335_v4 = vld [vmem:[#allocation8 + $0x178] sm:$0xff]  ;;  %v2334_v9 = vld [vmem:[#allocation8 + $0x170] sm:$0xff]  ;;  %v87_v13 = vld [vmem:[#allocation2 + $0x28] sm:$0xff] }
  0x2c   :  { %313 = vmatpush.msra.mxu2 %v116_v46  ;;  %378 = vmatpush.msra.mxu3 %v117_v47  ;;  %v2303_v5 = vld [vmem:[#allocation8 + $0x78] sm:$0xff]  ;;  %v2302_v10 = vld [vmem:[#allocation8 + $0x70] sm:$0xff]  ;;  %v2333_v14 = vld [vmem:[#allocation8 + $0x168] sm:$0xff] }
  0x2d   :  { %184 = vmatpush.msra.mxu0 %v110_v48  ;;  %249 = vmatpush.msra.mxu1 %v111_v49  ;;  %v2351_v6 = vld [vmem:[#allocation8 + $0x1f8] sm:$0xff]  ;;  %v2350_v11 = vld [vmem:[#allocation8 + $0x1f0] sm:$0xff]  ;;  %v2301_v15 = vld [vmem:[#allocation8 + $0x68] sm:$0xff] }
  0x2e   :  { %314 = vmatpush.msra.mxu2 %v112_v50  ;;  %379 = vmatpush.msra.mxu3 %v113_v51  ;;  %v2319_v7 = vld [vmem:[#allocation8 + $0xf8] sm:$0xff]  ;;  %v2318_v12 = vld [vmem:[#allocation8 + $0xf0] sm:$0xff]  ;;  %v2349_v16 = vld [vmem:[#allocation8 + $0x1e8] sm:$0xff] }
  0x2f   :  { %185 = vmatpush.msra.mxu0 %v106_v52  ;;  %250 = vmatpush.msra.mxu1 %v107_v53  ;;  %v86_v8 = vld [vmem:[#allocation2 + $0x20] sm:$0xff]  ;;  %v2317_v17 = vld [vmem:[#allocation8 + $0xe8] sm:$0xff]  ;;  %v89_v23 = vld [vmem:[#allocation2 + $0x38] sm:$0xff] }
  0x30   :  { %315 = vmatpush.msra.mxu2 %v108_v54  ;;  %380 = vmatpush.msra.mxu3 %v109_v55  ;;  %v88_v18 = vld [vmem:[#allocation2 + $0x30] sm:$0xff]  ;;  %v2332_v19 = vld [vmem:[#allocation8 + $0x160] sm:$0xff]  ;;  %v2331_v24 = vld [vmem:[#allocation8 + $0x158] sm:$0xff] }
  0x31   :  { %186 = vmatpush.msra.mxu0 %v102_v56  ;;  %251 = vmatpush.msra.mxu1 %v103_v57  ;;  %v2300_v20 = vld [vmem:[#allocation8 + $0x60] sm:$0xff]  ;;  %v2299_v25 = vld [vmem:[#allocation8 + $0x58] sm:$0xff]  ;;  %v2330_v29 = vld [vmem:[#allocation8 + $0x150] sm:$0xff] }
  0x32   :  { %316 = vmatpush.msra.mxu2 %v104_v58  ;;  %381 = vmatpush.msra.mxu3 %v105_v59  ;;  %v2348_v21 = vld [vmem:[#allocation8 + $0x1e0] sm:$0xff]  ;;  %v2347_v26 = vld [vmem:[#allocation8 + $0x1d8] sm:$0xff]  ;;  %v2298_v30 = vld [vmem:[#allocation8 + $0x50] sm:$0xff] }
  0x33   :  { %187 = vmatpush.msra.mxu0 %v98_v60  ;;  %252 = vmatpush.msra.mxu1 %v99_v61  ;;  %v2316_v22 = vld [vmem:[#allocation8 + $0xe0] sm:$0xff]  ;;  %v2315_v27 = vld [vmem:[#allocation8 + $0xd8] sm:$0xff]  ;;  %v2346_v31 = vld [vmem:[#allocation8 + $0x1d0] sm:$0xff] }
  0x34   :  { %317 = vmatpush.msra.mxu2 %v100_v62  ;;  %382 = vmatpush.msra.mxu3 %v101_v63  ;;  %v90_v28 = vld [vmem:[#allocation2 + $0x40] sm:$0xff]  ;;  %v2314_v32 = vld [vmem:[#allocation8 + $0xd0] sm:$0xff]  ;;  %v91_v33 = vld [vmem:[#allocation2 + $0x48] sm:$0xff] }
  0x35   :  { %188 = vmatmul.f32.vlgmr.msra.gmra.mxu0 %v82_v0  ;;  %253 = vmatmul.f32.vlgmr.msra.gmra.mxu1 %v82_v0  ;;  %v2329_v34 = vld [vmem:[#allocation8 + $0x148] sm:$0xff]  ;;  %v2328_v39 = vld [vmem:[#allocation8 + $0x140] sm:$0xff]  ;;  %v93_v43 = vld [vmem:[#allocation2 + $0x58] sm:$0xff] }
  0x36   :  { %318 = vmatmul.f32.vlgmr.msra.gmra.mxu2 %v82_v0  ;;  %383 = vmatmul.f32.vlgmr.msra.gmra.mxu3 %v82_v0  ;;  %v2297_v35 = vld [vmem:[#allocation8 + $0x48] sm:$0xff]  ;;  %v2296_v40 = vld [vmem:[#allocation8 + $0x40] sm:$0xff]  ;;  %v2327_v44 = vld [vmem:[#allocation8 + $0x138] sm:$0xff] }
  0x37   :  { %2486 = vmatpush.msrb.mxu2 %v2335_v4  ;;  %2356 = vmatpush.msrb.mxu0 %v2303_v5  ;;  %v2345_v36 = vld [vmem:[#allocation8 + $0x1c8] sm:$0xff]  ;;  %v2344_v41 = vld [vmem:[#allocation8 + $0x1c0] sm:$0xff]  ;;  %v2295_v45 = vld [vmem:[#allocation8 + $0x38] sm:$0xff] }
  0x38   :  { %2551 = vmatpush.msrb.mxu3 %v2351_v6  ;;  %2421 = vmatpush.msrb.mxu1 %v2319_v7  ;;  %v2313_v37 = vld [vmem:[#allocation8 + $0xc8] sm:$0xff]  ;;  %v2312_v42 = vld [vmem:[#allocation8 + $0xc0] sm:$0xff]  ;;  %v2343_v46 = vld [vmem:[#allocation8 + $0x1b8] sm:$0xff] }
  0x39   :  { %2487 = vmatpush.msrb.mxu2 %v2334_v9  ;;  %2357 = vmatpush.msrb.mxu0 %v2302_v10  ;;  %v92_v38 = vld [vmem:[#allocation2 + $0x50] sm:$0xff]  ;;  %v2311_v47 = vld [vmem:[#allocation8 + $0xb8] sm:$0xff]  ;;  %v95_v49 = vld [vmem:[#allocation2 + $0x68] sm:$0xff] }
  0x3a   :  { %2552 = vmatpush.msrb.mxu3 %v2350_v11  ;;  %2422 = vmatpush.msrb.mxu1 %v2318_v12  ;;  %v94_v48 = vld [vmem:[#allocation2 + $0x60] sm:$0xff]  ;;  %v96_v50 = vld [vmem:[#allocation2 + $0x70] sm:$0xff]  ;;  %v97_v54 = vld [vmem:[#allocation2 + $0x78] sm:$0xff] }
  0x3b   :  { %2488 = vmatpush.msrb.mxu2 %v2333_v14  ;;  %2358 = vmatpush.msrb.mxu0 %v2301_v15  ;;  %v2326_v51 = vld [vmem:[#allocation8 + $0x130] sm:$0xff]  ;;  %v162_v56 = vld [vmem:[#allocation7] sm:$0xf]  ;;  %v2325_v58 = vld [vmem:[#allocation8 + $0x128] sm:$0xff] }
  0x3c   :  { %2553 = vmatpush.msrb.mxu3 %v2349_v16  ;;  %2423 = vmatpush.msrb.mxu1 %v2317_v17  ;;  %v2294_v52 = vld [vmem:[#allocation8 + $0x30] sm:$0xff]  ;;  %v3104_v57 = vperm.slane %v162_v56, 0  ;;  %v2293_v59 = vld [vmem:[#allocation8 + $0x28] sm:$0xff]  ;;  %v3106_v62 = vperm.slane %v162_v56, 1  ;;  %v3122_v6 = vperm.slane %v162_v56, 3  ;;  %v2324_v16 = vld [vmem:[#allocation8 + $0x120] sm:$0xff] }
  0x3d   :  { %191 = vmatmul.f32.gmra.mxu0 %v83_v1  ;;  %256 = vmatmul.f32.gmra.mxu1 %v83_v1  ;;  %v2342_v53 = vld [vmem:[#allocation8 + $0x1b0] sm:$0xff]  ;;  %v2341_v60 = vld [vmem:[#allocation8 + $0x1a8] sm:$0xff]  ;;  %v2292_v17 = vld [vmem:[#allocation8 + $0x20] sm:$0xff] }
  0x3e   :  { %321 = vmatmul.f32.gmra.mxu2 %v83_v1  ;;  %386 = vmatmul.f32.gmra.mxu3 %v83_v1  ;;  %v2310_v55 = vld [vmem:[#allocation8 + $0xb0] sm:$0xff]  ;;  %v2309_v7 = vld [vmem:[#allocation8 + $0xa8] sm:$0xff] }
  0x3f   :  { %2489 = vmatpush.msrb.mxu2 %v2332_v19  ;;  %2359 = vmatpush.msrb.mxu0 %v2300_v20 }
  0x40   :  { %2554 = vmatpush.msrb.mxu3 %v2348_v21  ;;  %2424 = vmatpush.msrb.mxu1 %v2316_v22 }
  0x41   :  { %2490 = vmatpush.msrb.mxu2 %v2331_v24  ;;  %2360 = vmatpush.msrb.mxu0 %v2299_v25 }
  0x42   :  { %2555 = vmatpush.msrb.mxu3 %v2347_v26  ;;  %2425 = vmatpush.msrb.mxu1 %v2315_v27 }
  0x43   :  { %2491 = vmatpush.msrb.mxu2 %v2330_v29  ;;  %2361 = vmatpush.msrb.mxu0 %v2298_v30 }
  0x44   :  { %2556 = vmatpush.msrb.mxu3 %v2346_v31  ;;  %2426 = vmatpush.msrb.mxu1 %v2314_v32  ;;  %v2308_v32 = vld [vmem:[#allocation8 + $0xa0] sm:$0xff] }
  0x45   :  { %194 = vmatmul.f32.gmra.mxu0 %v84_v2  ;;  %259 = vmatmul.f32.gmra.mxu1 %v84_v2 }
  0x46   :  { %324 = vmatmul.f32.gmra.mxu2 %v84_v2  ;;  %389 = vmatmul.f32.gmra.mxu3 %v84_v2  ;;  %v3114_v2 = vperm.slane %v162_v56, 2 }
  0x47   :  { %2492 = vmatpush.msrb.mxu2 %v2329_v34  ;;  %2362 = vmatpush.msrb.mxu0 %v2297_v35 }
  0x48   :  { %2557 = vmatpush.msrb.mxu3 %v2345_v36  ;;  %2427 = vmatpush.msrb.mxu1 %v2313_v37 }
  0x49   :  { %2493 = vmatpush.msrb.mxu2 %v2328_v39  ;;  %2363 = vmatpush.msrb.mxu0 %v2296_v40 }
  0x4a   :  { %2558 = vmatpush.msrb.mxu3 %v2344_v41  ;;  %2428 = vmatpush.msrb.mxu1 %v2312_v42 }
  0x4b   :  { %2494 = vmatpush.msrb.mxu2 %v2327_v44  ;;  %2364 = vmatpush.msrb.mxu0 %v2295_v45 }
  0x4c   :  { %2559 = vmatpush.msrb.mxu3 %v2343_v46  ;;  %2429 = vmatpush.msrb.mxu1 %v2311_v47 }
  0x4d   :  { %197 = vmatmul.f32.gmra.mxu0 %v85_v3  ;;  %262 = vmatmul.f32.gmra.mxu1 %v85_v3 }
  0x4e   :  { %327 = vmatmul.f32.gmra.mxu2 %v85_v3  ;;  %392 = vmatmul.f32.gmra.mxu3 %v85_v3 }
  0x4f   :  { %2495 = vmatpush.msrb.mxu2 %v2326_v51  ;;  %2365 = vmatpush.msrb.mxu0 %v2294_v52 }
  0x50   :  { %2560 = vmatpush.msrb.mxu3 %v2342_v53  ;;  %2430 = vmatpush.msrb.mxu1 %v2310_v55 }
  0x51   :  { %2496 = vmatpush.msrb.mxu2 %v2325_v58  ;;  %2366 = vmatpush.msrb.mxu0 %v2293_v59 }
  0x52   :  { %2561 = vmatpush.msrb.mxu3 %v2341_v60  ;;  %2431 = vmatpush.msrb.mxu1 %v2309_v7 }
  0x53   :  { %2497 = vmatpush.msrb.mxu2 %v2324_v16  ;;  %2367 = vmatpush.msrb.mxu0 %v2292_v17 }
  0x54   :  { %2432 = vmatpush.msrb.mxu1 %v2308_v32 }
  0x55   :  { %200 = vmatmul.f32.gmra.mxu0 %v86_v8  ;;  %265 = vmatmul.f32.gmra.mxu1 %v86_v8 }
  0x56   :  { %330 = vmatmul.f32.gmra.mxu2 %v86_v8  ;;  %395 = vmatmul.f32.gmra.mxu3 %v86_v8 }
  0x5d   :  { %203 = vmatmul.f32.gmra.mxu0 %v87_v13  ;;  %268 = vmatmul.f32.gmra.mxu1 %v87_v13 }
  0x5e   :  { %333 = vmatmul.f32.gmra.mxu2 %v87_v13  ;;  %398 = vmatmul.f32.gmra.mxu3 %v87_v13 }
  0x65   :  { %206 = vmatmul.f32.gmra.mxu0 %v88_v18  ;;  %271 = vmatmul.f32.gmra.mxu1 %v88_v18 }
  0x66   :  { %336 = vmatmul.f32.gmra.mxu2 %v88_v18  ;;  %401 = vmatmul.f32.gmra.mxu3 %v88_v18  ;;  %v2340_v18 = vld [vmem:[#allocation8 + $0x1a0] sm:$0xff] }
  0x67   :  { %2562 = vmatpush.msrb.mxu3 %v2340_v18 }
  0x6d   :  { %209 = vmatmul.f32.gmra.mxu0 %v89_v23  ;;  %274 = vmatmul.f32.gmra.mxu1 %v89_v23 }
  0x6e   :  { %339 = vmatmul.f32.gmra.mxu2 %v89_v23  ;;  %404 = vmatmul.f32.gmra.mxu3 %v89_v23 }
  0x75   :  { %212 = vmatmul.f32.gmra.mxu0 %v90_v28  ;;  %277 = vmatmul.f32.gmra.mxu1 %v90_v28 }
  0x76   :  { %342 = vmatmul.f32.gmra.mxu2 %v90_v28  ;;  %407 = vmatmul.f32.gmra.mxu3 %v90_v28 }
  0x7d   :  { %215 = vmatmul.f32.gmra.mxu0 %v91_v33  ;;  %280 = vmatmul.f32.gmra.mxu1 %v91_v33 }
  0x7e   :  { %345 = vmatmul.f32.gmra.mxu2 %v91_v33  ;;  %410 = vmatmul.f32.gmra.mxu3 %v91_v33 }
  0x85   :  { %218 = vmatmul.f32.gmra.mxu0 %v92_v38  ;;  %283 = vmatmul.f32.gmra.mxu1 %v92_v38 }
  0x86   :  { %348 = vmatmul.f32.gmra.mxu2 %v92_v38  ;;  %413 = vmatmul.f32.gmra.mxu3 %v92_v38 }
  0x8d   :  { %221 = vmatmul.f32.gmra.mxu0 %v93_v43  ;;  %286 = vmatmul.f32.gmra.mxu1 %v93_v43 }
  0x8e   :  { %351 = vmatmul.f32.gmra.mxu2 %v93_v43  ;;  %416 = vmatmul.f32.gmra.mxu3 %v93_v43 }
  0x95   :  { %224 = vmatmul.f32.gmra.mxu0 %v94_v48  ;;  %289 = vmatmul.f32.gmra.mxu1 %v94_v48 }
  0x96   :  { %354 = vmatmul.f32.gmra.mxu2 %v94_v48  ;;  %419 = vmatmul.f32.gmra.mxu3 %v94_v48 }
  0x9d   :  { %227 = vmatmul.f32.gmra.mxu0 %v95_v49  ;;  %292 = vmatmul.f32.gmra.mxu1 %v95_v49 }
  0x9e   :  { %357 = vmatmul.f32.gmra.mxu2 %v95_v49  ;;  %422 = vmatmul.f32.gmra.mxu3 %v95_v49 }
  0xa5   :  { %230 = vmatmul.f32.gmra.mxu0 %v96_v50  ;;  %295 = vmatmul.f32.gmra.mxu1 %v96_v50 }
  0xa6   :  { %360 = vmatmul.f32.gmra.mxu2 %v96_v50  ;;  %425 = vmatmul.f32.gmra.mxu3 %v96_v50 }
  0xad   :  { %233 = vmatmul.f32.gmra.mxu0 %v97_v54  ;;  %298 = vmatmul.f32.gmra.mxu1 %v97_v54 }
  0xae   :  { %363 = vmatmul.f32.gmra.mxu2 %v97_v54  ;;  %428 = vmatmul.f32.gmra.mxu3 %v97_v54 }
  0xb2   :  { %v189_v61 = vpop.f32.mrf.mxu0  ;;  %v254_v63 = vpop.f32.mrf.mxu1 }
  0xb3   :  { %v3109_v0 = vadd.f32 %v189_v61, %v3104_v57  ;;  %v3112_v1 = vadd.f32 %v254_v63, %v3106_v62  ;;  %v2291_v61 = vld [vmem:[#allocation8 + $0x18] sm:$0xff] }
  0xb4   :  { %v2307_v63 = vld [vmem:[#allocation8 + $0x98] sm:$0xff]  ;;  %2368 = vmatpush.msrb.mxu0 %v2291_v61 }
  0xb5   :  { %v3117_v4 = vmul.f32 0.70710677, %v3109_v0  ;;  %v3120_v5 = vmul.f32 0.70710677, %v3112_v1  ;;  %v3189_v7 = vmul.f32 0.5, %v3112_v1  ;;  %2433 = vmatpush.msrb.mxu1 %v2307_v63  ;;  %v2339_v1 = vld [vmem:[#allocation8 + $0x198] sm:$0xff] }
  0xb6   :  { %2563 = vmatpush.msrb.mxu3 %v2339_v1 }
  0xb7   :  { %v560_v10 = vand.u32 2147483647, %v3117_v4  ;;  %v561_v12 = vand.u32 2147483647, %v3120_v5  ;;  %vm1968_vm0 = vcmp.ge.f32.partialorder %v3117_v4, 0.0  ;;  %vm1969_vm1 = vcmp.ge.f32.partialorder %v3120_v5, 0.0 }
  0xb9   :  { %v319_v3 = vpop.f32.mrf.mxu2  ;;  %v384_v9 = vpop.f32.mrf.mxu3  ;;  %v624_v20 = vmul.f32 0.3275911, %v560_v10  ;;  %v625_v23 = vmul.f32 0.3275911, %v561_v12  ;;  %v1584_v29 = vsub.f32 0.0, %v560_v10  ;;  %v1585_v41 = vsub.f32 0.0, %v561_v12 }
  0xba   :  { %v3125_v8 = vadd.f32 %v319_v3, %v3114_v2  ;;  %v192_v11 = vpop.f32.mrf.mxu0  ;;  %v3130_v13 = vadd.f32 %v384_v9, %v3122_v6  ;;  %v257_v14 = vpop.f32.mrf.mxu1  ;;  %v3186_v3 = vmul.f32 0.5, %v3109_v0 }
  0xbb   :  { %v3136_v19 = vadd.f32 %v192_v11, %v3104_v57  ;;  %v3139_v21 = vadd.f32 %v257_v14, %v3106_v62  ;;  %v688_v27 = vadd.f32 1.0, %v624_v20  ;;  %v689_v33 = vadd.f32 1.0, %v625_v23  ;;  %v2323_v11 = vld [vmem:[#allocation8 + $0x118] sm:$0xff] }
  0xbc   :  { %v3133_v15 = vmul.f32 0.70710677, %v3125_v8  ;;  %v3142_v22 = vmul.f32 0.70710677, %v3130_v13  ;;  %v1648_v40 = vmul.f32 %v1584_v29, %v560_v10  ;;  %v1649_v52 = vmul.f32 %v1585_v41, %v561_v12  ;;  %2498 = vmatpush.msrb.mxu2 %v2323_v11  ;;  %v2290_v41 = vld [vmem:[#allocation8 + $0x10] sm:$0xff] }
  0xbd   :  { %v3146_v25 = vmul.f32 0.70710677, %v3136_v19  ;;  %v3149_v28 = vmul.f32 0.70710677, %v3139_v21  ;;  %2663 = vrcp.f32 %v688_v27  ;;  %v3199_v14 = vmul.f32 0.5, %v3125_v8  ;;  %2369 = vmatpush.msrb.mxu0 %v2290_v41 }
  0xbe   :  { %v562_v24 = vand.u32 2147483647, %v3133_v15  ;;  %v563_v30 = vand.u32 2147483647, %v3142_v22  ;;  %2665 = vrcp.f32 %v689_v33  ;;  %v1712_v58 = vmul.f32 1.442695, %v1648_v40 }
  0xbf   :  { %v564_v37 = vand.u32 2147483647, %v3146_v25  ;;  %v3157_v38 = vand.u32 2147483647, %v3149_v28  ;;  %v1714_v8 = vmul.f32 1.442695, %v1649_v52 }
  0xc0   :  { %v626_v34 = vmul.f32 0.3275911, %v562_v24  ;;  %v627_v42 = vmul.f32 0.3275911, %v563_v30  ;;  %v1586_v45 = vsub.f32 0.0, %v562_v24  ;;  %v1587_v48 = vsub.f32 0.0, %v563_v30 }
  0xc1   :  { %v322_v26 = vpop.f32.mrf.mxu2  ;;  %v387_v31 = vpop.f32.mrf.mxu3  ;;  %v628_v47 = vmul.f32 0.3275911, %v564_v37  ;;  %v629_v49 = vmul.f32 0.3275911, %v3157_v38  ;;  %v1588_v54 = vsub.f32 0.0, %v564_v37  ;;  %v2306_v52 = vld [vmem:[#allocation8 + $0x90] sm:$0xff] }
  0xc2   :  { %v3153_v35 = vadd.f32 %v322_v26, %v3114_v2  ;;  %v195_v36 = vpop.f32.mrf.mxu0  ;;  %v3160_v39 = vadd.f32 %v387_v31, %v3122_v6  ;;  %v3165_v44 = vadd.f32 1.0, %v626_v34  ;;  %v260_v51 = vpop.f32.mrf.mxu1  ;;  %v3174_v53 = vadd.f32 1.0, %v627_v42  ;;  %2434 = vmatpush.msrb.mxu1 %v2306_v52 }
  0xc3   :  { %v3163_v43 = vadd.f32 %v195_v36, %v3104_v57  ;;  %v3179_v56 = vpop.eup %2663  ;;  %v1650_v59 = vmul.f32 %v1586_v45, %v562_v24  ;;  %v3191_v9 = vadd.f32 1.0, %v628_v47  ;;  %v3194_v10 = vadd.f32 %v260_v51, %v3106_v62 }
  0xc4   :  { %5082 = vst [vmem:[#allocation15_spill] sm:$0xff] %v3153_v35  ;;  %v3168_v46 = vmul.f32 0.70710677, %v3153_v35  ;;  %v3172_v50 = vmul.f32 0.70710677, %v3160_v39  ;;  %2667 = vrcp.f32 %v3165_v44  ;;  %v3196_v12 = vpop.eup %2665  ;;  %v1651_v16 = vmul.f32 %v1587_v48, %v563_v30 }
  0xc5   :  { %5083 = vst [vmem:[#allocation16_spill] sm:$0xff] %v3160_v39  ;;  %v3177_v55 = vmul.f32 0.70710677, %v3163_v43  ;;  %v3201_v17 = vadd.f32 1.0, %v629_v49  ;;  %v816_v18 = vmul.f32 %v3179_v56, %v688_v27  ;;  %2669 = vrcp.f32 %v3174_v53 }
  0xc6   :  { %5084 = vst [vmem:[#allocation17_spill] sm:$0xff] %v3163_v43  ;;  %v3183_v60 = vand.u32 2147483647, %v3168_v46  ;;  %v3204_v0 = vand.u32 2147483647, %v3172_v50  ;;  %v1652_v20 = vmul.f32 %v1588_v54, %v564_v37  ;;  %2671 = vpow2.f32 %v1712_v58 }
  0xc7   :  { %5085 = vst [vmem:[#allocation18_spill] sm:$0xff] %v3168_v46  ;;  %v3209_v23 = vand.u32 2147483647, %v3177_v55  ;;  %v1716_v26 = vmul.f32 1.442695, %v1650_v59  ;;  %v3213_v31 = vmul.f32 %v3196_v12, %v689_v33  ;;  %2673 = vrcp.f32 %v3191_v9 }
  0xc8   :  { %5086 = vst [vmem:[#allocation19_spill] sm:$0xff] %v3172_v50  ;;  %v630_v29 = vmul.f32 0.3275911, %v3183_v60  ;;  %v1589_v27 = vsub.f32 0.0, %v3157_v38  ;;  %v3218_v32 = vmul.f32 0.70710677, %v3194_v10  ;;  %2675 = vrcp.f32 %v3201_v17 }
  0xc9   :  { %5087 = vst [vmem:[#allocation20_spill] sm:$0xff] %v3177_v55  ;;  %v325_v24 = vpop.f32.mrf.mxu2  ;;  %v390_v30 = vpop.f32.mrf.mxu3  ;;  %v1718_v36 = vmul.f32 1.442695, %v1651_v16  ;;  %v631_v37 = vmul.f32 0.3275911, %v3204_v0  ;;  %v880_v33 = vsub.f32 2.0, %v816_v18  ;;  %2677 = vpow2.f32 %v1714_v8 }
  0xca   :  { %5088 = vst [vmem:[#allocation21_spill] sm:$0xff] %v3194_v10  ;;  %v3220_v34 = vpop.eup %2667  ;;  %v3225_v40 = vadd.f32 %v325_v24, %v3114_v2  ;;  %v1720_v42 = vmul.f32 1.442695, %v1652_v20  ;;  %v632_v45 = vmul.f32 0.3275911, %v3209_v23  ;;  %v3229_v47 = vadd.f32 %v390_v30, %v3122_v6  ;;  %v198_v1 = vpop.f32.mrf.mxu0 }
  0xcb   :  { %5089 = vst [vmem:[#allocation22_spill] sm:$0xff] %v3218_v32  ;;  %v3232_v48 = vmul.f32 0.5, %v3130_v13  ;;  %v3234_v49 = vadd.f32 1.0, %v630_v29  ;;  %v1590_v51 = vsub.f32 0.0, %v3183_v60  ;;  %v3237_v54 = vpop.eup %2669  ;;  %v818_v58 = vmul.f32 %v3220_v34, %v3165_v44  ;;  %v263_v24 = vpop.f32.mrf.mxu1 }
  0xcc   :  { %5090 = vst [vmem:[#allocation23_spill] sm:$0xff] %v3225_v40  ;;  %2679 = vpow2.f32 %v1716_v26  ;;  %v1653_v59 = vmul.f32 %v1589_v27, %v3157_v38  ;;  %v3243_v61 = vand.u32 2147483647, %v3218_v32  ;;  %v3245_v63 = vpop.eup %2671  ;;  %v881_v13 = vsub.f32 2.0, %v3213_v31  ;;  %v2338_v31 = vld [vmem:[#allocation8 + $0x190] sm:$0xff] }
  0xcd   :  { %5091 = vst [vmem:[#allocation24_spill] sm:$0xff] %v3229_v47  ;;  %2681 = vpow2.f32 %v1718_v36  ;;  %v3248_v11 = vadd.f32 1.0, %v631_v37  ;;  %v3251_v16 = vmul.f32 0.70710677, %v3225_v40  ;;  %v3253_v18 = vpop.eup %2673  ;;  %v3256_v44 = vmul.f32 %v3179_v56, %v880_v33  ;;  %v2322_v56 = vld [vmem:[#allocation8 + $0x110] sm:$0xff]  ;;  %2564 = vmatpush.msrb.mxu3 %v2338_v31 }
  0xce   :  { %5092 = vst [vmem:[#allocation25_spill] sm:$0xff] %v3232_v48  ;;  %2683 = vpow2.f32 %v1720_v42  ;;  %v3258_v38 = vadd.f32 1.0, %v632_v45  ;;  %v3261_v20 = vmul.f32 0.70710677, %v3229_v47  ;;  %v3263_v8 = vpop.eup %2675  ;;  %v819_v26 = vmul.f32 %v3237_v54, %v3174_v53  ;;  %2499 = vmatpush.msrb.mxu2 %v2322_v56  ;;  %v2289_v42 = vld [vmem:[#allocation8 + $0x8] sm:$0xff] }
  0xcf   :  { %5093 = vst [vmem:[#allocation26_spill] sm:$0xff] %v3251_v16  ;;  %2685 = vrcp.f32 %v3234_v49  ;;  %v1654_v29 = vmul.f32 %v1590_v51, %v3183_v60  ;;  %v1591_v30 = vsub.f32 0.0, %v3204_v0  ;;  %v882_v27 = vsub.f32 2.0, %v818_v58  ;;  %v3274_v53 = vpop.eup %2677  ;;  %2370 = vmatpush.msrb.mxu0 %v2289_v42 }
  0xd0   :  { %5094 = vst [vmem:[#allocation27_spill] sm:$0xff] %v3261_v20  ;;  %v1722_v36 = vmul.f32 1.442695, %v1653_v59  ;;  %v633_v37 = vmul.f32 0.3275911, %v3243_v61  ;;  %v3272_v41 = vadd.f32 %v198_v1, %v3104_v57  ;;  %v820_v60 = vmul.f32 %v3253_v18, %v3191_v9 }
  0xd1   :  { %v328_v33 = vpop.f32.mrf.mxu2  ;;  %2687 = vrcp.f32 %v3248_v11  ;;  %v3280_v45 = vand.u32 2147483647, %v3251_v16  ;;  %v3283_v51 = vadd.f32 %v263_v24, %v3106_v62  ;;  %v821_v58 = vmul.f32 %v3263_v8, %v3201_v17  ;;  %v2305_v16 = vld [vmem:[#allocation8 + $0x88] sm:$0xff] }
  0xd2   :  { %5095 = vst [vmem:[#allocation28_spill] sm:$0xff] %v3272_v41  ;;  %v3285_v52 = vpop.eup %2679  ;;  %2689 = vrcp.f32 %v3258_v38  ;;  %v1592_v59 = vsub.f32 0.0, %v3209_v23  ;;  %v3292_v9 = vand.u32 2147483647, %v3261_v20  ;;  %v883_v56 = vsub.f32 2.0, %v819_v26  ;;  %2435 = vmatpush.msrb.mxu1 %v2305_v16  ;;  %v201_v16 = vpop.f32.mrf.mxu0 }
  0xd3   :  { %5096 = vst [vmem:[#allocation29_spill] sm:$0xff] %v3283_v51  ;;  %v3294_v1 = vpop.eup %2681  ;;  %v1724_v31 = vmul.f32 1.442695, %v1654_v29  ;;  %v1655_v24 = vmul.f32 %v1591_v30, %v3204_v0  ;;  %v3298_v42 = vadd.f32 %v328_v33, %v3114_v2  ;;  %v3303_v17 = vmul.f32 %v3196_v12, %v881_v13  ;;  %v393_v33 = vpop.f32.mrf.mxu3 }
  0xd4   :  { %v3300_v47 = vpop.eup %2683  ;;  %2691 = vpow2.f32 %v1722_v36  ;;  %v3305_v40 = vadd.f32 1.0, %v633_v37  ;;  %v3308_v20 = vmul.f32 0.70710677, %v3272_v41  ;;  %v884_v26 = vsub.f32 2.0, %v820_v60  ;;  %v2321_v41 = vld [vmem:[#allocation8 + $0x108] sm:$0xff] }
  0xd5   :  { %5097 = vst [vmem:[#allocation30_spill] sm:$0xff] %v3298_v42  ;;  %v3310_v10 = vpop.eup %2685  ;;  %v1593_v0 = vsub.f32 0.0, %v3243_v61  ;;  %v634_v29 = vmul.f32 0.3275911, %v3280_v45  ;;  %v3315_v30 = vmul.f32 0.70710677, %v3283_v51  ;;  %v3318_v12 = vmul.f32 %v3220_v34, %v882_v27  ;;  %2500 = vmatpush.msrb.mxu2 %v2321_v41 }
  0xd6   :  { %5098 = vst [vmem:[#allocation31_spill] sm:$0xff] %v3308_v20  ;;  %v885_v13 = vsub.f32 2.0, %v821_v58  ;;  %v1656_v36 = vmul.f32 %v1592_v59, %v3209_v23  ;;  %v635_v37 = vmul.f32 0.3275911, %v3292_v9  ;;  %v3325_v60 = vmul.f32 %v3237_v54, %v883_v56  ;;  %v2337_v34 = vld [vmem:[#allocation8 + $0x188] sm:$0xff]  ;;  %v2288_v54 = vld [vmem:[#allocation8] sm:$0xff] }
  0xd7   :  { %5099 = vst [vmem:[#allocation32_spill] sm:$0xff] %v3315_v30  ;;  %v3322_v43 = vpop.eup %2687  ;;  %2693 = vpow2.f32 %v1724_v31  ;;  %v1726_v39 = vmul.f32 1.442695, %v1655_v24  ;;  %v3328_v51 = vmul.f32 0.70710677, %v3298_v42  ;;  %v822_v23 = vmul.f32 %v3310_v10, %v3234_v49  ;;  %2565 = vmatpush.msrb.mxu3 %v2337_v34  ;;  %v2304_v56 = vld [vmem:[#allocation8 + $0x80] sm:$0xff]  ;;  %2371 = vmatpush.msrb.mxu0 %v2288_v54 }
  0xd8   :  { %v2690_v27 = vpop.eup %2689  ;;  %2695 = vrcp.f32 %v3305_v40  ;;  %v572_v58 = vand.u32 2147483647, %v3308_v20  ;;  %v3335_v59 = vadd.f32 %v393_v33, %v3122_v6  ;;  %v3338_v31 = vmul.f32 %v3253_v18, %v884_v26  ;;  %2436 = vmatpush.msrb.mxu1 %v2304_v56 }
  0xd9   :  { %5100 = vst [vmem:[#allocation33_spill] sm:$0xff] %v3328_v51  ;;  %v1657_v41 = vmul.f32 %v1593_v0, %v3243_v61  ;;  %v3341_v24 = vadd.f32 1.0, %v634_v29  ;;  %v3344_v42 = vand.u32 2147483647, %v3315_v30  ;;  %v3349_v33 = vmul.f32 %v3263_v8, %v885_v13  ;;  %v266_v29 = vpop.f32.mrf.mxu1  ;;  %v2320_v30 = vld [vmem:[#allocation8 + $0x100] sm:$0xff] }
  0xda   :  { %5101 = vst [vmem:[#allocation34_spill] sm:$0xff] %v3335_v59  ;;  %v3346_v49 = vpop.eup %2691  ;;  %v1728_v34 = vmul.f32 1.442695, %v1656_v36  ;;  %v3351_v20 = vadd.f32 1.0, %v635_v37  ;;  %v3354_v18 = vadd.f32 %v201_v16, %v3104_v57  ;;  %v823_v61 = vmul.f32 %v3322_v43, %v3248_v11  ;;  %v331_v37 = vpop.f32.mrf.mxu2  ;;  %2501 = vmatpush.msrb.mxu2 %v2320_v30 }
  0xdb   :  { %2697 = vpow2.f32 %v1726_v39  ;;  %v824_v26 = vmul.f32 %v2690_v27, %v3258_v38  ;;  %v3360_v0 = vand.u32 2147483647, %v3328_v51  ;;  %v886_v54 = vsub.f32 2.0, %v822_v23 }
  0xdc   :  { %5102 = vst [vmem:[#allocation35_spill] sm:$0xff] %v3354_v18  ;;  %v1594_v8 = vsub.f32 0.0, %v3280_v45  ;;  %v636_v13 = vmul.f32 0.3275911, %v572_v58  ;;  %v3364_v36 = vmul.f32 0.70710677, %v3335_v59  ;;  %2699 = vrcp.f32 %v3341_v24 }
  0xdd   :  { %v3366_v16 = vpop.eup %2693  ;;  %v1730_v56 = vmul.f32 1.442695, %v1657_v41  ;;  %v1595_v39 = vsub.f32 0.0, %v3292_v9  ;;  %v637_v11 = vmul.f32 0.3275911, %v3344_v42  ;;  %2701 = vrcp.f32 %v3351_v20 }
  0xde   :  { %5103 = vst [vmem:[#allocation36_spill] sm:$0xff] %v3364_v36  ;;  %v2696_v38 = vpop.eup %2695  ;;  %v1596_v23 = vsub.f32 0.0, %v572_v58  ;;  %v3373_v51 = vmul.f32 0.70710677, %v3354_v18  ;;  %v3376_v59 = vadd.f32 %v266_v29, %v3106_v62  ;;  %v887_v35 = vsub.f32 2.0, %v823_v61 }
  0xdf   :  { %5104 = vst [vmem:[#allocation37_spill] sm:$0xff] %v3366_v16  ;;  %v888_v32 = vsub.f32 2.0, %v824_v26  ;;  %v638_v41 = vmul.f32 0.3275911, %v3360_v0  ;;  %v3380_v16 = vadd.f32 %v331_v37, %v3114_v2  ;;  %2703 = vpow2.f32 %v1728_v34 }
  0xe0   :  { %5105 = vst [vmem:[#allocation38_spill] sm:$0xff] %v3373_v51  ;;  %v1658_v55 = vmul.f32 %v1594_v8, %v3280_v45  ;;  %v700_v50 = vadd.f32 1.0, %v636_v13  ;;  %v3384_v46 = vand.u32 2147483647, %v3364_v36  ;;  %v3389_v29 = vmul.f32 %v3310_v10, %v886_v54 }
  0xe1   :  { %5106 = vst [vmem:[#allocation39_spill] sm:$0xff] %v3376_v59  ;;  %v3386_v18 = vpop.eup %2697  ;;  %v825_v61 = vmul.f32 %v2696_v38, %v3305_v40  ;;  %v1659_v26 = vmul.f32 %v1595_v39, %v3292_v9  ;;  %v701_v48 = vadd.f32 1.0, %v637_v11  ;;  %2705 = vpow2.f32 %v1730_v56  ;;  %v396_v9 = vpop.f32.mrf.mxu3 }
  0xe2   :  { %5107 = vst [vmem:[#allocation40_spill] sm:$0xff] %v3380_v16  ;;  %v1660_v37 = vmul.f32 %v1596_v23, %v572_v58  ;;  %v3394_v30 = vand.u32 2147483647, %v3373_v51  ;;  %v3397_v45 = vmul.f32 0.70710677, %v3376_v59  ;;  %v2700_v34 = vpop.eup %2699  ;;  %v3400_v8 = vmul.f32 %v3322_v43, %v887_v35  ;;  %v204_v43 = vpop.f32.mrf.mxu0 }
  0xe3   :  { %5108 = vst [vmem:[#allocation41_spill] sm:$0xff] %v3386_v18  ;;  %v3402_v13 = vmul.f32 %v2690_v27, %v888_v32  ;;  %v3404_v10 = vadd.f32 1.0, %v638_v41  ;;  %v3407_v40 = vmul.f32 0.70710677, %v3380_v16  ;;  %v3409_v54 = vpop.eup %2701  ;;  %v1732_v58 = vmul.f32 1.442695, %v1658_v55 }
  0xe4   :  { %5109 = vst [vmem:[#allocation42_spill] sm:$0xff] %v3389_v29  ;;  %2707 = vrcp.f32 %v700_v50  ;;  %v1597_v56 = vsub.f32 0.0, %v3344_v42  ;;  %v639_v39 = vmul.f32 0.3275911, %v3384_v46  ;;  %v889_v11 = vsub.f32 2.0, %v825_v61 }
  0xe5   :  { %5110 = vst [vmem:[#allocation43_spill] sm:$0xff] %v3397_v45  ;;  %v1734_v23 = vmul.f32 1.442695, %v1659_v26  ;;  %2709 = vrcp.f32 %v701_v48  ;;  %v1598_v35 = vsub.f32 0.0, %v3360_v0  ;;  %v3414_v32 = vpop.eup %2703  ;;  %v1736_v27 = vmul.f32 1.442695, %v1660_v37 }
  0xe6   :  { %5111 = vst [vmem:[#allocation44_spill] sm:$0xff] %v3400_v8  ;;  %v640_v41 = vmul.f32 0.3275911, %v3394_v30  ;;  %v3418_v16 = vand.u32 2147483647, %v3397_v45  ;;  %v3421_v55 = vadd.f32 %v396_v9, %v3122_v6  ;;  %v826_v59 = vmul.f32 %v2700_v34, %v3341_v24 }
  0xe7   :  { %5112 = vst [vmem:[#allocation45_spill] sm:$0xff] %v3402_v13  ;;  %v827_v61 = vmul.f32 %v3409_v54, %v3351_v20  ;;  %2711 = vrcp.f32 %v3404_v10  ;;  %v3428_v26 = vand.u32 2147483647, %v3407_v40  ;;  %v3430_v51 = vpop.eup %2705  ;;  %v1661_v37 = vmul.f32 %v1597_v56, %v3344_v42  ;;  %v334_v42 = vpop.f32.mrf.mxu2 }
  0xe8   :  { %5113 = vst [vmem:[#allocation46_spill] sm:$0xff] %v3407_v40  ;;  %2713 = vpow2.f32 %v1732_v58  ;;  %v703_v45 = vadd.f32 1.0, %v639_v39  ;;  %v3434_v36 = vadd.f32 %v204_v43, %v3104_v57  ;;  %v3436_v9 = vmul.f32 %v2696_v38, %v889_v11 }
  0xe9   :  { %5114 = vst [vmem:[#allocation47_spill] sm:$0xff] %v3414_v32  ;;  %2715 = vpow2.f32 %v1734_v23  ;;  %v1662_v24 = vmul.f32 %v1598_v35, %v3360_v0  ;;  %v1599_v20 = vsub.f32 0.0, %v3384_v46  ;;  %v269_v32 = vpop.f32.mrf.mxu1  ;;  %v704_v40 = vadd.f32 1.0, %v640_v41 }
  0xea   :  { %5115 = vst [vmem:[#allocation48_spill] sm:$0xff] %v3421_v55  ;;  %v2708_v18 = vpop.eup %2707  ;;  %2717 = vpow2.f32 %v1736_v27  ;;  %v3442_v58 = vmul.f32 0.70710677, %v3421_v55  ;;  %v890_v39 = vsub.f32 2.0, %v826_v59  ;;  %v891_v43 = vsub.f32 2.0, %v827_v61 }
  0xeb   :  { %5116 = vst [vmem:[#allocation49_spill] sm:$0xff] %v3430_v51  ;;  %v641_v51 = vmul.f32 0.3275911, %v3418_v16  ;;  %v2710_v56 = vpop.eup %2709  ;;  %v1600_v38 = vsub.f32 0.0, %v3394_v30  ;;  %v642_v11 = vmul.f32 0.3275911, %v3428_v26  ;;  %2719 = vrcp.f32 %v703_v45 }
  0xec   :  { %5117 = vst [vmem:[#allocation50_spill] sm:$0xff] %v3434_v36  ;;  %v1738_v0 = vmul.f32 1.442695, %v1661_v37  ;;  %v3447_v23 = vmul.f32 0.70710677, %v3434_v36  ;;  %v3450_v35 = vadd.f32 %v269_v32, %v3106_v62  ;;  %v828_v41 = vmul.f32 %v2708_v18, %v700_v50 }
  0xed   :  { %5118 = vst [vmem:[#allocation51_spill] sm:$0xff] %v3436_v9  ;;  %v2712_v27 = vpop.eup %2711  ;;  %v1740_v55 = vmul.f32 1.442695, %v1662_v24  ;;  %v1663_v9 = vmul.f32 %v1599_v20, %v3384_v46  ;;  %v3454_v59 = vadd.f32 %v334_v42, %v3114_v2  ;;  %v829_v13 = vmul.f32 %v2710_v56, %v701_v48 }
  0xee   :  { %5119 = vst [vmem:[#allocation52_spill] sm:$0xff] %v3442_v58  ;;  %v3456_v61 = vpop.eup %2713  ;;  %2721 = vrcp.f32 %v704_v40  ;;  %v705_v37 = vadd.f32 1.0, %v641_v51  ;;  %v579_v8 = vand.u32 2147483647, %v3442_v58  ;;  %v3461_v29 = vmul.f32 %v2700_v34, %v890_v39  ;;  %v399_v39 = vpop.f32.mrf.mxu3 }
  0xef   :  { %5120 = vst [vmem:[#allocation53_spill] sm:$0xff] %v3447_v23  ;;  %v3459_v36 = vpop.eup %2715  ;;  %v1664_v32 = vmul.f32 %v1600_v38, %v3394_v30  ;;  %v1601_v50 = vsub.f32 0.0, %v3418_v16  ;;  %v706_v24 = vadd.f32 1.0, %v642_v11  ;;  %2723 = vpow2.f32 %v1738_v0 }
  0xf0   :  { %5121 = vst [vmem:[#allocation54_spill] sm:$0xff] %v3450_v35  ;;  %v3465_v46 = vpop.eup %2717  ;;  %v830_v20 = vmul.f32 %v2712_v27, %v3404_v10  ;;  %v3469_v48 = vand.u32 2147483647, %v3447_v23  ;;  %v3472_v51 = vmul.f32 0.70710677, %v3450_v35  ;;  %v892_v42 = vsub.f32 2.0, %v828_v41 }
  0xf1   :  { %5122 = vst [vmem:[#allocation55_spill] sm:$0xff] %v3454_v59  ;;  %2725 = vpow2.f32 %v1740_v55  ;;  %v1602_v34 = vsub.f32 0.0, %v3428_v26  ;;  %v3476_v30 = vmul.f32 0.70710677, %v3454_v59  ;;  %v2720_v38 = vpop.eup %2719  ;;  %v893_v11 = vsub.f32 2.0, %v829_v13 }
  0xf2   :  { %5123 = vst [vmem:[#allocation56_spill] sm:$0xff] %v3456_v61  ;;  %v1742_v58 = vmul.f32 1.442695, %v1663_v9  ;;  %2727 = vrcp.f32 %v705_v37  ;;  %v643_v0 = vmul.f32 0.3275911, %v579_v8  ;;  %v3479_v10 = vmul.f32 %v3409_v54, %v891_v43 }
  0xf3   :  { %5124 = vst [vmem:[#allocation57_spill] sm:$0xff] %v3459_v36  ;;  %v1744_v23 = vmul.f32 1.442695, %v1664_v32  ;;  %v1665_v35 = vmul.f32 %v1601_v50, %v3418_v16  ;;  %2729 = vrcp.f32 %v706_v24  ;;  %v894_v55 = vsub.f32 2.0, %v830_v20 }
  0xf4   :  { %5125 = vst [vmem:[#allocation58_spill] sm:$0xff] %v3461_v29  ;;  %v2722_v41 = vpop.eup %2721  ;;  %v581_v59 = vand.u32 2147483647, %v3472_v51  ;;  %v3485_v36 = vadd.f32 %v399_v39, %v3122_v6  ;;  %v3487_v13 = vmul.f32 %v2708_v18, %v892_v42  ;;  %v831_v9 = vmul.f32 %v2720_v38, %v703_v45  ;;  %v207_v42 = vpop.f32.mrf.mxu0 }
  0xf5   :  { %5126 = vst [vmem:[#allocation59_spill] sm:$0xff] %v3465_v46  ;;  %v644_v46 = vmul.f32 0.3275911, %v3469_v48  ;;  %v1666_v61 = vmul.f32 %v1602_v34, %v3428_v26  ;;  %v3491_v54 = vand.u32 2147483647, %v3476_v30  ;;  %v3493_v43 = vpop.eup %2723  ;;  %v3495_v16 = vmul.f32 %v2710_v56, %v893_v11 }
  0xf6   :  { %5127 = vst [vmem:[#allocation60_spill] sm:$0xff] %v3472_v51  ;;  %2731 = vpow2.f32 %v1742_v58  ;;  %v3497_v32 = vadd.f32 1.0, %v643_v0  ;;  %v1008_v50 = vmul.f32 1.0614054, %v3256_v44  ;;  %v832_v39 = vmul.f32 %v2722_v41, %v704_v40 }
  0xf7   :  { %5128 = vst [vmem:[#allocation61_spill] sm:$0xff] %v3476_v30  ;;  %v3500_v20 = vpop.eup %2725  ;;  %2733 = vpow2.f32 %v1744_v23  ;;  %v1746_v18 = vmul.f32 1.442695, %v1665_v35  ;;  %v1603_v45 = vsub.f32 0.0, %v579_v8  ;;  %v3502_v34 = vmul.f32 %v2712_v27, %v894_v55 }
  0xf8   :  { %5129 = vst [vmem:[#allocation62_spill] sm:$0xff] %v3479_v10  ;;  %v2728_v26 = vpop.eup %2727  ;;  %v708_v30 = vadd.f32 1.0, %v644_v46  ;;  %v645_v51 = vmul.f32 0.3275911, %v581_v59  ;;  %v3505_v56 = vmul.f32 0.70710677, %v3485_v36  ;;  %2735 = vrcp.f32 %v3497_v32 }
  0xf9   :  { %5130 = vst [vmem:[#allocation63_spill] sm:$0xff] %v3485_v36  ;;  %v2730_v58 = vpop.eup %2729  ;;  %v895_v11 = vsub.f32 2.0, %v831_v9  ;;  %v1748_v0 = vmul.f32 1.442695, %v1666_v61  ;;  %v1605_v40 = vsub.f32 0.0, %v581_v59  ;;  %v3511_v23 = vadd.f32 %v207_v42, %v3104_v57  ;;  %v272_v36 = vpop.f32.mrf.mxu1 }
  0xfa   :  { %5131 = vst [vmem:[#allocation64_spill] sm:$0xff] %v3487_v13  ;;  %v1072_v35 = vadd.f32 -1.4531521, %v1008_v50  ;;  %v896_v27 = vsub.f32 2.0, %v832_v39  ;;  %v833_v46 = vmul.f32 %v2728_v26, %v705_v37  ;;  %2737 = vpow2.f32 %v1746_v18  ;;  %v2336_v13 = vld [vmem:[#allocation8 + $0x180] sm:$0xff] }
  0xfb   :  { %5132 = vst [vmem:[#allocation65_spill] sm:$0xff] %v3493_v43  ;;  %v1604_v43 = vsub.f32 0.0, %v3469_v48  ;;  %v1667_v55 = vmul.f32 %v1603_v45, %v579_v8  ;;  %v834_v9 = vmul.f32 %v2730_v58, %v706_v24  ;;  %2739 = vrcp.f32 %v708_v30  ;;  %2566 = vmatpush.msrb.mxu3 %v2336_v13 }
  0xfc   :  { %5133 = vst [vmem:[#allocation66_spill] sm:$0xff] %v3495_v16  ;;  %v3515_v61 = vadd.f32 1.0, %v645_v51  ;;  %v583_v16 = vand.u32 2147483647, %v3505_v56  ;;  %v3520_v29 = vmul.f32 %v2720_v38, %v895_v11  ;;  %2741 = vpow2.f32 %v1748_v0 }
  0xfd   :  { %5134 = vst [vmem:[#allocation67_spill] sm:$0xff] %v3500_v20  ;;  %v646_v20 = vmul.f32 0.3275911, %v3491_v54  ;;  %v1668_v50 = vmul.f32 %v1604_v43, %v3469_v48  ;;  %v1669_v8 = vmul.f32 %v1605_v40, %v581_v59  ;;  %v3524_v39 = vmul.f32 0.70710677, %v3511_v23 }
  0xfe   :  { %5135 = vst [vmem:[#allocation68_spill] sm:$0xff] %v3502_v34  ;;  %v3513_v34 = vpop.eup %2731  ;;  %v3527_v24 = vadd.f32 %v272_v36, %v3106_v62  ;;  %v1136_v51 = vmul.f32 %v1072_v35, %v3256_v44  ;;  %v3530_v18 = vmul.f32 %v2722_v41, %v896_v27  ;;  %v897_v45 = vsub.f32 2.0, %v833_v46 }
  0xff   :  { %5136 = vst [vmem:[#allocation69_spill] sm:$0xff] %v3505_v56  ;;  %v3518_v10 = vpop.eup %2733  ;;  %v710_v37 = vadd.f32 1.0, %v646_v20  ;;  %v1750_v42 = vmul.f32 1.442695, %v1667_v55  ;;  %v1009_v38 = vmul.f32 1.0614054, %v3303_v17  ;;  %2743 = vrcp.f32 %v3515_v61 }
 0x100   :  { %5137 = vst [vmem:[#allocation70_spill] sm:$0xff] %v3511_v23  ;;  %v2736_v11 = vpop.eup %2735  ;;  %v898_v0 = vsub.f32 2.0, %v834_v9  ;;  %v647_v48 = vmul.f32 0.3275911, %v583_v16  ;;  %v1200_v59 = vadd.f32 1.4214138, %v1136_v51  ;;  %v3546_v23 = vmul.f32 %v2728_v26, %v897_v45 }
 0x101   :  { %5138 = vst [vmem:[#allocation71_spill] sm:$0xff] %v3518_v10  ;;  %v3534_v13 = vpop.eup %2737  ;;  %v1752_v43 = vmul.f32 1.442695, %v1668_v50  ;;  %2745 = vrcp.f32 %v710_v37  ;;  %v1606_v36 = vsub.f32 0.0, %v3491_v54  ;;  %v1073_v20 = vadd.f32 -1.4531521, %v1009_v38 }
 0x102   :  { %5139 = vst [vmem:[#allocation72_spill] sm:$0xff] %v3524_v39  ;;  %v2740_v40 = vpop.eup %2739  ;;  %v1754_v41 = vmul.f32 1.442695, %v1669_v8  ;;  %v584_v35 = vand.u32 2147483647, %v3524_v39  ;;  %v1264_v46 = vmul.f32 %v1200_v59, %v3256_v44  ;;  %v835_v9 = vmul.f32 %v2736_v11, %v3497_v32  ;;  %v337_v59 = vpop.f32.mrf.mxu2 }
 0x103   :  { %5140 = vst [vmem:[#allocation73_spill] sm:$0xff] %v3527_v24  ;;  %v3539_v27 = vmul.f32 0.70710677, %v3527_v24  ;;  %v3542_v55 = vpop.eup %2741  ;;  %2747 = vpow2.f32 %v1750_v42  ;;  %v1607_v51 = vsub.f32 0.0, %v583_v16  ;;  %v1137_v50 = vmul.f32 %v1073_v20, %v3303_v17 }
 0x104   :  { %5141 = vst [vmem:[#allocation74_spill] sm:$0xff] %v3534_v13  ;;  %v3548_v38 = vmul.f32 %v2730_v58, %v898_v0  ;;  %v711_v8 = vadd.f32 1.0, %v647_v48  ;;  %v1328_v56 = vadd.f32 -0.28449672, %v1264_v46  ;;  %v836_v39 = vmul.f32 %v2740_v40, %v708_v30 }
 0x105   :  { %5142 = vst [vmem:[#allocation75_spill] sm:$0xff] %v3539_v27  ;;  %2749 = vpow2.f32 %v1752_v43  ;;  %v1670_v24 = vmul.f32 %v1606_v36, %v3491_v54  ;;  %v1201_v13 = vadd.f32 1.4214138, %v1137_v50  ;;  %v2744_v10 = vpop.eup %2743  ;;  %v585_v32 = vand.u32 2147483647, %v3539_v27 }
 0x106   :  { %5143 = vst [vmem:[#allocation76_spill] sm:$0xff] %v3542_v55  ;;  %2751 = vpow2.f32 %v1754_v41  ;;  %v648_v55 = vmul.f32 0.3275911, %v584_v35  ;;  %v1392_v42 = vmul.f32 %v1328_v56, %v3256_v44  ;;  %v899_v26 = vsub.f32 2.0, %v835_v9 }
 0x107   :  { %5144 = vst [vmem:[#allocation77_spill] sm:$0xff] %v3548_v38  ;;  %v2746_v20 = vpop.eup %2745  ;;  %v1671_v45 = vmul.f32 %v1607_v51, %v583_v16  ;;  %v1608_v58 = vsub.f32 0.0, %v584_v35  ;;  %v1265_v0 = vmul.f32 %v1201_v13, %v3303_v17  ;;  %2753 = vrcp.f32 %v711_v8 }
 0x108   :  { %v1609_v30 = vsub.f32 0.0, %v585_v32  ;;  %v1456_v48 = vadd.f32 0.2548296, %v1392_v42  ;;  %v3555_v54 = vadd.f32 %v337_v59, %v3114_v2  ;;  %v900_v36 = vsub.f32 2.0, %v836_v39 }
 0x109   :  { %v3557_v43 = vpop.eup %2747  ;;  %v837_v41 = vmul.f32 %v2744_v10, %v3515_v61  ;;  %v1756_v56 = vmul.f32 1.442695, %v1670_v24  ;;  %v1329_v46 = vadd.f32 -0.28449672, %v1265_v0  ;;  %v838_v9 = vmul.f32 %v2746_v20, %v710_v37 }
 0x10a   :  { %5145 = vst [vmem:[#allocation78_spill] sm:$0xff] %v3555_v54  ;;  %v712_v16 = vadd.f32 1.0, %v648_v55  ;;  %v649_v51 = vmul.f32 0.3275911, %v585_v32  ;;  %v1520_v13 = vmul.f32 %v1456_v48, %v3256_v44  ;;  %v1758_v42 = vmul.f32 1.442695, %v1671_v45  ;;  %v402_v45 = vpop.f32.mrf.mxu3 }
 0x10b   :  { %5146 = vst [vmem:[#allocation79_spill] sm:$0xff] %v3557_v43  ;;  %v3562_v50 = vpop.eup %2749  ;;  %v1672_v27 = vmul.f32 %v1608_v58, %v584_v35  ;;  %v1393_v59 = vmul.f32 %v1329_v46, %v3303_v17  ;;  %v3566_v43 = vmul.f32 0.5, %v3136_v19  ;;  %v3570_v39 = vmul.f32 %v2736_v11, %v899_v26 }
 0x10c   :  { %v3568_v38 = vpop.eup %2751  ;;  %v1673_v61 = vmul.f32 %v1609_v30, %v585_v32  ;;  %v1840_v37 = vmul.f32 %v3245_v63, %v1520_v13  ;;  %v3574_v24 = vmul.f32 0.70710677, %v3555_v54  ;;  %v3576_v44 = vmul.f32 %v2740_v40, %v900_v36  ;;  %v210_v32 = vpop.f32.mrf.mxu0 }
 0x10d   :  { %v901_v55 = vsub.f32 2.0, %v837_v41  ;;  %2755 = vpow2.f32 %v1756_v56  ;;  %v1457_v35 = vadd.f32 0.2548296, %v1393_v59  ;;  %v2754_v58 = vpop.eup %2753  ;;  %v902_v19 = vsub.f32 2.0, %v838_v9 }
 0x10e   :  { %5147 = vst [vmem:[#allocation80_spill] sm:$0xff] %v3574_v24  ;;  %2757 = vrcp.f32 %v712_v16  ;;  %v3579_v0 = vadd.f32 1.0, %v649_v51  ;;  %v1904_v11 = vsub.f32 1.0, %v1840_v37  ;;  %v1760_v63 = vmul.f32 1.442695, %v1672_v27 }
 0x10f   :  { %2759 = vpow2.f32 %v1758_v42  ;;  %v1521_v26 = vmul.f32 %v1457_v35, %v3303_v17  ;;  %v1010_v40 = vmul.f32 1.0614054, %v3318_v12  ;;  %v1762_v30 = vmul.f32 1.442695, %v1673_v61  ;;  %v275_v61 = vpop.f32.mrf.mxu1 }
 0x110   :  { %v2032_v48 = vsub.f32 0.0, %v1904_v11  ;;  %v586_v36 = vand.u32 2147483647, %v3574_v24  ;;  %v3585_v41 = vadd.f32 %v402_v45, %v3122_v6  ;;  %v839_v56 = vmul.f32 %v2754_v58, %v711_v8 }
 0x111   :  { %v1841_v46 = vmul.f32 %v3274_v53, %v1521_v26  ;;  %v3589_v9 = vadd.f32 %v210_v32, %v3104_v57  ;;  %v1074_v51 = vadd.f32 -1.4531521, %v1010_v40  ;;  %v3591_v13 = vmul.f32 %v2744_v10, %v901_v55 }
 0x112   :  { %5148 = vst [vmem:[#allocation81_spill] sm:$0xff] %v3585_v41  ;;  %v3593_v27 = vmul.f32 %v2746_v20, %v902_v19  ;;  %2761 = vrcp.f32 %v3579_v0  ;;  %v2096_v17 = vsel %vm1968_vm0, %v1904_v11, %v2032_v48  ;;  %v650_v10 = vmul.f32 0.3275911, %v586_v36  ;;  %v405_v54 = vpop.f32.mrf.mxu3 }
 0x113   :  { %5149 = vst [vmem:[#allocation82_spill] sm:$0xff] %v3589_v9  ;;  %v3598_v42 = vpop.eup %2755  ;;  %2763 = vpow2.f32 %v1760_v63  ;;  %v2160_v59 = vadd.f32 1.0, %v2096_v17  ;;  %v1905_v8 = vsub.f32 1.0, %v1841_v46  ;;  %v1138_v53 = vmul.f32 %v1074_v51, %v3318_v12 }
 0x114   :  { %v3601_v37 = vpop.eup %2757  ;;  %2765 = vpow2.f32 %v1762_v30  ;;  %v3604_v20 = vmul.f32 0.70710677, %v3585_v41  ;;  %v1011_v55 = vmul.f32 1.0614054, %v3325_v60  ;;  %v903_v4 = vsub.f32 2.0, %v839_v56 }
 0x115   :  { %v3607_v35 = vpop.eup %2759  ;;  %v2224_v45 = vmul.f32 %v2160_v59, %v3186_v3  ;;  %v2033_v19 = vsub.f32 0.0, %v1905_v8  ;;  %v3611_v11 = vmul.f32 0.70710677, %v3589_v9  ;;  %v1610_v32 = vsub.f32 0.0, %v586_v36 }
 0x116   :  { %5150 = vst [vmem:[#allocation83_spill] sm:$0xff] %v3604_v20  ;;  %v3614_v63 = vadd.f32 %v275_v61, %v3106_v62  ;;  %v1202_v26 = vadd.f32 1.4214138, %v1138_v53  ;;  %v1075_v40 = vadd.f32 -1.4531521, %v1011_v55  ;;  %v3617_v30 = vmul.f32 %v3601_v37, %v712_v16 }
 0x117   :  { %5151 = vst [vmem:[#allocation84_spill] sm:$0xff] %v3611_v11  ;;  %2372 = vmatmul.f32.vlgmr.msrb.gmra.mxu0 %v2224_v45  ;;  %v2097_v48 = vsel %vm1969_vm1, %v1905_v8, %v2033_v19  ;;  %v1012_v56 = vmul.f32 1.0614054, %v3338_v31  ;;  %v1013_v3 = vmul.f32 1.0614054, %v3349_v33  ;;  %v714_v17 = vadd.f32 1.0, %v650_v10 }
 0x118   :  { %5152 = vst [vmem:[#allocation85_spill] sm:$0xff] %v3614_v63  ;;  %v3623_v46 = vpop.eup %2761  ;;  %v2161_v51 = vadd.f32 1.0, %v2097_v48  ;;  %v587_v59 = vand.u32 2147483647, %v3604_v20  ;;  %v1266_v61 = vmul.f32 %v1202_v26, %v3318_v12  ;;  %v3629_v16 = vmul.f32 %v2754_v58, %v903_v4 }
 0x119   :  { %v3627_v53 = vpop.eup %2763  ;;  %v1139_v55 = vmul.f32 %v1075_v40, %v3325_v60  ;;  %v1076_v5 = vadd.f32 -1.4531521, %v1012_v56  ;;  %v1077_v8 = vadd.f32 -1.4531521, %v1013_v3  ;;  %v3636_v9 = vand.u32 2147483647, %v3611_v11  ;;  %v340_v40 = vpop.f32.mrf.mxu2 }
 0x11a   :  { %v3632_v45 = vpop.eup %2765  ;;  %v2225_v19 = vmul.f32 %v2161_v51, %v3189_v7  ;;  %v3639_v10 = vmul.f32 0.70710677, %v3614_v63  ;;  %v1330_v48 = vadd.f32 -0.28449672, %v1266_v61  ;;  %v1674_v26 = vmul.f32 %v1610_v32, %v586_v36 }
 0x11b   :  { %v1203_v20 = vadd.f32 1.4214138, %v1139_v55  ;;  %v1140_v58 = vmul.f32 %v1076_v5, %v3338_v31  ;;  %v1141_v4 = vmul.f32 %v1077_v8, %v3349_v33  ;;  %v3645_v56 = vmul.f32 %v3623_v46, %v3579_v0 }
 0x11c   :  { %5153 = vst [vmem:[#allocation86_spill] sm:$0xff] %v3639_v10  ;;  %2437 = vmatmul.f32.vlgmr.msrb.gmra.mxu1 %v2225_v19  ;;  %2767 = vrcp.f32 %v714_v17  ;;  %v651_v7 = vmul.f32 0.3275911, %v587_v59  ;;  %v1394_v3 = vmul.f32 %v1330_v48, %v3318_v12  ;;  %v1611_v51 = vsub.f32 0.0, %v587_v59 }
 0x11d   :  { %v1267_v63 = vmul.f32 %v1203_v20, %v3325_v60  ;;  %v1204_v61 = vadd.f32 1.4214138, %v1140_v58  ;;  %v1205_v36 = vadd.f32 1.4214138, %v1141_v4  ;;  %v652_v32 = vmul.f32 0.3275911, %v3636_v9 }
 0x11e   :  { %v3651_v55 = vand.u32 2147483647, %v3639_v10  ;;  %v1458_v5 = vadd.f32 0.2548296, %v1394_v3  ;;  %v3654_v8 = vadd.f32 %v340_v40, %v3114_v2  ;;  %vm1970_vm2 = vcmp.ge.f32.partialorder %v3133_v15, 0.0 }
 0x11f   :  { %v1764_v0 = vmul.f32 1.442695, %v1674_v26  ;;  %v1331_v19 = vadd.f32 -0.28449672, %v1267_v63  ;;  %v1268_v48 = vmul.f32 %v1204_v61, %v3338_v31  ;;  %v1269_v11 = vmul.f32 %v1205_v36, %v3349_v33 }
 0x120   :  { %5154 = vst [vmem:[#allocation87_spill] sm:$0xff] %v3654_v8  ;;  %v904_v20 = vsub.f32 2.0, %v3617_v30  ;;  %v905_v58 = vsub.f32 2.0, %v3645_v56  ;;  %v3661_v4 = vadd.f32 1.0, %v651_v7  ;;  %v1522_v10 = vmul.f32 %v1458_v5, %v3318_v12 }
 0x121   :  { %v1675_v3 = vmul.f32 %v1611_v51, %v587_v59  ;;  %v1395_v40 = vmul.f32 %v1331_v19, %v3325_v60  ;;  %v1332_v41 = vadd.f32 -0.28449672, %v1268_v48  ;;  %v1333_v24 = vadd.f32 -0.28449672, %v1269_v11 }
 0x122   :  { %v2768_v26 = vpop.eup %2767  ;;  %v716_v63 = vadd.f32 1.0, %v652_v32  ;;  %v653_v61 = vmul.f32 0.3275911, %v3651_v55  ;;  %v1842_v36 = vmul.f32 %v3285_v52, %v1522_v10  ;;  %v3668_v30 = vmul.f32 0.70710677, %v3654_v8 }
 0x123   :  { %2769 = vpow2.f32 %v1764_v0  ;;  %v1459_v56 = vadd.f32 0.2548296, %v1395_v40  ;;  %v1396_v7 = vmul.f32 %v1332_v41, %v3338_v31  ;;  %v1397_v12 = vmul.f32 %v1333_v24, %v3349_v33 }
 0x124   :  { %5155 = vst [vmem:[#allocation88_spill] sm:$0xff] %v3668_v30  ;;  %vm1971_vm3 = vcmp.ge.f32.partialorder %v3142_v22, 0.0  ;;  %2771 = vrcp.f32 %v3661_v4  ;;  %v1612_v11 = vsub.f32 0.0, %v3636_v9  ;;  %v1906_v59 = vsub.f32 1.0, %v1842_v36 }
 0x125   :  { %v3676_v51 = vadd.f32 %v405_v54, %v3122_v6  ;;  %v842_v52 = vmul.f32 %v2768_v26, %v714_v17  ;;  %v1523_v10 = vmul.f32 %v1459_v56, %v3325_v60  ;;  %v1460_v32 = vadd.f32 0.2548296, %v1396_v7 }
 0x126   :  { %v1461_v5 = vadd.f32 0.2548296, %v1397_v12  ;;  %vm1972_vm4 = vcmp.ge.f32.partialorder %v3146_v25, 0.0  ;;  %vm1973_vm5 = vcmp.ge.f32.partialorder %v3149_v28, 0.0  ;;  %2773 = vrcp.f32 %v716_v63 }
 0x127   :  { %5156 = vst [vmem:[#allocation89_spill] sm:$0xff] %v3676_v51  ;;  %v717_v24 = vadd.f32 1.0, %v653_v61  ;;  %v2034_v41 = vsub.f32 0.0, %v1906_v59  ;;  %v3682_v0 = vand.u32 2147483647, %v3668_v30  ;;  %v1843_v48 = vmul.f32 %v3294_v1, %v1523_v10 }
 0x128   :  { %v1766_v19 = vmul.f32 1.442695, %v1675_v3  ;;  %v1524_v54 = vmul.f32 %v1460_v32, %v3338_v31  ;;  %v1525_v17 = vmul.f32 %v1461_v5, %v3349_v33  ;;  %v1676_v60 = vmul.f32 %v1612_v11, %v3636_v9 }
 0x129   :  { %v1613_v40 = vsub.f32 0.0, %v3651_v55  ;;  %v2098_v36 = vsel %vm1970_vm2, %v1906_v59, %v2034_v41  ;;  %v3692_v61 = vmul.f32 0.70710677, %v3676_v51  ;;  %v3694_v56 = vpop.eup %2769  ;;  %v1907_v3 = vsub.f32 1.0, %v1843_v48 }
 0x12a   :  { %5158 = vst [vmem:[#allocation91_spill] sm:$0xff] %v3694_v56  ;;  %v2162_v7 = vadd.f32 1.0, %v2098_v36  ;;  %v1844_v1 = vmul.f32 %v3300_v47, %v1524_v54  ;;  %v1845_v31 = vmul.f32 %v3346_v49, %v1525_v17  ;;  %v2772_v12 = vpop.eup %2771  ;;  %v3699_v33 = vmul.f32 %v3601_v37, %v904_v20 }
 0x12b   :  { %5157 = vst [vmem:[#allocation90_spill] sm:$0xff] %v3692_v61  ;;  %v906_v9 = vsub.f32 2.0, %v842_v52  ;;  %2775 = vrcp.f32 %v717_v24  ;;  %v654_v15 = vmul.f32 0.3275911, %v3682_v0  ;;  %v2035_v59 = vsub.f32 0.0, %v1907_v3 }
 0x12c   :  { %v2226_v11 = vmul.f32 %v2162_v7, %v3199_v14  ;;  %v1908_v10 = vsub.f32 1.0, %v1844_v1  ;;  %v1909_v32 = vsub.f32 1.0, %v1845_v31  ;;  %v2774_v5 = vpop.eup %2773  ;;  %v3704_v41 = vmul.f32 %v3623_v46, %v905_v58  ;;  %v213_v14 = vpop.f32.mrf.mxu0  ;;  %v5159_v7 = vld [vmem:[#allocation25_spill] sm:$0xff] }
 0x12d   :  { %2777 = vpow2.f32 %v1766_v19  ;;  %v1768_v47 = vmul.f32 1.442695, %v1676_v60  ;;  %v1677_v49 = vmul.f32 %v1613_v40, %v3651_v55  ;;  %v2099_v37 = vsel %vm1971_vm3, %v1907_v3, %v2035_v59  ;;  %v278_v58 = vpop.f32.mrf.mxu1 }
 0x12e   :  { %2502 = vmatmul.f32.vlgmr.msrb.gmra.mxu2 %v2226_v11  ;;  %v2036_v20 = vsub.f32 0.0, %v1908_v10  ;;  %v2037_v52 = vsub.f32 0.0, %v1909_v32  ;;  %v591_v48 = vand.u32 2147483647, %v3692_v61  ;;  %v3710_v54 = vmul.f32 %v2768_v26, %v906_v9 }
 0x12f   :  { %v843_v17 = vmul.f32 %v2772_v12, %v3661_v4  ;;  %v2163_v36 = vadd.f32 1.0, %v2099_v37  ;;  %v718_v46 = vadd.f32 1.0, %v654_v15  ;;  %v844_v19 = vmul.f32 %v2774_v5, %v716_v63  ;;  %v5161_v37 = vld [vmem:[#allocation42_spill] sm:$0xff] }
 0x130   :  { %v2100_v55 = vsel %vm1972_vm4, %v1908_v10, %v2036_v20  ;;  %v437_v60 = vmul.f32 0.5, %v3139_v21  ;;  %v2101_v22 = vsel %vm1973_vm5, %v1909_v32, %v2037_v52  ;;  %v214_v31 = vadd.f32 %v213_v14, %v3104_v57  ;;  %v5163_v52 = vld [vmem:[#allocation44_spill] sm:$0xff] }
 0x131   :  { %v2776_v40 = vpop.eup %2775  ;;  %v2227_v3 = vmul.f32 %v2163_v36, %v5159_v7  ;;  %v2164_v1 = vadd.f32 1.0, %v2100_v55  ;;  %v2165_v26 = vadd.f32 1.0, %v2101_v22  ;;  %v1770_v4 = vmul.f32 1.442695, %v1677_v49  ;;  %v5164_v36 = vld [vmem:[#allocation45_spill] sm:$0xff]  ;;  %v5166_v22 = vld [vmem:[#allocation51_spill] sm:$0xff] }
 0x132   :  { %v1614_v9 = vsub.f32 0.0, %v3682_v0  ;;  %v655_v15 = vmul.f32 0.3275911, %v591_v48  ;;  %v279_v63 = vadd.f32 %v278_v58, %v3106_v62  ;;  %v907_v11 = vsub.f32 2.0, %v843_v17 }
 0x133   :  { %v3722_v25 = vpop.eup %2777  ;;  %2567 = vmatmul.f32.vlgmr.msrb.gmra.mxu3 %v2227_v3  ;;  %v2228_v21 = vmul.f32 %v2164_v1, %v3566_v43  ;;  %v2229_v28 = vmul.f32 %v2165_v26, %v437_v60  ;;  %2779 = vrcp.f32 %v718_v46  ;;  %v908_v59 = vsub.f32 2.0, %v844_v19 }
 0x134   :  { %5160 = vst [vmem:[#allocation25_spill] sm:$0xff] %v3722_v25  ;;  %v845_v10 = vmul.f32 %v2776_v40, %v717_v24  ;;  %v1615_v32 = vsub.f32 0.0, %v591_v48  ;;  %v1014_v20 = vmul.f32 1.0614054, %v5161_v37  ;;  %2781 = vpow2.f32 %v1768_v47 }
 0x135   :  { %2375 = vmatmul.f32.gmra.mxu0 %v2228_v21  ;;  %2440 = vmatmul.f32.gmra.mxu1 %v2229_v28  ;;  %v3726_v49 = vmul.f32 0.70710677, %v214_v31  ;;  %v1015_v14 = vmul.f32 1.0614054, %v5163_v52  ;;  %v1016_v58 = vmul.f32 1.0614054, %v5164_v36  ;;  %v1678_v17 = vmul.f32 %v1614_v9, %v3682_v0 }
 0x136   :  { %v3731_v55 = vadd.f32 1.0, %v655_v15  ;;  %v3733_v43 = vmul.f32 0.70710677, %v279_v63  ;;  %v1078_v19 = vadd.f32 -1.4531521, %v1014_v20  ;;  %2783 = vpow2.f32 %v1770_v4 }
 0x137   :  { %5162 = vst [vmem:[#allocation42_spill] sm:$0xff] %v3726_v49  ;;  %v1079_v24 = vadd.f32 -1.4531521, %v1015_v14  ;;  %v1080_v60 = vadd.f32 -1.4531521, %v1016_v58  ;;  %v3736_v7 = vmul.f32 %v2772_v12, %v907_v11  ;;  %v909_v3 = vsub.f32 2.0, %v845_v10 }
 0x138   :  { %5165 = vst [vmem:[#allocation44_spill] sm:$0xff] %v3733_v43  ;;  %v1017_v47 = vmul.f32 1.0614054, %v5166_v22  ;;  %v1679_v1 = vmul.f32 %v1615_v32, %v591_v48  ;;  %v1142_v26 = vmul.f32 %v1078_v19, %v5161_v37  ;;  %v592_v0 = vand.u32 2147483647, %v3726_v49 }
 0x139   :  { %v3739_v21 = vpop.eup %2779  ;;  %v1143_v9 = vmul.f32 %v1079_v24, %v5163_v52  ;;  %v1144_v15 = vmul.f32 %v1080_v60, %v5164_v36  ;;  %v3744_v4 = vmul.f32 %v2774_v5, %v908_v59  ;;  %v1772_v20 = vmul.f32 1.442695, %v1678_v17  ;;  %v343_v59 = vpop.f32.mrf.mxu2 }
 0x13a   :  { %v1081_v28 = vadd.f32 -1.4531521, %v1017_v47  ;;  %v3747_v14 = vand.u32 2147483647, %v3733_v43  ;;  %v1206_v12 = vadd.f32 1.4214138, %v1142_v26  ;;  %v3749_v11 = vpop.eup %2781  ;;  %2785 = vrcp.f32 %v3731_v55 }
 0x13b   :  { %5167 = vst [vmem:[#allocation45_spill] sm:$0xff] %v3744_v4  ;;  %v1207_v48 = vadd.f32 1.4214138, %v1143_v9  ;;  %v1208_v10 = vadd.f32 1.4214138, %v1144_v15  ;;  %v3753_v58 = vmul.f32 %v2776_v40, %v909_v3  ;;  %v846_v19 = vmul.f32 %v3739_v21, %v718_v46  ;;  %v408_v3 = vpop.f32.mrf.mxu3 }
 0x13c   :  { %5168 = vst [vmem:[#allocation51_spill] sm:$0xff] %v3749_v11  ;;  %v1145_v32 = vmul.f32 %v1081_v28, %v5166_v22  ;;  %v1774_v24 = vmul.f32 1.442695, %v1679_v1  ;;  %v1270_v5 = vmul.f32 %v1206_v12, %v5161_v37  ;;  %v3757_v17 = vpop.eup %2783  ;;  %v656_v60 = vmul.f32 0.3275911, %v592_v0  ;;  %v281_v11 = vpop.f32.mrf.mxu1 }
 0x13d   :  { %5169 = vst [vmem:[#allocation92_spill] sm:$0xff] %v3753_v58  ;;  %v1616_v47 = vsub.f32 0.0, %v592_v0  ;;  %v1271_v26 = vmul.f32 %v1207_v48, %v5163_v52  ;;  %v1272_v43 = vmul.f32 %v1208_v10, %v5164_v36  ;;  %2787 = vpow2.f32 %v1772_v20 }
 0x13e   :  { %5170 = vst [vmem:[#allocation93_spill] sm:$0xff] %v3757_v17  ;;  %v657_v9 = vmul.f32 0.3275911, %v3747_v14  ;;  %v1334_v15 = vadd.f32 -0.28449672, %v1270_v5  ;;  %v3762_v28 = vmul.f32 0.5, %v214_v31  ;;  %v3765_v12 = vadd.f32 %v343_v59, %v3114_v2 }
 0x13f   :  { %v1209_v40 = vadd.f32 1.4214138, %v1145_v32  ;;  %v1335_v46 = vadd.f32 -0.28449672, %v1271_v26  ;;  %v1336_v1 = vadd.f32 -0.28449672, %v1272_v43  ;;  %v3776_v5 = vadd.f32 %v408_v3, %v3122_v6 }
 0x140   :  { %5171 = vst [vmem:[#allocation94_spill] sm:$0xff] %v3762_v28  ;;  %v910_v49 = vsub.f32 2.0, %v846_v19  ;;  %v3767_v61 = vmul.f32 0.5, %v279_v63  ;;  %v1398_v48 = vmul.f32 %v1334_v15, %v5161_v37  ;;  %v3771_v20 = vpop.eup %2785  ;;  %v720_v30 = vadd.f32 1.0, %v656_v60  ;;  %v5173_v63 = vld [vmem:[#allocation18_spill] sm:$0xff] }
 0x141   :  { %v1273_v10 = vmul.f32 %v1209_v40, %v5166_v22  ;;  %v1399_v32 = vmul.f32 %v1335_v46, %v5163_v52  ;;  %v1400_v31 = vmul.f32 %v1336_v1, %v5164_v36  ;;  %v1680_v43 = vmul.f32 %v1616_v47, %v592_v0  ;;  %v5176_v46 = vld [vmem:[#allocation19_spill] sm:$0xff]  ;;  %v5177_v1 = vld [vmem:[#allocation20_spill] sm:$0xff] }
 0x142   :  { %5172 = vst [vmem:[#allocation95_spill] sm:$0xff] %v3767_v61  ;;  %v721_v59 = vadd.f32 1.0, %v657_v9  ;;  %v1462_v26 = vadd.f32 0.2548296, %v1398_v48  ;;  %vm1974_vm6 = vcmp.ge.f32.partialorder %v5173_v63, 0.0  ;;  %2789 = vpow2.f32 %v1774_v24 }
 0x143   :  { %v1337_v19 = vadd.f32 -0.28449672, %v1273_v10  ;;  %v1463_v15 = vadd.f32 0.2548296, %v1399_v32  ;;  %v1464_v61 = vadd.f32 0.2548296, %v1400_v31  ;;  %v3782_v60 = vpop.eup %2787  ;;  %v3788_v0 = vmul.f32 %v3771_v20, %v3731_v55 }
 0x144   :  { %v3780_v40 = vmul.f32 0.70710677, %v3765_v12  ;;  %5175 = vst [vmem:[#allocation96_spill] sm:$0xff] %v3782_v60  ;;  %vm1975_vm7 = vcmp.ge.f32.partialorder %v5176_v46, 0.0  ;;  %vm1976_vm8 = vcmp.ge.f32.partialorder %v5177_v1, 0.0  ;;  %v1617_v47 = vsub.f32 0.0, %v3747_v14 }
 0x145   :  { %v1526_v9 = vmul.f32 %v1462_v26, %v5161_v37  ;;  %v1401_v24 = vmul.f32 %v1337_v19, %v5166_v22  ;;  %2791 = vrcp.f32 %v720_v30  ;;  %v1527_v3 = vmul.f32 %v1463_v15, %v5163_v52  ;;  %v5179_v31 = vld [vmem:[#allocation37_spill] sm:$0xff]  ;;  %v5180_v60 = vld [vmem:[#allocation22_spill] sm:$0xff]  ;;  %v5183_v19 = vld [vmem:[#allocation47_spill] sm:$0xff] }
 0x146   :  { %5174 = vst [vmem:[#allocation18_spill] sm:$0xff] %v3780_v40  ;;  %v1528_v48 = vmul.f32 %v1464_v61, %v5164_v36  ;;  %v3796_v10 = vmul.f32 0.70710677, %v3776_v5  ;;  %v1776_v32 = vmul.f32 1.442695, %v1680_v43  ;;  %2793 = vrcp.f32 %v721_v59  ;;  %v5182_v37 = vld [vmem:[#allocation41_spill] sm:$0xff] }
 0x147   :  { %v1846_v28 = vmul.f32 %v5179_v31, %v1526_v9  ;;  %v1465_v55 = vadd.f32 0.2548296, %v1401_v24  ;;  %vm1977_vm9 = vcmp.ge.f32.partialorder %v5180_v60, 0.0  ;;  %v3801_v51 = vmul.f32 %v3739_v21, %v910_v49  ;;  %v5185_v24 = vld [vmem:[#allocation15_spill] sm:$0xff]  ;;  %v5190_v46 = vld [vmem:[#allocation21_spill] sm:$0xff] }
 0x148   :  { %5178 = vst [vmem:[#allocation19_spill] sm:$0xff] %v3796_v10  ;;  %v1847_v26 = vmul.f32 %v5182_v37, %v1527_v3  ;;  %v1848_v8 = vmul.f32 %v5183_v19, %v1528_v48  ;;  %v594_v52 = vand.u32 2147483647, %v3780_v40  ;;  %v911_v61 = vsub.f32 2.0, %v3788_v0  ;;  %v3809_v9 = vpop.eup %2789  ;;  %v5186_v48 = vld [vmem:[#allocation16_spill] sm:$0xff]  ;;  %v5187_v19 = vld [vmem:[#allocation49_spill] sm:$0xff] }
 0x149   :  { %5181 = vst [vmem:[#allocation20_spill] sm:$0xff] %v3801_v51  ;;  %v1681_v36 = vmul.f32 %v1617_v47, %v3747_v14  ;;  %v1910_v43 = vsub.f32 1.0, %v1846_v28  ;;  %v1529_v15 = vmul.f32 %v1465_v55, %v5166_v22  ;;  %v438_v31 = vmul.f32 0.5, %v5185_v24  ;;  %v5188_v14 = vld [vmem:[#allocation17_spill] sm:$0xff] }
 0x14a   :  { %5184 = vst [vmem:[#allocation37_spill] sm:$0xff] %v3809_v9  ;;  %v1911_v17 = vsub.f32 1.0, %v1847_v26  ;;  %v1912_v49 = vsub.f32 1.0, %v1848_v8  ;;  %v595_v21 = vand.u32 2147483647, %v3796_v10  ;;  %2795 = vpow2.f32 %v1776_v32  ;;  %v216_v10 = vpop.f32.mrf.mxu0 }
 0x14b   :  { %v2038_v3 = vsub.f32 0.0, %v1910_v43  ;;  %v439_v37 = vmul.f32 0.5, %v5186_v48  ;;  %v1849_v40 = vmul.f32 %v5187_v19, %v1529_v15  ;;  %v2792_v0 = vpop.eup %2791  ;;  %v440_v28 = vmul.f32 0.5, %v5188_v14 }
 0x14c   :  { %v2039_v51 = vsub.f32 0.0, %v1911_v17  ;;  %v2040_v47 = vsub.f32 0.0, %v1912_v49  ;;  %v658_v22 = vmul.f32 0.3275911, %v594_v52  ;;  %v2794_v55 = vpop.eup %2793  ;;  %v1778_v9 = vmul.f32 1.442695, %v1681_v36 }
 0x14d   :  { %v2102_v26 = vsel %vm1974_vm6, %v1910_v43, %v2038_v3  ;;  %v1913_v8 = vsub.f32 1.0, %v1849_v40  ;;  %v1618_v24 = vsub.f32 0.0, %v594_v52  ;;  %v659_v19 = vmul.f32 0.3275911, %v595_v21 }
 0x14e   :  { %v2166_v32 = vadd.f32 1.0, %v2102_v26  ;;  %v2103_v48 = vsel %vm1975_vm7, %v1911_v17, %v2039_v51  ;;  %v2104_v15 = vsel %vm1976_vm8, %v1912_v49, %v2040_v47  ;;  %v848_v14 = vmul.f32 %v2792_v0, %v720_v30 }
 0x14f   :  { %v2167_v25 = vadd.f32 1.0, %v2103_v48  ;;  %v2168_v56 = vadd.f32 1.0, %v2104_v15  ;;  %v2041_v58 = vsub.f32 0.0, %v1913_v8  ;;  %v849_v36 = vmul.f32 %v2794_v55, %v721_v59  ;;  %v5199_v48 = vld [vmem:[#allocation66_spill] sm:$0xff] }
 0x150   :  { %v2230_v4 = vmul.f32 %v2166_v32, %v438_v31  ;;  %v722_v63 = vadd.f32 1.0, %v658_v22  ;;  %v217_v40 = vadd.f32 %v216_v10, %v3104_v57  ;;  %v3823_v43 = vpop.eup %2795  ;;  %v282_v17 = vadd.f32 %v281_v11, %v3106_v62 }
 0x151   :  { %5189 = vst [vmem:[#allocation22_spill] sm:$0xff] %v3823_v43  ;;  %v2231_v3 = vmul.f32 %v2167_v25, %v439_v37  ;;  %v2232_v26 = vmul.f32 %v2168_v56, %v440_v28  ;;  %v2105_v51 = vsel %vm1977_vm9, %v1913_v8, %v2041_v58  ;;  %v441_v30 = vmul.f32 0.5, %v5190_v46  ;;  %v5193_v58 = vld [vmem:[#allocation58_spill] sm:$0xff]  ;;  %v5197_v28 = vld [vmem:[#allocation64_spill] sm:$0xff]  ;;  %v346_v46 = vpop.f32.mrf.mxu2 }
 0x152   :  { %2505 = vmatmul.f32.gmra.mxu2 %v2230_v4  ;;  %v2169_v1 = vadd.f32 1.0, %v2105_v51  ;;  %v1682_v49 = vmul.f32 %v1618_v24, %v594_v52  ;;  %v723_v47 = vadd.f32 1.0, %v659_v19  ;;  %v3830_v59 = vmul.f32 %v3771_v20, %v911_v61  ;;  %v5196_v37 = vld [vmem:[#allocation62_spill] sm:$0xff] }
 0x153   :  { %v912_v31 = vsub.f32 2.0, %v848_v14  ;;  %2797 = vpow2.f32 %v1778_v9  ;;  %2570 = vmatmul.f32.gmra.mxu3 %v2231_v3  ;;  %2378 = vmatmul.f32.gmra.mxu0 %v2232_v26  ;;  %v1619_v25 = vsub.f32 0.0, %v595_v21  ;;  %v3832_v60 = vmul.f32 0.70710677, %v217_v40 }
 0x154   :  { %5191 = vst [vmem:[#allocation41_spill] sm:$0xff] %v3830_v59  ;;  %v2233_v56 = vmul.f32 %v2169_v1, %v441_v30  ;;  %2799 = vrcp.f32 %v722_v63  ;;  %v1018_v11 = vmul.f32 1.0614054, %v5193_v58  ;;  %v913_v4 = vsub.f32 2.0, %v849_v36 }
 0x155   :  { %5192 = vst [vmem:[#allocation47_spill] sm:$0xff] %v3832_v60  ;;  %v3836_v10 = vmul.f32 0.5, %v3765_v12  ;;  %v3838_v52 = vmul.f32 0.70710677, %v282_v17  ;;  %v1019_v20 = vmul.f32 1.0614054, %v5196_v37  ;;  %2801 = vrcp.f32 %v723_v47 }
 0x156   :  { %2443 = vmatmul.f32.gmra.mxu1 %v2233_v56  ;;  %v1780_v61 = vmul.f32 1.442695, %v1682_v49  ;;  %v1082_v9 = vadd.f32 -1.4531521, %v1018_v11  ;;  %v1020_v22 = vmul.f32 1.0614054, %v5197_v28  ;;  %v1683_v24 = vmul.f32 %v1619_v25, %v595_v21  ;;  %v411_v11 = vpop.f32.mrf.mxu3 }
 0x157   :  { %5194 = vst [vmem:[#allocation15_spill] sm:$0xff] %v3836_v10  ;;  %v3843_v8 = vmul.f32 0.5, %v3776_v5  ;;  %v1083_v32 = vadd.f32 -1.4531521, %v1019_v20  ;;  %v1021_v15 = vmul.f32 1.0614054, %v5199_v48  ;;  %v3846_v19 = vmul.f32 %v2792_v0, %v912_v31 }
 0x158   :  { %5195 = vst [vmem:[#allocation16_spill] sm:$0xff] %v3838_v52  ;;  %v596_v12 = vand.u32 2147483647, %v3832_v60  ;;  %v1146_v14 = vmul.f32 %v1082_v9, %v5193_v58  ;;  %v1084_v36 = vadd.f32 -1.4531521, %v1020_v22  ;;  %v3852_v26 = vmul.f32 %v2794_v55, %v913_v4  ;;  %v5218_v60 = vld [vmem:[#allocation59_spill] sm:$0xff] }
 0x159   :  { %5198 = vst [vmem:[#allocation49_spill] sm:$0xff] %v3843_v8  ;;  %v3850_v3 = vpop.eup %2797  ;;  %v3855_v51 = vand.u32 2147483647, %v3838_v52  ;;  %v1147_v5 = vmul.f32 %v1083_v32, %v5196_v37  ;;  %v1085_v21 = vadd.f32 -1.4531521, %v1021_v15  ;;  %2803 = vpow2.f32 %v1780_v61  ;;  %v5214_v52 = vld [vmem:[#allocation56_spill] sm:$0xff] }
 0x15a   :  { %5200 = vst [vmem:[#allocation17_spill] sm:$0xff] %v3846_v19  ;;  %v2800_v30 = vpop.eup %2799  ;;  %v3858_v0 = vmul.f32 0.5, %v217_v40  ;;  %v1210_v1 = vadd.f32 1.4214138, %v1146_v14  ;;  %v1148_v49 = vmul.f32 %v1084_v36, %v5197_v28  ;;  %v1782_v31 = vmul.f32 1.442695, %v1683_v24 }
 0x15b   :  { %5201 = vst [vmem:[#allocation21_spill] sm:$0xff] %v3850_v3  ;;  %v3861_v25 = vmul.f32 0.5, %v282_v17  ;;  %v1211_v56 = vadd.f32 1.4214138, %v1147_v5  ;;  %v1149_v55 = vmul.f32 %v1085_v21, %v5199_v48  ;;  %v2802_v4 = vpop.eup %2801  ;;  %v660_v20 = vmul.f32 0.3275911, %v596_v12 }
 0x15c   :  { %5202 = vst [vmem:[#allocation58_spill] sm:$0xff] %v3852_v26  ;;  %v1274_v9 = vmul.f32 %v1210_v1, %v5193_v58  ;;  %v1212_v22 = vadd.f32 1.4214138, %v1148_v49  ;;  %v3866_v32 = vadd.f32 %v346_v46, %v3114_v2  ;;  %v850_v40 = vmul.f32 %v2800_v30, %v722_v63 }
 0x15d   :  { %5203 = vst [vmem:[#allocation62_spill] sm:$0xff] %v3858_v0  ;;  %v661_v61 = vmul.f32 0.3275911, %v3855_v51  ;;  %v1275_v15 = vmul.f32 %v1211_v56, %v5196_v37  ;;  %v1213_v24 = vadd.f32 1.4214138, %v1149_v55  ;;  %v1620_v17 = vsub.f32 0.0, %v596_v12 }
 0x15e   :  { %5204 = vst [vmem:[#allocation64_spill] sm:$0xff] %v3861_v25  ;;  %v1338_v14 = vadd.f32 -0.28449672, %v1274_v9  ;;  %v1276_v36 = vmul.f32 %v1212_v22, %v5197_v28  ;;  %v3872_v5 = vadd.f32 %v411_v11, %v3122_v6  ;;  %v851_v21 = vmul.f32 %v2802_v4, %v723_v47 }
 0x15f   :  { %2805 = vpow2.f32 %v1782_v31  ;;  %v1339_v1 = vadd.f32 -0.28449672, %v1275_v15  ;;  %v1277_v49 = vmul.f32 %v1213_v24, %v5199_v48  ;;  %v3875_v46 = vpop.eup %2803  ;;  %v724_v63 = vadd.f32 1.0, %v660_v20  ;;  %v5208_v24 = vld [vmem:[#allocation26_spill] sm:$0xff] }
 0x160   :  { %5205 = vst [vmem:[#allocation66_spill] sm:$0xff] %v3875_v46  ;;  %v1402_v25 = vmul.f32 %v1338_v14, %v5193_v58  ;;  %v1340_v0 = vadd.f32 -0.28449672, %v1276_v36  ;;  %v3879_v56 = vmul.f32 0.70710677, %v3866_v32  ;;  %v914_v55 = vsub.f32 2.0, %v850_v40 }
 0x161   :  { %v725_v9 = vadd.f32 1.0, %v661_v61  ;;  %v1403_v22 = vmul.f32 %v1339_v1, %v5196_v37  ;;  %v1341_v11 = vadd.f32 -0.28449672, %v1277_v49  ;;  %v1684_v8 = vmul.f32 %v1620_v17, %v596_v12  ;;  %v5209_v40 = vld [vmem:[#allocation27_spill] sm:$0xff] }
 0x162   :  { %5206 = vst [vmem:[#allocation97_spill] sm:$0xff] %v3879_v56  ;;  %v1466_v47 = vadd.f32 0.2548296, %v1402_v25  ;;  %v1404_v31 = vmul.f32 %v1340_v0, %v5197_v28  ;;  %v3884_v15 = vmul.f32 0.70710677, %v3872_v5  ;;  %vm1978_vm10 = vcmp.ge.f32.partialorder %v5208_v24, 0.0 }
 0x163   :  { %v915_v20 = vsub.f32 2.0, %v851_v21  ;;  %v1621_v14 = vsub.f32 0.0, %v3855_v51  ;;  %v1467_v36 = vadd.f32 0.2548296, %v1403_v22  ;;  %v1405_v10 = vmul.f32 %v1341_v11, %v5199_v48  ;;  %v5211_v17 = vld [vmem:[#allocation31_spill] sm:$0xff]  ;;  %v5213_v22 = vld [vmem:[#allocation32_spill] sm:$0xff] }
 0x164   :  { %5207 = vst [vmem:[#allocation98_spill] sm:$0xff] %v3884_v15  ;;  %vm1979_vm11 = vcmp.ge.f32.partialorder %v5209_v40, 0.0  ;;  %2807 = vrcp.f32 %v724_v63  ;;  %v1530_v61 = vmul.f32 %v1466_v47, %v5193_v58  ;;  %v1468_v12 = vadd.f32 0.2548296, %v1404_v31 }
 0x165   :  { %v598_v25 = vand.u32 2147483647, %v3879_v56  ;;  %v3892_v0 = vpop.eup %2805  ;;  %vm1980_vm12 = vcmp.ge.f32.partialorder %v5211_v17, 0.0  ;;  %v3895_v1 = vmul.f32 %v2800_v30, %v914_v55  ;;  %2809 = vrcp.f32 %v725_v9  ;;  %v5216_v30 = vld [vmem:[#allocation57_spill] sm:$0xff] }
 0x166   :  { %5210 = vst [vmem:[#allocation26_spill] sm:$0xff] %v3892_v0  ;;  %v1531_v21 = vmul.f32 %v1467_v36, %v5196_v37  ;;  %v1469_v49 = vadd.f32 0.2548296, %v1405_v10  ;;  %vm1981_vm13 = vcmp.ge.f32.partialorder %v5213_v22, 0.0  ;;  %v1784_v11 = vmul.f32 1.442695, %v1684_v8 }
 0x167   :  { %5212 = vst [vmem:[#allocation27_spill] sm:$0xff] %v3895_v1  ;;  %v1850_v46 = vmul.f32 %v5214_v52, %v1530_v61  ;;  %v1532_v58 = vmul.f32 %v1468_v12, %v5197_v28  ;;  %v3902_v47 = vand.u32 2147483647, %v3884_v15  ;;  %v3904_v31 = vmul.f32 %v2802_v4, %v915_v20  ;;  %v5217_v37 = vld [vmem:[#allocation23_spill] sm:$0xff]  ;;  %v219_v52 = vpop.f32.mrf.mxu0  ;;  %v5219_v61 = vld [vmem:[#allocation24_spill] sm:$0xff]  ;;  %v5221_v4 = vld [vmem:[#allocation65_spill] sm:$0xff] }
 0x168   :  { %v1685_v56 = vmul.f32 %v1621_v14, %v3855_v51  ;;  %v1851_v55 = vmul.f32 %v5216_v30, %v1531_v21  ;;  %v1533_v0 = vmul.f32 %v1469_v49, %v5199_v48  ;;  %v442_v10 = vmul.f32 0.5, %v5217_v37  ;;  %v5220_v15 = vld [vmem:[#allocation28_spill] sm:$0xff]  ;;  %v5222_v21 = vld [vmem:[#allocation29_spill] sm:$0xff] }
 0x169   :  { %5215 = vst [vmem:[#allocation31_spill] sm:$0xff] %v3904_v31  ;;  %v1914_v36 = vsub.f32 1.0, %v1850_v46  ;;  %v1852_v8 = vmul.f32 %v5218_v60, %v1532_v58  ;;  %v662_v1 = vmul.f32 0.3275911, %v598_v25  ;;  %v443_v28 = vmul.f32 0.5, %v5219_v61 }
 0x16a   :  { %v1915_v12 = vsub.f32 1.0, %v1851_v55  ;;  %v444_v3 = vmul.f32 0.5, %v5220_v15  ;;  %v1853_v20 = vmul.f32 %v5221_v4, %v1533_v0  ;;  %v2808_v31 = vpop.eup %2807  ;;  %v445_v30 = vmul.f32 0.5, %v5222_v21 }
 0x16b   :  { %v2042_v51 = vsub.f32 0.0, %v1914_v36  ;;  %v1916_v14 = vsub.f32 1.0, %v1852_v8  ;;  %v663_v48 = vmul.f32 0.3275911, %v3902_v47  ;;  %v2810_v49 = vpop.eup %2809  ;;  %v1786_v46 = vmul.f32 1.442695, %v1685_v56 }
 0x16c   :  { %v2043_v37 = vsub.f32 0.0, %v1915_v12  ;;  %v1917_v60 = vsub.f32 1.0, %v1853_v20  ;;  %v3917_v58 = vadd.f32 %v219_v52, %v3104_v57  ;;  %v726_v61 = vadd.f32 1.0, %v662_v1 }
 0x16d   :  { %v2106_v55 = vsel %vm1978_vm10, %v1914_v36, %v2042_v51  ;;  %v2044_v15 = vsub.f32 0.0, %v1916_v14  ;;  %v1622_v0 = vsub.f32 0.0, %v598_v25  ;;  %v852_v4 = vmul.f32 %v2808_v31, %v724_v63 }
 0x16e   :  { %v2170_v43 = vadd.f32 1.0, %v2106_v55  ;;  %v2107_v8 = vsel %vm1979_vm11, %v1915_v12, %v2043_v37  ;;  %v2045_v21 = vsub.f32 0.0, %v1917_v60  ;;  %v853_v26 = vmul.f32 %v2810_v49, %v725_v9  ;;  %v284_v12 = vpop.f32.mrf.mxu1 }
 0x16f   :  { %v2171_v19 = vadd.f32 1.0, %v2107_v8  ;;  %v2108_v56 = vsel %vm1980_vm12, %v1916_v14, %v2044_v15  ;;  %v3925_v20 = vadd.f32 1.0, %v663_v48  ;;  %v3930_v1 = vmul.f32 0.70710677, %v3917_v58 }
 0x170   :  { %v2234_v52 = vmul.f32 %v2170_v43, %v442_v10  ;;  %v2172_v59 = vadd.f32 1.0, %v2108_v56  ;;  %v2109_v24 = vsel %vm1981_vm13, %v1917_v60, %v2045_v21  ;;  %2811 = vrcp.f32 %v726_v61  ;;  %v5225_v10 = vld [vmem:[#allocation68_spill] sm:$0xff] }
 0x171   :  { %5223 = vst [vmem:[#allocation32_spill] sm:$0xff] %v3930_v1  ;;  %v2235_v63 = vmul.f32 %v2171_v19, %v443_v28  ;;  %v2173_v36 = vadd.f32 1.0, %v2109_v24  ;;  %v1686_v40 = vmul.f32 %v1622_v0, %v598_v25  ;;  %v916_v9 = vsub.f32 2.0, %v852_v4  ;;  %v349_v4 = vpop.f32.mrf.mxu2 }
 0x172   :  { %2813 = vpow2.f32 %v1784_v11  ;;  %2508 = vmatmul.f32.gmra.mxu2 %v2234_v52  ;;  %v2236_v17 = vmul.f32 %v2172_v59, %v444_v3  ;;  %v1623_v51 = vsub.f32 0.0, %v3902_v47  ;;  %v917_v14 = vsub.f32 2.0, %v853_v26 }
 0x173   :  { %2573 = vmatmul.f32.gmra.mxu3 %v2235_v63  ;;  %v2237_v43 = vmul.f32 %v2173_v36, %v445_v30  ;;  %v3934_v22 = vmul.f32 0.5, %v3866_v32  ;;  %v1022_v48 = vmul.f32 1.0614054, %v5225_v10  ;;  %2815 = vrcp.f32 %v3925_v20 }
 0x174   :  { %2381 = vmatmul.f32.gmra.mxu0 %v2236_v17  ;;  %v600_v19 = vand.u32 2147483647, %v3930_v1  ;;  %v3940_v25 = vadd.f32 %v284_v12, %v3106_v62  ;;  %v1023_v59 = vmul.f32 1.0614054, %v3520_v29  ;;  %2817 = vpow2.f32 %v1786_v46 }
 0x175   :  { %5224 = vst [vmem:[#allocation56_spill] sm:$0xff] %v3934_v22  ;;  %2446 = vmatmul.f32.gmra.mxu1 %v2237_v43  ;;  %v1788_v3 = vmul.f32 1.442695, %v1686_v40  ;;  %v1086_v26 = vadd.f32 -1.4531521, %v1022_v48  ;;  %v3944_v32 = vmul.f32 %v2808_v31, %v916_v9  ;;  %v3947_v28 = vmul.f32 0.5, %v3872_v5 }
 0x176   :  { %v1024_v11 = vmul.f32 1.0614054, %v3530_v18  ;;  %v1687_v30 = vmul.f32 %v1623_v51, %v3902_v47  ;;  %v1087_v37 = vadd.f32 -1.4531521, %v1023_v59  ;;  %v2812_v60 = vpop.eup %2811  ;;  %v1624_v55 = vsub.f32 0.0, %v600_v19  ;;  %v5241_v22 = vld [vmem:[#allocation35_spill] sm:$0xff] }
 0x177   :  { %5226 = vst [vmem:[#allocation57_spill] sm:$0xff] %v3947_v28  ;;  %v1150_v15 = vmul.f32 %v1086_v26, %v5225_v10  ;;  %v1025_v46 = vmul.f32 1.0614054, %v3546_v23  ;;  %v3954_v21 = vmul.f32 %v2810_v49, %v917_v14  ;;  %v664_v31 = vmul.f32 0.3275911, %v600_v19 }
 0x178   :  { %v1088_v0 = vadd.f32 -1.4531521, %v1024_v11  ;;  %v3952_v8 = vpop.eup %2813  ;;  %v3957_v56 = vmul.f32 0.70710677, %v3940_v25  ;;  %v1151_v5 = vmul.f32 %v1087_v37, %v3520_v29  ;;  %2819 = vpow2.f32 %v1788_v3  ;;  %v414_v37 = vpop.f32.mrf.mxu3 }
 0x179   :  { %v1214_v47 = vadd.f32 1.4214138, %v1150_v15  ;;  %v1089_v24 = vadd.f32 -1.4531521, %v1025_v46  ;;  %v2816_v63 = vpop.eup %2815  ;;  %v854_v36 = vmul.f32 %v2812_v60, %v726_v61  ;;  %v1790_v40 = vmul.f32 1.442695, %v1687_v30 }
 0x17a   :  { %5227 = vst [vmem:[#allocation23_spill] sm:$0xff] %v3957_v56  ;;  %v1152_v52 = vmul.f32 %v1088_v0, %v3530_v18  ;;  %v1215_v12 = vadd.f32 1.4214138, %v1151_v5  ;;  %v3962_v9 = vadd.f32 %v349_v4, %v3114_v2  ;;  %v3964_v49 = vpop.eup %2817  ;;  %v1688_v17 = vmul.f32 %v1624_v55, %v600_v19 }
 0x17b   :  { %v1278_v51 = vmul.f32 %v1214_v47, %v5225_v10  ;;  %v1153_v43 = vmul.f32 %v1089_v24, %v3546_v23  ;;  %v3969_v48 = vmul.f32 0.5, %v3917_v58  ;;  %v3971_v59 = vadd.f32 1.0, %v664_v31 }
 0x17c   :  { %v1216_v14 = vadd.f32 1.4214138, %v1152_v52  ;;  %v3974_v61 = vand.u32 2147483647, %v3957_v56  ;;  %v1279_v3 = vmul.f32 %v1215_v12, %v3520_v29  ;;  %v855_v26 = vmul.f32 %v2816_v63, %v3925_v20 }
 0x17d   :  { %5228 = vst [vmem:[#allocation59_spill] sm:$0xff] %v3969_v48  ;;  %v1342_v11 = vadd.f32 -0.28449672, %v1278_v51  ;;  %v1217_v30 = vadd.f32 1.4214138, %v1153_v43  ;;  %v918_v55 = vsub.f32 2.0, %v854_v36  ;;  %2821 = vpow2.f32 %v1790_v40 }
 0x17e   :  { %v1280_v19 = vmul.f32 %v1216_v14, %v3530_v18  ;;  %v1343_v15 = vadd.f32 -0.28449672, %v1279_v3  ;;  %v3980_v58 = vmul.f32 0.70710677, %v3962_v9  ;;  %v3982_v0 = vpop.eup %2819  ;;  %v1792_v46 = vmul.f32 1.442695, %v1688_v17 }
 0x17f   :  { %5230 = vst [vmem:[#allocation28_spill] sm:$0xff] %v3982_v0  ;;  %v1406_v4 = vmul.f32 %v1342_v11, %v5225_v10  ;;  %v1281_v5 = vmul.f32 %v1217_v30, %v3546_v23  ;;  %2823 = vrcp.f32 %v3971_v59  ;;  %v665_v20 = vmul.f32 0.3275911, %v3974_v61  ;;  %v5231_v17 = vld [vmem:[#allocation33_spill] sm:$0xff]  ;;  %v5233_v11 = vld [vmem:[#allocation36_spill] sm:$0xff] }
 0x180   :  { %5229 = vst [vmem:[#allocation24_spill] sm:$0xff] %v3980_v58  ;;  %v1344_v31 = vadd.f32 -0.28449672, %v1280_v19  ;;  %v1407_v47 = vmul.f32 %v1343_v15, %v3520_v29  ;;  %v3990_v52 = vadd.f32 %v414_v37, %v3122_v6  ;;  %v919_v24 = vsub.f32 2.0, %v855_v26  ;;  %v5235_v15 = vld [vmem:[#allocation38_spill] sm:$0xff] }
 0x181   :  { %v1470_v36 = vadd.f32 0.2548296, %v1406_v4  ;;  %v1345_v12 = vadd.f32 -0.28449672, %v1281_v5  ;;  %vm1982_vm14 = vcmp.ge.f32.partialorder %v5231_v17, 0.0  ;;  %v3994_v51 = vmul.f32 %v2812_v60, %v918_v55  ;;  %v5236_v55 = vld [vmem:[#allocation30_spill] sm:$0xff] }
 0x182   :  { %v1408_v40 = vmul.f32 %v1344_v31, %v3530_v18  ;;  %v3997_v14 = vmul.f32 0.5, %v3940_v25  ;;  %v1471_v43 = vadd.f32 0.2548296, %v1407_v47  ;;  %v602_v3 = vand.u32 2147483647, %v3980_v58 }
 0x183   :  { %vm1983_vm15 = vcmp.ge.f32.partialorder %v5233_v11, 0.0  ;;  %2825 = vpow2.f32 %v1792_v46  ;;  %v1534_v19 = vmul.f32 %v1470_v36, %v5225_v10  ;;  %v1409_v30 = vmul.f32 %v1345_v12, %v3546_v23  ;;  %v4003_v37 = vpop.eup %2821  ;;  %v5238_v46 = vld [vmem:[#allocation67_spill] sm:$0xff] }
 0x184   :  { %5232 = vst [vmem:[#allocation65_spill] sm:$0xff] %v3997_v14  ;;  %v1472_v26 = vadd.f32 0.2548296, %v1408_v40  ;;  %vm1984_vm0 = vcmp.ge.f32.partialorder %v5235_v15, 0.0  ;;  %v729_v60 = vadd.f32 1.0, %v665_v20  ;;  %v446_v4 = vmul.f32 0.5, %v5236_v55 }
 0x185   :  { %5234 = vst [vmem:[#allocation29_spill] sm:$0xff] %v4003_v37  ;;  %v1535_v25 = vmul.f32 %v1471_v43, %v3520_v29  ;;  %v4009_v31 = vmul.f32 0.70710677, %v3990_v52  ;;  %v4011_v5 = vmul.f32 %v2816_v63, %v919_v24  ;;  %v1854_v47 = vmul.f32 %v5238_v46, %v1534_v19  ;;  %v2824_v40 = vpop.eup %2823  ;;  %v5239_v12 = vld [vmem:[#allocation43_spill] sm:$0xff]  ;;  %v5240_v20 = vld [vmem:[#allocation34_spill] sm:$0xff]  ;;  %v222_v43 = vpop.f32.mrf.mxu0 }
 0x186   :  { %v1536_v10 = vmul.f32 %v1472_v26, %v3530_v18  ;;  %v1473_v36 = vadd.f32 0.2548296, %v1409_v30  ;;  %vm1985_vm1 = vcmp.ge.f32.partialorder %v5239_v12, 0.0  ;;  %v1625_v14 = vsub.f32 0.0, %v3974_v61  ;;  %v5242_v24 = vld [vmem:[#allocation71_spill] sm:$0xff] }
 0x187   :  { %5237 = vst [vmem:[#allocation68_spill] sm:$0xff] %v4009_v31  ;;  %v447_v48 = vmul.f32 0.5, %v5240_v20  ;;  %v1855_v55 = vmul.f32 %v3513_v34, %v1535_v25  ;;  %v666_v29 = vmul.f32 0.3275911, %v602_v3  ;;  %v1918_v28 = vsub.f32 1.0, %v1854_v47  ;;  %v5243_v26 = vld [vmem:[#allocation39_spill] sm:$0xff] }
 0x188   :  { %v448_v63 = vmul.f32 0.5, %v5241_v22  ;;  %v1856_v58 = vmul.f32 %v5242_v24, %v1536_v10  ;;  %v1537_v19 = vmul.f32 %v1473_v36, %v3546_v23  ;;  %2827 = vrcp.f32 %v729_v60  ;;  %v5245_v34 = vld [vmem:[#allocation74_spill] sm:$0xff]  ;;  %v287_v22 = vpop.f32.mrf.mxu1 }
 0x189   :  { %v1919_v18 = vsub.f32 1.0, %v1855_v55  ;;  %v449_v30 = vmul.f32 0.5, %v5243_v26  ;;  %v603_v46 = vand.u32 2147483647, %v4009_v31  ;;  %v4024_v56 = vpop.eup %2825  ;;  %v2046_v20 = vsub.f32 0.0, %v1918_v28 }
 0x18a   :  { %5244 = vst [vmem:[#allocation33_spill] sm:$0xff] %v4024_v56  ;;  %v1920_v1 = vsub.f32 1.0, %v1856_v58  ;;  %v1857_v25 = vmul.f32 %v5245_v34, %v1537_v19  ;;  %v4028_v47 = vadd.f32 %v222_v43, %v3104_v57  ;;  %v856_v10 = vmul.f32 %v2824_v40, %v3971_v59 }
 0x18b   :  { %v1689_v23 = vmul.f32 %v1625_v14, %v3974_v61  ;;  %v2047_v36 = vsub.f32 0.0, %v1919_v18  ;;  %v730_v55 = vadd.f32 1.0, %v666_v29  ;;  %v2110_v24 = vsel %vm1982_vm14, %v1918_v28, %v2046_v20 }
 0x18c   :  { %v2048_v26 = vsub.f32 0.0, %v1920_v1  ;;  %v1921_v31 = vsub.f32 1.0, %v1857_v25  ;;  %v1626_v56 = vsub.f32 0.0, %v602_v3  ;;  %v2174_v37 = vadd.f32 1.0, %v2110_v24 }
 0x18d   :  { %v2111_v58 = vsel %vm1983_vm15, %v1919_v18, %v2047_v36  ;;  %v667_v19 = vmul.f32 0.3275911, %v603_v46  ;;  %v4037_v43 = vadd.f32 %v287_v22, %v3106_v62  ;;  %v4042_v14 = vmul.f32 0.70710677, %v4028_v47 }
 0x18e   :  { %v2175_v34 = vadd.f32 1.0, %v2111_v58  ;;  %v2112_v59 = vsel %vm1984_vm0, %v1920_v1, %v2048_v26  ;;  %v2049_v61 = vsub.f32 0.0, %v1921_v31  ;;  %v2828_v28 = vpop.eup %2827  ;;  %v920_v17 = vsub.f32 2.0, %v856_v10  ;;  %v352_v10 = vpop.f32.mrf.mxu2 }
 0x18f   :  { %5246 = vst [vmem:[#allocation36_spill] sm:$0xff] %v4042_v14  ;;  %v2238_v29 = vmul.f32 %v2174_v37, %v446_v4  ;;  %v2176_v20 = vadd.f32 1.0, %v2112_v59  ;;  %2829 = vrcp.f32 %v730_v55  ;;  %v1794_v25 = vmul.f32 1.442695, %v1689_v23 }
 0x190   :  { %v2239_v11 = vmul.f32 %v2175_v34, %v447_v48  ;;  %v2113_v18 = vsel %vm1985_vm1, %v1921_v31, %v2049_v61  ;;  %v1690_v22 = vmul.f32 %v1626_v56, %v602_v3  ;;  %v4047_v1 = vmul.f32 0.5, %v3962_v9  ;;  %v5249_v3 = vld [vmem:[#allocation77_spill] sm:$0xff] }
 0x191   :  { %2511 = vmatmul.f32.gmra.mxu2 %v2238_v29  ;;  %v2240_v36 = vmul.f32 %v2176_v20, %v448_v63  ;;  %v2177_v24 = vadd.f32 1.0, %v2113_v18  ;;  %v1627_v15 = vsub.f32 0.0, %v603_v46  ;;  %v857_v26 = vmul.f32 %v2828_v28, %v729_v60 }
 0x192   :  { %5247 = vst [vmem:[#allocation38_spill] sm:$0xff] %v4047_v1  ;;  %2576 = vmatmul.f32.gmra.mxu3 %v2239_v11  ;;  %v4049_v58 = vadd.f32 1.0, %v667_v19  ;;  %v604_v37 = vand.u32 2147483647, %v4042_v14  ;;  %v4053_v4 = vmul.f32 0.70710677, %v4037_v43  ;;  %v4055_v48 = vmul.f32 %v2824_v40, %v920_v17 }
 0x193   :  { %2384 = vmatmul.f32.gmra.mxu0 %v2240_v36  ;;  %v2241_v56 = vmul.f32 %v2177_v24, %v449_v30  ;;  %v1026_v31 = vmul.f32 1.0614054, %v5249_v3  ;;  %v1027_v12 = vmul.f32 1.0614054, %v3570_v39  ;;  %2831 = vpow2.f32 %v1794_v25 }
 0x194   :  { %5248 = vst [vmem:[#allocation30_spill] sm:$0xff] %v4053_v4  ;;  %v1796_v9 = vmul.f32 1.442695, %v1690_v22  ;;  %v4060_v60 = vmul.f32 0.5, %v3990_v52  ;;  %v4063_v63 = vand.u32 2147483647, %v4053_v4  ;;  %v1691_v19 = vmul.f32 %v1627_v15, %v603_v46 }
 0x195   :  { %v2830_v23 = vpop.eup %2829  ;;  %2449 = vmatmul.f32.gmra.mxu1 %v2241_v56  ;;  %v1090_v40 = vadd.f32 -1.4531521, %v1026_v31  ;;  %v1091_v34 = vadd.f32 -1.4531521, %v1027_v12  ;;  %v1028_v30 = vmul.f32 1.0614054, %v3576_v44  ;;  %2833 = vrcp.f32 %v4049_v58 }
 0x196   :  { %5250 = vst [vmem:[#allocation67_spill] sm:$0xff] %v4060_v60  ;;  %v921_v59 = vsub.f32 2.0, %v857_v26  ;;  %v668_v61 = vmul.f32 0.3275911, %v604_v37  ;;  %v1029_v17 = vmul.f32 1.0614054, %v3591_v13  ;;  %v4071_v25 = vadd.f32 %v352_v10, %v3114_v2 }
 0x197   :  { %v1154_v52 = vmul.f32 %v1090_v40, %v5249_v3  ;;  %v1155_v29 = vmul.f32 %v1091_v34, %v3570_v39  ;;  %v1092_v20 = vadd.f32 -1.4531521, %v1028_v30  ;;  %v858_v11 = vmul.f32 %v2830_v23, %v730_v55  ;;  %v417_v34 = vpop.f32.mrf.mxu3  ;;  %v5262_v60 = vld [vmem:[#allocation48_spill] sm:$0xff] }
 0x198   :  { %2835 = vpow2.f32 %v1796_v9  ;;  %v669_v46 = vmul.f32 0.3275911, %v4063_v63  ;;  %v1093_v18 = vadd.f32 -1.4531521, %v1029_v17  ;;  %v1798_v22 = vmul.f32 1.442695, %v1691_v19 }
 0x199   :  { %v1218_v36 = vadd.f32 1.4214138, %v1154_v52  ;;  %v1219_v24 = vadd.f32 1.4214138, %v1155_v29  ;;  %v1156_v15 = vmul.f32 %v1092_v20, %v3576_v44  ;;  %v4075_v26 = vpop.eup %2831  ;;  %v4077_v56 = vmul.f32 %v2828_v28, %v921_v59 }
 0x19a   :  { %5251 = vst [vmem:[#allocation43_spill] sm:$0xff] %v4075_v26  ;;  %v4079_v31 = vadd.f32 1.0, %v668_v61  ;;  %v1628_v12 = vsub.f32 0.0, %v604_v37  ;;  %v1157_v10 = vmul.f32 %v1093_v18, %v3591_v13  ;;  %v4085_v19 = vmul.f32 0.70710677, %v4071_v25 }
 0x19b   :  { %v1282_v55 = vmul.f32 %v1218_v36, %v5249_v3  ;;  %v1283_v9 = vmul.f32 %v1219_v24, %v3570_v39  ;;  %v1220_v40 = vadd.f32 1.4214138, %v1156_v15  ;;  %v4087_v30 = vpop.eup %2833  ;;  %v922_v17 = vsub.f32 2.0, %v858_v11 }
 0x19c   :  { %5252 = vst [vmem:[#allocation34_spill] sm:$0xff] %v4085_v19  ;;  %v4090_v28 = vmul.f32 0.5, %v4028_v47  ;;  %v4092_v59 = vadd.f32 1.0, %v669_v46  ;;  %v1221_v61 = vadd.f32 1.4214138, %v1157_v10  ;;  %2837 = vpow2.f32 %v1798_v22 }
 0x19d   :  { %v1346_v52 = vadd.f32 -0.28449672, %v1282_v55  ;;  %v1347_v29 = vadd.f32 -0.28449672, %v1283_v9  ;;  %v1284_v20 = vmul.f32 %v1220_v40, %v3576_v44  ;;  %2839 = vrcp.f32 %v4079_v31 }
 0x19e   :  { %5253 = vst [vmem:[#allocation35_spill] sm:$0xff] %v4090_v28  ;;  %v4095_v18 = vpop.eup %2835  ;;  %v1692_v36 = vmul.f32 %v1628_v12, %v604_v37  ;;  %v1285_v24 = vmul.f32 %v1221_v61, %v3591_v13  ;;  %v4100_v11 = vadd.f32 %v417_v34, %v3122_v6  ;;  %v606_v22 = vand.u32 2147483647, %v4085_v19  ;;  %v5256_v61 = vld [vmem:[#allocation46_spill] sm:$0xff]  ;;  %v5260_v28 = vld [vmem:[#allocation53_spill] sm:$0xff] }
 0x19f   :  { %5254 = vst [vmem:[#allocation71_spill] sm:$0xff] %v4095_v18  ;;  %v1410_v47 = vmul.f32 %v1346_v52, %v5249_v3  ;;  %v1411_v46 = vmul.f32 %v1347_v29, %v3570_v39  ;;  %v1348_v15 = vadd.f32 -0.28449672, %v1284_v20  ;;  %v4105_v10 = vmul.f32 %v2830_v23, %v922_v17  ;;  %v5257_v52 = vld [vmem:[#allocation52_spill] sm:$0xff] }
 0x1a0   :  { %v4109_v55 = vmul.f32 %v4087_v30, %v4049_v58  ;;  %2841 = vrcp.f32 %v4092_v59  ;;  %v1349_v37 = vadd.f32 -0.28449672, %v1285_v24  ;;  %v4114_v34 = vmul.f32 0.70710677, %v4100_v11 }
 0x1a1   :  { %v1474_v12 = vadd.f32 0.2548296, %v1410_v47  ;;  %v1475_v9 = vadd.f32 0.2548296, %v1411_v46  ;;  %v1412_v40 = vmul.f32 %v1348_v15, %v3576_v44  ;;  %vm1986_vm2 = vcmp.ge.f32.partialorder %v5256_v61, 0.0 }
 0x1a2   :  { %5255 = vst [vmem:[#allocation39_spill] sm:$0xff] %v4114_v34  ;;  %vm1987_vm3 = vcmp.ge.f32.partialorder %v5257_v52, 0.0  ;;  %v1800_v23 = vmul.f32 1.442695, %v1692_v36  ;;  %v4119_v17 = vmul.f32 0.5, %v4037_v43  ;;  %v1629_v58 = vsub.f32 0.0, %v4063_v63  ;;  %v4123_v20 = vpop.eup %2837 }
 0x1a3   :  { %v1413_v29 = vmul.f32 %v1349_v37, %v3591_v13  ;;  %5259 = vst [vmem:[#allocation77_spill] sm:$0xff] %v4123_v20  ;;  %v1538_v24 = vmul.f32 %v1474_v12, %v5249_v3  ;;  %v1539_v47 = vmul.f32 %v1475_v9, %v3570_v39  ;;  %v1476_v46 = vadd.f32 0.2548296, %v1412_v40  ;;  %v4127_v19 = vpop.eup %2839  ;;  %v5261_v43 = vld [vmem:[#allocation40_spill] sm:$0xff]  ;;  %v5265_v3 = vld [vmem:[#allocation79_spill] sm:$0xff]  ;;  %v225_v40 = vpop.f32.mrf.mxu0 }
 0x1a4   :  { %5258 = vst [vmem:[#allocation74_spill] sm:$0xff] %v4119_v17  ;;  %v670_v15 = vmul.f32 0.3275911, %v606_v22  ;;  %vm1988_vm4 = vcmp.ge.f32.partialorder %v5260_v28, 0.0  ;;  %v923_v36 = vsub.f32 2.0, %v4109_v55  ;;  %v450_v17 = vmul.f32 0.5, %v5261_v43 }
 0x1a5   :  { %v451_v1 = vmul.f32 0.5, %v5262_v60  ;;  %v1477_v4 = vadd.f32 0.2548296, %v1413_v29  ;;  %v5263_v37 = vld [vmem:[#allocation60_spill] sm:$0xff]  ;;  %v1859_v12 = vmul.f32 %v5265_v3, %v1539_v47  ;;  %v1540_v39 = vmul.f32 %v1476_v46, %v3576_v44 }
 0x1a6   :  { %vm1989_vm5 = vcmp.ge.f32.partialorder %v5263_v37, 0.0  ;;  %v5264_v20 = vld [vmem:[#allocation76_spill] sm:$0xff]  ;;  %v607_v9 = vand.u32 2147483647, %v4114_v34  ;;  %v4138_v14 = vpop.eup %2841  ;;  %2843 = vpow2.f32 %v1800_v23  ;;  %v1693_v55 = vmul.f32 %v1629_v58, %v4063_v63 }
 0x1a7   :  { %v1858_v18 = vmul.f32 %v5264_v20, %v1538_v24  ;;  %v1541_v43 = vmul.f32 %v1477_v4, %v3591_v13  ;;  %v1630_v60 = vsub.f32 0.0, %v606_v22  ;;  %v1923_v26 = vsub.f32 1.0, %v1859_v12  ;;  %v5266_v24 = vld [vmem:[#allocation50_spill] sm:$0xff]  ;;  %v290_v12 = vpop.f32.mrf.mxu1 }
 0x1a8   :  { %v1860_v0 = vmul.f32 %v3562_v50, %v1540_v39  ;;  %v4143_v20 = vadd.f32 1.0, %v670_v15  ;;  %v860_v44 = vmul.f32 %v4127_v19, %v4079_v31  ;;  %v452_v47 = vmul.f32 0.5, %v5266_v24 }
 0x1a9   :  { %v1922_v29 = vsub.f32 1.0, %v1858_v18  ;;  %v1861_v46 = vmul.f32 %v3568_v38, %v1541_v43  ;;  %v226_v23 = vadd.f32 %v225_v40, %v3104_v57  ;;  %v2051_v63 = vsub.f32 0.0, %v1923_v26 }
 0x1aa   :  { %v1924_v58 = vsub.f32 1.0, %v1860_v0  ;;  %v671_v13 = vmul.f32 0.3275911, %v607_v9  ;;  %v861_v4 = vmul.f32 %v4138_v14, %v4092_v59  ;;  %v1802_v18 = vmul.f32 1.442695, %v1693_v55 }
 0x1ab   :  { %v2050_v3 = vsub.f32 0.0, %v1922_v29  ;;  %v1925_v50 = vsub.f32 1.0, %v1861_v46  ;;  %v1694_v15 = vmul.f32 %v1630_v60, %v606_v22  ;;  %v2115_v39 = vsel %vm1987_vm3, %v1923_v26, %v2051_v63 }
 0x1ac   :  { %v2052_v38 = vsub.f32 0.0, %v1924_v58  ;;  %2845 = vrcp.f32 %v4143_v20  ;;  %v4157_v40 = vpop.eup %2843  ;;  %v2179_v43 = vadd.f32 1.0, %v2115_v39  ;;  %v4159_v34 = vmul.f32 0.70710677, %v226_v23 }
 0x1ad   :  { %v2114_v31 = vsel %vm1986_vm2, %v1922_v29, %v2050_v3  ;;  %5267 = vst [vmem:[#allocation46_spill] sm:$0xff] %v4157_v40  ;;  %v2053_v24 = vsub.f32 0.0, %v1925_v50  ;;  %v735_v22 = vadd.f32 1.0, %v671_v13  ;;  %v1631_v55 = vsub.f32 0.0, %v607_v9  ;;  %v5269_v3 = vld [vmem:[#allocation54_spill] sm:$0xff] }
 0x1ae   :  { %v2178_v0 = vadd.f32 1.0, %v2114_v31  ;;  %5268 = vst [vmem:[#allocation52_spill] sm:$0xff] %v4159_v34  ;;  %v2116_v59 = vsel %vm1988_vm4, %v1924_v58, %v2052_v38  ;;  %v4164_v61 = vadd.f32 %v290_v12, %v3106_v62  ;;  %v2243_v26 = vmul.f32 %v2179_v43, %v451_v1 }
 0x1af   :  { %v2180_v60 = vadd.f32 1.0, %v2116_v59  ;;  %v2117_v29 = vsel %vm1989_vm5, %v1925_v50, %v2053_v24  ;;  %v924_v46 = vsub.f32 2.0, %v860_v44  ;;  %v453_v63 = vmul.f32 0.5, %v5269_v3  ;;  %v420_v59 = vpop.f32.mrf.mxu3 }
 0x1b0   :  { %v2242_v52 = vmul.f32 %v2178_v0, %v450_v17  ;;  %v2181_v31 = vadd.f32 1.0, %v2117_v29  ;;  %v1804_v39 = vmul.f32 1.442695, %v1694_v15  ;;  %v925_v40 = vsub.f32 2.0, %v861_v4  ;;  %2579 = vmatmul.f32.gmra.mxu3 %v2243_v26  ;;  %v355_v15 = vpop.f32.mrf.mxu2 }
 0x1b1   :  { %v2244_v28 = vmul.f32 %v2180_v60, %v452_v47  ;;  %v608_v58 = vand.u32 2147483647, %v4159_v34  ;;  %v4171_v13 = vmul.f32 0.70710677, %v4164_v61  ;;  %v4176_v1 = vmul.f32 %v4087_v30, %v923_v36  ;;  %v5312_v34 = vld [vmem:[#allocation25_spill] sm:$0xff] }
 0x1b2   :  { %2514 = vmatmul.f32.gmra.mxu2 %v2242_v52  ;;  %v4173_v17 = vpop.eup %2845  ;;  %v2245_v37 = vmul.f32 %v2181_v31, %v453_v63  ;;  %v4179_v44 = vmul.f32 0.5, %v4071_v25  ;;  %2847 = vrcp.f32 %v735_v22  ;;  %v1695_v4 = vmul.f32 %v1631_v55, %v607_v9 }
 0x1b3   :  { %5270 = vst [vmem:[#allocation53_spill] sm:$0xff] %v4171_v13  ;;  %2849 = vpow2.f32 %v1802_v18  ;;  %2387 = vmatmul.f32.gmra.mxu0 %v2244_v28  ;;  %v4182_v47 = vand.u32 2147483647, %v4171_v13  ;;  %v1030_v50 = vmul.f32 1.0614054, %v3593_v27  ;;  %v4186_v12 = vmul.f32 %v4127_v19, %v924_v46 }
 0x1b4   :  { %5271 = vst [vmem:[#allocation40_spill] sm:$0xff] %v4179_v44  ;;  %2452 = vmatmul.f32.gmra.mxu1 %v2245_v37  ;;  %2851 = vpow2.f32 %v1804_v39  ;;  %v4189_v30 = vmul.f32 0.5, %v4100_v11  ;;  %v1031_v25 = vmul.f32 1.0614054, %v3629_v16  ;;  %v4193_v36 = vmul.f32 %v4138_v14, %v925_v40 }
 0x1b5   :  { %v672_v9 = vmul.f32 0.3275911, %v608_v58  ;;  %v673_v18 = vmul.f32 0.3275911, %v4182_v47  ;;  %v1094_v38 = vadd.f32 -1.4531521, %v1030_v50  ;;  %v4199_v24 = vadd.f32 %v355_v15, %v3114_v2 }
 0x1b6   :  { %5272 = vst [vmem:[#allocation48_spill] sm:$0xff] %v4189_v30  ;;  %v1095_v0 = vadd.f32 -1.4531521, %v1031_v25  ;;  %v1032_v43 = vmul.f32 1.0614054, %v3699_v33  ;;  %v4201_v55 = vmul.f32 0.5, %v226_v23  ;;  %v862_v26 = vmul.f32 %v4173_v17, %v4143_v20 }
 0x1b7   :  { %v1033_v19 = vmul.f32 1.0614054, %v3704_v41  ;;  %v1806_v11 = vmul.f32 1.442695, %v1695_v4  ;;  %v1632_v52 = vsub.f32 0.0, %v608_v58  ;;  %v1158_v14 = vmul.f32 %v1094_v38, %v3593_v27 }
 0x1b8   :  { %5273 = vst [vmem:[#allocation60_spill] sm:$0xff] %v4201_v55  ;;  %v2848_v40 = vpop.eup %2847  ;;  %v1159_v60 = vmul.f32 %v1095_v0, %v3629_v16  ;;  %v1096_v29 = vadd.f32 -1.4531521, %v1032_v43  ;;  %v4209_v63 = vadd.f32 1.0, %v672_v9  ;;  %v4211_v31 = vadd.f32 1.0, %v673_v18  ;;  %v5281_v55 = vld [vmem:[#allocation69_spill] sm:$0xff] }
 0x1b9   :  { %v1097_v46 = vadd.f32 -1.4531521, %v1033_v19  ;;  %v4207_v3 = vpop.eup %2849  ;;  %v1222_v39 = vadd.f32 1.4214138, %v1158_v14  ;;  %v4214_v23 = vadd.f32 %v420_v59, %v3122_v6  ;;  %v4221_v50 = vmul.f32 0.70710677, %v4199_v24 }
 0x1ba   :  { %v4216_v28 = vpop.eup %2851  ;;  %v1223_v37 = vadd.f32 1.4214138, %v1159_v60  ;;  %v1160_v4 = vmul.f32 %v1096_v29, %v3699_v33  ;;  %v863_v15 = vmul.f32 %v2848_v40, %v735_v22  ;;  %2853 = vpow2.f32 %v1806_v11 }
 0x1bb   :  { %5274 = vst [vmem:[#allocation76_spill] sm:$0xff] %v4216_v28  ;;  %v1161_v20 = vmul.f32 %v1097_v46, %v3704_v41  ;;  %v1696_v25 = vmul.f32 %v1632_v52, %v608_v58  ;;  %v1286_v9 = vmul.f32 %v1222_v39, %v3593_v27  ;;  %v926_v18 = vsub.f32 2.0, %v862_v26  ;;  %v5313_v28 = vld [vmem:[#allocation51_spill] sm:$0xff] }
 0x1bc   :  { %5275 = vst [vmem:[#allocation79_spill] sm:$0xff] %v4221_v50  ;;  %v1287_v38 = vmul.f32 %v1223_v37, %v3629_v16  ;;  %v1224_v0 = vadd.f32 1.4214138, %v1160_v4  ;;  %2855 = vrcp.f32 %v4209_v63  ;;  %v4227_v59 = vand.u32 2147483647, %v4221_v50  ;;  %v5284_v50 = vld [vmem:[#allocation75_spill] sm:$0xff] }
 0x1bd   :  { %v1225_v43 = vadd.f32 1.4214138, %v1161_v20  ;;  %v1350_v19 = vadd.f32 -0.28449672, %v1286_v9  ;;  %v4230_v14 = vmul.f32 0.70710677, %v4214_v23  ;;  %2857 = vrcp.f32 %v4211_v31 }
 0x1be   :  { %v1351_v22 = vadd.f32 -0.28449672, %v1287_v38  ;;  %v1288_v58 = vmul.f32 %v1224_v0, %v3699_v33  ;;  %v927_v52 = vsub.f32 2.0, %v863_v15  ;;  %v1808_v26 = vmul.f32 1.442695, %v1696_v25  ;;  %v5280_v0 = vld [vmem:[#allocation55_spill] sm:$0xff] }
 0x1bf   :  { %5276 = vst [vmem:[#allocation50_spill] sm:$0xff] %v4230_v14  ;;  %v1289_v11 = vmul.f32 %v1225_v43, %v3704_v41  ;;  %v4236_v60 = vmul.f32 0.5, %v4164_v61  ;;  %v1414_v29 = vmul.f32 %v1350_v19, %v3593_v27  ;;  %v1633_v46 = vsub.f32 0.0, %v4182_v47  ;;  %v5279_v61 = vld [vmem:[#allocation61_spill] sm:$0xff] }
 0x1c0   :  { %v1415_v39 = vmul.f32 %v1351_v22, %v3629_v16  ;;  %v1352_v37 = vadd.f32 -0.28449672, %v1288_v58  ;;  %v4241_v20 = vpop.eup %2853  ;;  %v4244_v9 = vmul.f32 %v4173_v17, %v926_v18  ;;  %v674_v15 = vmul.f32 0.3275911, %v4227_v59  ;;  %v228_v58 = vpop.f32.mrf.mxu0 }
 0x1c1   :  { %5277 = vst [vmem:[#allocation54_spill] sm:$0xff] %v4236_v60  ;;  %v1353_v4 = vadd.f32 -0.28449672, %v1289_v11  ;;  %v1478_v38 = vadd.f32 0.2548296, %v1414_v29  ;;  %vm1990_vm6 = vcmp.ge.f32.partialorder %v5279_v61, 0.0  ;;  %v4255_v17 = vmul.f32 %v2848_v40, %v927_v52 }
 0x1c2   :  { %5278 = vst [vmem:[#allocation99_spill] sm:$0xff] %v4241_v20  ;;  %v611_v25 = vand.u32 2147483647, %v4230_v14  ;;  %v454_v43 = vmul.f32 0.5, %v5280_v0  ;;  %v1479_v19 = vadd.f32 0.2548296, %v1415_v39  ;;  %v1416_v60 = vmul.f32 %v1352_v37, %v3699_v33  ;;  %v4252_v11 = vpop.eup %2855 }
 0x1c3   :  { %v1417_v22 = vmul.f32 %v1353_v4, %v3704_v41  ;;  %vm1991_vm7 = vcmp.ge.f32.partialorder %v5281_v55, 0.0  ;;  %2859 = vpow2.f32 %v1808_v26  ;;  %v1542_v18 = vmul.f32 %v1478_v38, %v3593_v27  ;;  %v5282_v29 = vld [vmem:[#allocation63_spill] sm:$0xff]  ;;  %v4259_v44 = vpop.eup %2857  ;;  %v5283_v14 = vld [vmem:[#allocation72_spill] sm:$0xff] }
 0x1c4   :  { %v455_v30 = vmul.f32 0.5, %v5282_v29  ;;  %v1697_v39 = vmul.f32 %v1633_v46, %v4182_v47  ;;  %v1543_v37 = vmul.f32 %v1479_v19, %v3629_v16  ;;  %v1480_v0 = vadd.f32 0.2548296, %v1416_v60  ;;  %v5285_v29 = vld [vmem:[#allocation70_spill] sm:$0xff] }
 0x1c5   :  { %v1481_v4 = vadd.f32 0.2548296, %v1417_v22  ;;  %vm1992_vm8 = vcmp.ge.f32.partialorder %v5283_v14, 0.0  ;;  %vm1993_vm9 = vcmp.ge.f32.partialorder %v5284_v50, 0.0  ;;  %v1862_v40 = vmul.f32 %v3598_v42, %v1542_v18 }
 0x1c6   :  { %v4266_v52 = vadd.f32 1.0, %v674_v15  ;;  %v675_v26 = vmul.f32 0.3275911, %v611_v25  ;;  %v4269_v27 = vadd.f32 %v228_v58, %v3104_v57  ;;  %v1863_v38 = vmul.f32 %v3607_v35, %v1543_v37 }
 0x1c7   :  { %v456_v47 = vmul.f32 0.5, %v5285_v29  ;;  %v1544_v16 = vmul.f32 %v1480_v0, %v3699_v33  ;;  %v1545_v60 = vmul.f32 %v1481_v4, %v3704_v41  ;;  %v864_v46 = vmul.f32 %v4252_v11, %v4209_v63 }
 0x1c8   :  { %v865_v42 = vmul.f32 %v4259_v44, %v4211_v31  ;;  %v1926_v15 = vsub.f32 1.0, %v1862_v40  ;;  %v1634_v19 = vsub.f32 0.0, %v4227_v59  ;;  %v1810_v22 = vmul.f32 1.442695, %v1697_v39  ;;  %v293_v39 = vpop.f32.mrf.mxu1 }
 0x1c9   :  { %v1927_v58 = vsub.f32 1.0, %v1863_v38  ;;  %v1864_v18 = vmul.f32 %v3627_v53, %v1544_v16  ;;  %v1865_v35 = vmul.f32 %v3632_v45, %v1545_v60  ;;  %v4282_v37 = vpop.eup %2859  ;;  %2861 = vrcp.f32 %v4266_v52 }
 0x1ca   :  { %5286 = vst [vmem:[#allocation61_spill] sm:$0xff] %v4282_v37  ;;  %v2054_v33 = vsub.f32 0.0, %v1926_v15  ;;  %v4285_v41 = vadd.f32 1.0, %v675_v26  ;;  %v4288_v63 = vmul.f32 0.70710677, %v4269_v27  ;;  %v1635_v40 = vsub.f32 0.0, %v611_v25 }
 0x1cb   :  { %v2055_v31 = vsub.f32 0.0, %v1927_v58  ;;  %v1928_v0 = vsub.f32 1.0, %v1864_v18  ;;  %v1929_v4 = vsub.f32 1.0, %v1865_v35  ;;  %v928_v38 = vsub.f32 2.0, %v864_v46 }
 0x1cc   :  { %5287 = vst [vmem:[#allocation55_spill] sm:$0xff] %v4288_v63  ;;  %v929_v29 = vsub.f32 2.0, %v865_v42  ;;  %v2118_v53 = vsel %vm1990_vm6, %v1926_v15, %v2054_v33  ;;  %v1698_v45 = vmul.f32 %v1634_v19, %v4227_v59  ;;  %2863 = vrcp.f32 %v4285_v41 }
 0x1cd   :  { %v2182_v16 = vadd.f32 1.0, %v2118_v53  ;;  %v2119_v26 = vsel %vm1991_vm7, %v1927_v58, %v2055_v31  ;;  %v2056_v60 = vsub.f32 0.0, %v1928_v0  ;;  %v2057_v37 = vsub.f32 0.0, %v1929_v4  ;;  %v5288_v58 = vld [vmem:[#allocation73_spill] sm:$0xff] }
 0x1ce   :  { %v2183_v13 = vadd.f32 1.0, %v2119_v26  ;;  %v612_v18 = vand.u32 2147483647, %v4288_v63  ;;  %v4298_v35 = vadd.f32 %v293_v39, %v3106_v62  ;;  %v1699_v42 = vmul.f32 %v1635_v40, %v611_v25 }
 0x1cf   :  { %v2246_v46 = vmul.f32 %v2182_v16, %v454_v43  ;;  %v2120_v61 = vsel %vm1992_vm8, %v1928_v0, %v2056_v60  ;;  %v2121_v59 = vsel %vm1993_vm9, %v1929_v4, %v2057_v37  ;;  %v2862_v55 = vpop.eup %2861  ;;  %v457_v33 = vmul.f32 0.5, %v5288_v58 }
 0x1d0   :  { %v2247_v15 = vmul.f32 %v2183_v13, %v455_v30  ;;  %v2184_v19 = vadd.f32 1.0, %v2120_v61  ;;  %v2185_v31 = vadd.f32 1.0, %v2121_v59  ;;  %2865 = vpow2.f32 %v1810_v22 }
 0x1d1   :  { %2517 = vmatmul.f32.gmra.mxu2 %v2246_v46  ;;  %v4306_v53 = vmul.f32 0.5, %v4199_v24  ;;  %v1812_v39 = vmul.f32 1.442695, %v1698_v45  ;;  %v4309_v43 = vmul.f32 0.5, %v4214_v23  ;;  %v676_v37 = vmul.f32 0.3275911, %v612_v18  ;;  %v358_v45 = vpop.f32.mrf.mxu2 }
 0x1d2   :  { %2582 = vmatmul.f32.gmra.mxu3 %v2247_v15  ;;  %v2248_v14 = vmul.f32 %v2184_v19, %v456_v47  ;;  %v2249_v50 = vmul.f32 %v2185_v31, %v457_v33  ;;  %v4312_v25 = vmul.f32 0.70710677, %v4298_v35  ;;  %v4315_v13 = vmul.f32 %v4252_v11, %v928_v38  ;;  %v2864_v0 = vpop.eup %2863  ;;  %v5292_v38 = vld [vmem:[#allocation45_spill] sm:$0xff]  ;;  %v423_v19 = vpop.f32.mrf.mxu3 }
 0x1d3   :  { %5289 = vst [vmem:[#allocation69_spill] sm:$0xff] %v4306_v53  ;;  %v4318_v30 = vmul.f32 %v4259_v44, %v929_v29  ;;  %v1814_v22 = vmul.f32 1.442695, %v1699_v42  ;;  %v1034_v24 = vmul.f32 1.0614054, %v3710_v54  ;;  %v866_v23 = vmul.f32 %v2862_v55, %v4266_v52  ;;  %v5295_v42 = vld [vmem:[#allocation92_spill] sm:$0xff] }
 0x1d4   :  { %5290 = vst [vmem:[#allocation63_spill] sm:$0xff] %v4309_v43  ;;  %2390 = vmatmul.f32.gmra.mxu0 %v2248_v14  ;;  %2455 = vmatmul.f32.gmra.mxu1 %v2249_v50  ;;  %v1636_v47 = vsub.f32 0.0, %v612_v18  ;;  %v4323_v4 = vand.u32 2147483647, %v4312_v25  ;;  %v1035_v40 = vmul.f32 1.0614054, %v3736_v7  ;;  %2867 = vpow2.f32 %v1812_v39 }
 0x1d5   :  { %5291 = vst [vmem:[#allocation72_spill] sm:$0xff] %v4312_v25  ;;  %v1098_v11 = vadd.f32 -1.4531521, %v1034_v24  ;;  %v1036_v44 = vmul.f32 1.0614054, %v5292_v38  ;;  %v4328_v29 = vadd.f32 %v358_v45, %v3114_v2  ;;  %v4331_v16 = vmul.f32 0.5, %v4269_v27 }
 0x1d6   :  { %v4333_v26 = vadd.f32 1.0, %v676_v37  ;;  %v677_v52 = vmul.f32 0.3275911, %v4323_v4  ;;  %v1099_v60 = vadd.f32 -1.4531521, %v1035_v40  ;;  %v4336_v46 = vpop.eup %2865  ;;  %2869 = vpow2.f32 %v1814_v22 }
 0x1d7   :  { %5293 = vst [vmem:[#allocation75_spill] sm:$0xff] %v4331_v16  ;;  %v1162_v61 = vmul.f32 %v1098_v11, %v3710_v54  ;;  %v1100_v59 = vadd.f32 -1.4531521, %v1036_v44  ;;  %v1037_v15 = vmul.f32 1.0614054, %v5295_v42  ;;  %v930_v58 = vsub.f32 2.0, %v866_v23 }
 0x1d8   :  { %5294 = vst [vmem:[#allocation70_spill] sm:$0xff] %v4336_v46  ;;  %v867_v33 = vmul.f32 %v2864_v0, %v4285_v41  ;;  %v1700_v31 = vmul.f32 %v1636_v47, %v612_v18  ;;  %v1163_v27 = vmul.f32 %v1099_v60, %v3736_v7  ;;  %v4344_v37 = vmul.f32 0.70710677, %v4328_v29  ;;  %v5303_v16 = vld [vmem:[#allocation80_spill] sm:$0xff]  ;;  %v5311_v46 = vld [vmem:[#allocation86_spill] sm:$0xff] }
 0x1d9   :  { %v1226_v39 = vadd.f32 1.4214138, %v1162_v61  ;;  %v1164_v14 = vmul.f32 %v1100_v59, %v5292_v38  ;;  %v1101_v50 = vadd.f32 -1.4531521, %v1037_v15  ;;  %2871 = vrcp.f32 %v4333_v26 }
 0x1da   :  { %5296 = vst [vmem:[#allocation73_spill] sm:$0xff] %v4344_v37  ;;  %v741_v22 = vadd.f32 1.0, %v677_v52  ;;  %v1227_v24 = vadd.f32 1.4214138, %v1163_v27  ;;  %v4348_v40 = vadd.f32 %v423_v19, %v3122_v6  ;;  %v4350_v23 = vpop.eup %2867  ;;  %v614_v45 = vand.u32 2147483647, %v4344_v37 }
 0x1db   :  { %5297 = vst [vmem:[#allocation45_spill] sm:$0xff] %v4350_v23  ;;  %v1290_v41 = vmul.f32 %v1226_v39, %v3710_v54  ;;  %v1228_v18 = vadd.f32 1.4214138, %v1164_v14  ;;  %v1165_v47 = vmul.f32 %v1101_v50, %v5295_v42  ;;  %v4355_v11 = vmul.f32 %v2862_v55, %v930_v58  ;;  %v5301_v55 = vld [vmem:[#allocation78_spill] sm:$0xff] }
 0x1dc   :  { %v931_v44 = vsub.f32 2.0, %v867_v33  ;;  %v1816_v60 = vmul.f32 1.442695, %v1700_v31  ;;  %v1291_v61 = vmul.f32 %v1227_v24, %v3736_v7  ;;  %v4358_v52 = vpop.eup %2869  ;;  %v4361_v59 = vmul.f32 0.5, %v4298_v35 }
 0x1dd   :  { %5298 = vst [vmem:[#allocation92_spill] sm:$0xff] %v4358_v52  ;;  %v1354_v15 = vadd.f32 -0.28449672, %v1290_v41  ;;  %v1292_v19 = vmul.f32 %v1228_v18, %v5292_v38  ;;  %v1229_v27 = vadd.f32 1.4214138, %v1165_v47  ;;  %2873 = vrcp.f32 %v741_v22 }
 0x1de   :  { %5299 = vst [vmem:[#allocation100_spill] sm:$0xff] %v4361_v59  ;;  %v1355_v39 = vadd.f32 -0.28449672, %v1291_v61  ;;  %v678_v14 = vmul.f32 0.3275911, %v614_v45  ;;  %v4368_v58 = vmul.f32 0.5, %v5301_v55  ;;  %v4374_v41 = vmul.f32 %v2864_v0, %v931_v44 }
 0x1df   :  { %v4365_v50 = vmul.f32 0.70710677, %v4348_v40  ;;  %v1418_v33 = vmul.f32 %v1354_v15, %v3710_v54  ;;  %v1356_v31 = vadd.f32 -0.28449672, %v1292_v19  ;;  %v1293_v24 = vmul.f32 %v1229_v27, %v5295_v42  ;;  %v4372_v35 = vpop.eup %2871  ;;  %v5304_v15 = vld [vmem:[#allocation81_spill] sm:$0xff]  ;;  %v5305_v0 = vld [vmem:[#allocation83_spill] sm:$0xff] }
 0x1e0   :  { %5302 = vst [vmem:[#allocation78_spill] sm:$0xff] %v4374_v41  ;;  %2875 = vpow2.f32 %v1816_v60  ;;  %v1419_v18 = vmul.f32 %v1355_v39, %v3736_v7  ;;  %v1637_v61 = vsub.f32 0.0, %v4323_v4  ;;  %vm1994_vm10 = vcmp.ge.f32.partialorder %v5303_v16, 0.0  ;;  %v5306_v60 = vld [vmem:[#allocation82_spill] sm:$0xff] }
 0x1e1   :  { %5300 = vst [vmem:[#allocation101_spill] sm:$0xff] %v4365_v50  ;;  %v615_v47 = vand.u32 2147483647, %v4365_v50  ;;  %v1482_v37 = vadd.f32 0.2548296, %v1418_v33  ;;  %v1420_v55 = vmul.f32 %v1356_v31, %v5292_v38  ;;  %v459_v19 = vmul.f32 0.5, %v5304_v15  ;;  %v231_v33 = vpop.f32.mrf.mxu0 }
 0x1e2   :  { %v1357_v59 = vadd.f32 -0.28449672, %v1293_v24  ;;  %v1483_v27 = vadd.f32 0.2548296, %v1419_v18  ;;  %v742_v43 = vadd.f32 1.0, %v678_v14  ;;  %v1638_v53 = vsub.f32 0.0, %v614_v45 }
 0x1e3   :  { %vm1995_vm11 = vcmp.ge.f32.partialorder %v5305_v0, 0.0  ;;  %v1546_v44 = vmul.f32 %v1482_v37, %v3710_v54  ;;  %v460_v39 = vmul.f32 0.5, %v5306_v60  ;;  %v1484_v50 = vadd.f32 0.2548296, %v1420_v55  ;;  %v2874_v25 = vpop.eup %2873  ;;  %v5307_v31 = vld [vmem:[#allocation84_spill] sm:$0xff]  ;;  %v5308_v14 = vld [vmem:[#allocation85_spill] sm:$0xff] }
 0x1e4   :  { %v1421_v52 = vmul.f32 %v1357_v59, %v5295_v42  ;;  %vm1996_vm12 = vcmp.ge.f32.partialorder %v5307_v31, 0.0  ;;  %v868_v24 = vmul.f32 %v4372_v35, %v4333_v26  ;;  %v1547_v18 = vmul.f32 %v1483_v27, %v3736_v7  ;;  %v5309_v37 = vld [vmem:[#allocation91_spill] sm:$0xff] }
 0x1e5   :  { %v4391_v15 = vmul.f32 0.5, %v5308_v14  ;;  %v679_v23 = vmul.f32 0.3275911, %v615_v47  ;;  %v1701_v54 = vmul.f32 %v1637_v61, %v4323_v4  ;;  %v1866_v60 = vmul.f32 %v5309_v37, %v1546_v44 }
 0x1e6   :  { %v1548_v55 = vmul.f32 %v1484_v50, %v5292_v38  ;;  %v1485_v59 = vadd.f32 0.2548296, %v1421_v52  ;;  %v4396_v63 = vpop.eup %2875  ;;  %vm1997_vm13 = vcmp.ge.f32.partialorder %v5311_v46, 0.0  ;;  %v1867_v20 = vmul.f32 %v5312_v34, %v1547_v18  ;;  %v5315_v18 = vld [vmem:[#allocation93_spill] sm:$0xff] }
 0x1e7   :  { %5310 = vst [vmem:[#allocation80_spill] sm:$0xff] %v4396_v63  ;;  %2877 = vrcp.f32 %v742_v43  ;;  %v1702_v26 = vmul.f32 %v1638_v53, %v614_v45  ;;  %v4401_v7 = vadd.f32 %v231_v33, %v3104_v57  ;;  %v869_v27 = vmul.f32 %v2874_v25, %v741_v22 }
 0x1e8   :  { %v1930_v14 = vsub.f32 1.0, %v1866_v60  ;;  %v1868_v4 = vmul.f32 %v5313_v28, %v1548_v55  ;;  %v1549_v61 = vmul.f32 %v1485_v59, %v5295_v42  ;;  %v1931_v44 = vsub.f32 1.0, %v1867_v20  ;;  %v296_v60 = vpop.f32.mrf.mxu1 }
 0x1e9   :  { %v743_v38 = vadd.f32 1.0, %v679_v23  ;;  %v1639_v52 = vsub.f32 0.0, %v615_v47  ;;  %v4406_v50 = vmul.f32 0.70710677, %v4401_v7  ;;  %v1818_v37 = vmul.f32 1.442695, %v1701_v54 }
 0x1ea   :  { %v2058_v63 = vsub.f32 0.0, %v1930_v14  ;;  %v1932_v34 = vsub.f32 1.0, %v1868_v4  ;;  %v1869_v53 = vmul.f32 %v5315_v18, %v1549_v61  ;;  %v932_v45 = vsub.f32 2.0, %v868_v24 }
 0x1eb   :  { %5314 = vst [vmem:[#allocation81_spill] sm:$0xff] %v4406_v50  ;;  %v2059_v33 = vsub.f32 0.0, %v1931_v44  ;;  %v1820_v41 = vmul.f32 1.442695, %v1702_v26  ;;  %v616_v22 = vand.u32 2147483647, %v4406_v50  ;;  %2879 = vrcp.f32 %v743_v38 }
 0x1ec   :  { %v933_v28 = vsub.f32 2.0, %v869_v27  ;;  %v2122_v20 = vsel %vm1994_vm10, %v1930_v14, %v2058_v63  ;;  %v2060_v42 = vsub.f32 0.0, %v1932_v34  ;;  %v1933_v23 = vsub.f32 1.0, %v1869_v53 }
 0x1ed   :  { %v2878_v55 = vpop.eup %2877  ;;  %v2186_v59 = vadd.f32 1.0, %v2122_v20  ;;  %v2123_v54 = vsel %vm1995_vm11, %v1931_v44, %v2059_v33  ;;  %v1703_v4 = vmul.f32 %v1639_v52, %v615_v47  ;;  %v297_v18 = vadd.f32 %v296_v60, %v3106_v62 }
 0x1ee   :  { %v2187_v61 = vadd.f32 1.0, %v2123_v54  ;;  %v2124_v24 = vsel %vm1996_vm12, %v1932_v34, %v2060_v42  ;;  %v2061_v26 = vsub.f32 0.0, %v1933_v23  ;;  %v4419_v63 = vmul.f32 0.5, %v4328_v29 }
 0x1ef   :  { %v2250_v27 = vmul.f32 %v2186_v59, %v4368_v58  ;;  %v2188_v16 = vadd.f32 1.0, %v2124_v24  ;;  %v680_v14 = vmul.f32 0.3275911, %v616_v22  ;;  %v4422_v53 = vmul.f32 %v4372_v35, %v932_v45  ;;  %v361_v35 = vpop.f32.mrf.mxu2  ;;  %v5322_v59 = vld [vmem:[#allocation58_spill] sm:$0xff] }
 0x1f0   :  { %5316 = vst [vmem:[#allocation83_spill] sm:$0xff] %v4419_v63  ;;  %v2251_v0 = vmul.f32 %v2187_v61, %v459_v19  ;;  %v2125_v47 = vsel %vm1997_vm13, %v1933_v23, %v2061_v26  ;;  %v870_v44 = vmul.f32 %v2878_v55, %v742_v43  ;;  %2881 = vpow2.f32 %v1818_v37  ;;  %v5319_v37 = vld [vmem:[#allocation20_spill] sm:$0xff] }
 0x1f1   :  { %2520 = vmatmul.f32.gmra.mxu2 %v2250_v27  ;;  %v2252_v31 = vmul.f32 %v2188_v16, %v460_v39  ;;  %v2189_v52 = vadd.f32 1.0, %v2125_v47  ;;  %v4427_v34 = vmul.f32 0.5, %v4348_v40  ;;  %v4429_v58 = vmul.f32 %v2874_v25, %v933_v28  ;;  %v2880_v19 = vpop.eup %2879  ;;  %v5320_v39 = vld [vmem:[#allocation41_spill] sm:$0xff] }
 0x1f2   :  { %2585 = vmatmul.f32.gmra.mxu3 %v2251_v0  ;;  %2883 = vpow2.f32 %v1820_v41  ;;  %v1822_v29 = vmul.f32 1.442695, %v1703_v4  ;;  %v4431_v33 = vmul.f32 0.70710677, %v297_v18  ;;  %v744_v43 = vadd.f32 1.0, %v680_v14  ;;  %v5321_v28 = vld [vmem:[#allocation17_spill] sm:$0xff]  ;;  %v426_v0 = vpop.f32.mrf.mxu3 }
 0x1f3   :  { %5317 = vst [vmem:[#allocation82_spill] sm:$0xff] %v4427_v34  ;;  %2393 = vmatmul.f32.gmra.mxu0 %v2252_v31  ;;  %v2253_v46 = vmul.f32 %v2189_v52, %v4391_v15  ;;  %v1038_v45 = vmul.f32 1.0614054, %v5319_v37  ;;  %v1039_v60 = vmul.f32 1.0614054, %v5320_v39  ;;  %v934_v20 = vsub.f32 2.0, %v870_v44 }
 0x1f4   :  { %5318 = vst [vmem:[#allocation84_spill] sm:$0xff] %v4431_v33  ;;  %v1640_v40 = vsub.f32 0.0, %v616_v22  ;;  %v617_v25 = vand.u32 2147483647, %v4431_v33  ;;  %v1040_v42 = vmul.f32 1.0614054, %v5321_v28  ;;  %v4440_v4 = vadd.f32 %v361_v35, %v3114_v2 }
 0x1f5   :  { %2458 = vmatmul.f32.gmra.mxu1 %v2253_v46  ;;  %v1102_v41 = vadd.f32 -1.4531521, %v1038_v45  ;;  %v1103_v23 = vadd.f32 -1.4531521, %v1039_v60  ;;  %v1041_v54 = vmul.f32 1.0614054, %v5322_v59  ;;  %v871_v15 = vmul.f32 %v2880_v19, %v743_v38 }
 0x1f6   :  { %2885 = vpow2.f32 %v1822_v29  ;;  %v4443_v61 = vmul.f32 0.5, %v4401_v7  ;;  %v1104_v24 = vadd.f32 -1.4531521, %v1040_v42  ;;  %v4445_v26 = vpop.eup %2881  ;;  %v4451_v44 = vmul.f32 %v2878_v55, %v934_v20  ;;  %v5336_v33 = vld [vmem:[#allocation42_spill] sm:$0xff] }
 0x1f7   :  { %5324 = vst [vmem:[#allocation91_spill] sm:$0xff] %v4445_v26  ;;  %2887 = vrcp.f32 %v744_v43  ;;  %v1166_v27 = vmul.f32 %v1102_v41, %v5319_v37  ;;  %v1167_v16 = vmul.f32 %v1103_v23, %v5320_v39  ;;  %v1105_v14 = vadd.f32 -1.4531521, %v1041_v54  ;;  %v5339_v26 = vld [vmem:[#allocation37_spill] sm:$0xff] }
 0x1f8   :  { %5323 = vst [vmem:[#allocation85_spill] sm:$0xff] %v4443_v61  ;;  %v4449_v47 = vpop.eup %2883  ;;  %v1704_v31 = vmul.f32 %v1640_v40, %v616_v22  ;;  %v681_v38 = vmul.f32 0.3275911, %v617_v25  ;;  %v1168_v52 = vmul.f32 %v1104_v24, %v5321_v28  ;;  %v4456_v46 = vmul.f32 0.70710677, %v4440_v4 }
 0x1f9   :  { %5325 = vst [vmem:[#allocation86_spill] sm:$0xff] %v4449_v47  ;;  %v1230_v7 = vadd.f32 1.4214138, %v1166_v27  ;;  %v1231_v29 = vadd.f32 1.4214138, %v1167_v16  ;;  %v1169_v35 = vmul.f32 %v1105_v14, %v5322_v59  ;;  %v935_v45 = vsub.f32 2.0, %v871_v15 }
 0x1fa   :  { %5326 = vst [vmem:[#allocation25_spill] sm:$0xff] %v4451_v44  ;;  %v4458_v60 = vmul.f32 0.5, %v297_v18  ;;  %v1232_v42 = vadd.f32 1.4214138, %v1168_v52  ;;  %v4461_v41 = vadd.f32 %v426_v0, %v3122_v6  ;;  %v618_v40 = vand.u32 2147483647, %v4456_v46 }
 0x1fb   :  { %5327 = vst [vmem:[#allocation51_spill] sm:$0xff] %v4456_v46  ;;  %v1294_v55 = vmul.f32 %v1230_v7, %v5319_v37  ;;  %v1295_v22 = vmul.f32 %v1231_v29, %v5320_v39  ;;  %v1233_v20 = vadd.f32 1.4214138, %v1169_v35  ;;  %v1824_v54 = vmul.f32 1.442695, %v1704_v31  ;;  %v5330_v27 = vld [vmem:[#allocation87_spill] sm:$0xff] }
 0x1fc   :  { %5328 = vst [vmem:[#allocation93_spill] sm:$0xff] %v4458_v60  ;;  %v4466_v23 = vpop.eup %2885  ;;  %v745_v24 = vadd.f32 1.0, %v681_v38  ;;  %v4469_v16 = vmul.f32 0.5, %v5330_v27  ;;  %v1296_v18 = vmul.f32 %v1232_v42, %v5321_v28  ;;  %v1641_v14 = vsub.f32 0.0, %v617_v25  ;;  %v5332_v29 = vld [vmem:[#allocation89_spill] sm:$0xff]  ;;  %v5335_v46 = vld [vmem:[#allocation90_spill] sm:$0xff] }
 0x1fd   :  { %5329 = vst [vmem:[#allocation20_spill] sm:$0xff] %v4466_v23  ;;  %v2888_v15 = vpop.eup %2887  ;;  %v1358_v0 = vadd.f32 -0.28449672, %v1294_v55  ;;  %v1359_v52 = vadd.f32 -0.28449672, %v1295_v22  ;;  %v1297_v7 = vmul.f32 %v1233_v20, %v5322_v59  ;;  %v4473_v60 = vmul.f32 %v2880_v19, %v935_v45  ;;  %v5338_v23 = vld [vmem:[#allocation96_spill] sm:$0xff] }
 0x1fe   :  { %v4476_v35 = vmul.f32 0.5, %v5332_v29  ;;  %v1360_v61 = vadd.f32 -0.28449672, %v1296_v18  ;;  %v4479_v31 = vmul.f32 0.70710677, %v4461_v41  ;;  %v872_v63 = vmul.f32 %v2888_v15, %v744_v43  ;;  %v5334_v29 = vld [vmem:[#allocation88_spill] sm:$0xff] }
 0x1ff   :  { %5331 = vst [vmem:[#allocation41_spill] sm:$0xff] %v4473_v60  ;;  %v1422_v38 = vmul.f32 %v1358_v0, %v5319_v37  ;;  %v1423_v27 = vmul.f32 %v1359_v52, %v5320_v39  ;;  %v1361_v42 = vadd.f32 -0.28449672, %v1297_v7  ;;  %v682_v34 = vmul.f32 0.3275911, %v618_v40 }
 0x200   :  { %5333 = vst [vmem:[#allocation17_spill] sm:$0xff] %v4479_v31  ;;  %2889 = vrcp.f32 %v745_v24  ;;  %v1424_v55 = vmul.f32 %v1360_v61, %v5321_v28  ;;  %v619_v19 = vand.u32 2147483647, %v4479_v31  ;;  %v1705_v45 = vmul.f32 %v1641_v14, %v617_v25  ;;  %v234_v14 = vpop.f32.mrf.mxu0 }
 0x201   :  { %v1486_v22 = vadd.f32 0.2548296, %v1422_v38  ;;  %v1487_v20 = vadd.f32 0.2548296, %v1423_v27  ;;  %v1425_v18 = vmul.f32 %v1361_v42, %v5322_v59  ;;  %vm1998_vm14 = vcmp.ge.f32.partialorder %v5334_v29, 0.0  ;;  %v5337_v38 = vld [vmem:[#allocation44_spill] sm:$0xff] }
 0x202   :  { %vm1999_vm15 = vcmp.ge.f32.partialorder %v5335_v46, 0.0  ;;  %2891 = vpow2.f32 %v1824_v54  ;;  %v1488_v0 = vadd.f32 0.2548296, %v1424_v55  ;;  %v1642_v52 = vsub.f32 0.0, %v618_v40 }
 0x203   :  { %v683_v7 = vmul.f32 0.3275911, %v619_v19  ;;  %vm2000_vm0 = vcmp.ge.f32.partialorder %v5336_v33, 0.0  ;;  %v1550_v43 = vmul.f32 %v1486_v22, %v5319_v37  ;;  %v1551_v61 = vmul.f32 %v1487_v20, %v5320_v39  ;;  %v5340_v22 = vld [vmem:[#allocation22_spill] sm:$0xff] }
 0x204   :  { %v1489_v31 = vadd.f32 0.2548296, %v1425_v18  ;;  %v746_v25 = vadd.f32 1.0, %v682_v34  ;;  %vm2001_vm1 = vcmp.ge.f32.partialorder %v5337_v38, 0.0  ;;  %v936_v27 = vsub.f32 2.0, %v872_v63 }
 0x205   :  { %v1552_v42 = vmul.f32 %v1488_v0, %v5321_v28  ;;  %v4494_v50 = vmul.f32 0.5, %v4440_v4  ;;  %v747_v54 = vadd.f32 1.0, %v683_v7  ;;  %v1826_v55 = vmul.f32 1.442695, %v1705_v45  ;;  %v5341_v0 = vld [vmem:[#allocation21_spill] sm:$0xff] }
 0x206   :  { %v1870_v47 = vmul.f32 %v5338_v23, %v1550_v43  ;;  %v1871_v60 = vmul.f32 %v5339_v26, %v1551_v61  ;;  %v1553_v37 = vmul.f32 %v1489_v31, %v5322_v59  ;;  %v2890_v39 = vpop.eup %2889  ;;  %v1706_v20 = vmul.f32 %v1642_v52, %v618_v40  ;;  %v299_v59 = vpop.f32.mrf.mxu1 }
 0x207   :  { %v1872_v34 = vmul.f32 %v5340_v22, %v1552_v42  ;;  %v1643_v18 = vsub.f32 0.0, %v619_v19  ;;  %v235_v63 = vadd.f32 %v234_v14, %v3104_v57  ;;  %2893 = vrcp.f32 %v746_v25 }
 0x208   :  { %v1934_v44 = vsub.f32 1.0, %v1870_v47  ;;  %v1935_v28 = vsub.f32 1.0, %v1871_v60  ;;  %v1873_v4 = vmul.f32 %v5341_v0, %v1553_v37  ;;  %v4502_v7 = vpop.eup %2891  ;;  %v4504_v45 = vmul.f32 %v2888_v15, %v936_v27 }
 0x209   :  { %v1936_v23 = vsub.f32 1.0, %v1872_v34  ;;  %2895 = vrcp.f32 %v747_v54  ;;  %v4506_v26 = vmul.f32 0.70710677, %v235_v63  ;;  %v873_v31 = vmul.f32 %v2890_v39, %v745_v24 }
 0x20a   :  { %v2062_v43 = vsub.f32 0.0, %v1934_v44  ;;  %v2063_v40 = vsub.f32 0.0, %v1935_v28  ;;  %v1937_v52 = vsub.f32 1.0, %v1873_v4  ;;  %v1828_v57 = vmul.f32 1.442695, %v1706_v20  ;;  %v5342_v4 = vld [vmem:[#allocation94_spill] sm:$0xff] }
 0x20b   :  { %v2064_v61 = vsub.f32 0.0, %v1936_v23  ;;  %v1707_v47 = vmul.f32 %v1643_v18, %v619_v19  ;;  %v620_v60 = vand.u32 2147483647, %v4506_v26  ;;  %v4514_v42 = vadd.f32 %v299_v59, %v3106_v62 }
 0x20c   :  { %v2126_v14 = vsel %vm1998_vm14, %v1934_v44, %v2062_v43  ;;  %v2127_v15 = vsel %vm1999_vm15, %v1935_v28, %v2063_v40  ;;  %v2065_v27 = vsub.f32 0.0, %v1937_v52  ;;  %v937_v19 = vsub.f32 2.0, %v873_v31 }
 0x20d   :  { %v2190_v37 = vadd.f32 1.0, %v2126_v14  ;;  %v2191_v24 = vadd.f32 1.0, %v2127_v15  ;;  %v2128_v22 = vsel %vm2000_vm0, %v1936_v23, %v2064_v61  ;;  %v684_v34 = vmul.f32 0.3275911, %v620_v60  ;;  %v4518_v20 = vpop.eup %2893 }
 0x20e   :  { %2897 = vpow2.f32 %v1826_v55  ;;  %v2192_v18 = vadd.f32 1.0, %v2128_v22  ;;  %v2129_v44 = vsel %vm2001_vm1, %v1937_v52, %v2065_v27  ;;  %v4528_v23 = vmul.f32 0.5, %v4461_v41  ;;  %v5344_v55 = vld [vmem:[#allocation95_spill] sm:$0xff] }
 0x20f   :  { %v4522_v46 = vpop.eup %2895  ;;  %v2254_v29 = vmul.f32 %v2190_v37, %v4469_v16  ;;  %v2255_v62 = vmul.f32 %v2191_v24, %v4476_v35  ;;  %v2193_v28 = vadd.f32 1.0, %v2129_v44  ;;  %v748_v0 = vadd.f32 1.0, %v684_v34  ;;  %v5345_v16 = vld [vmem:[#allocation27_spill] sm:$0xff] }
 0x210   :  { %v2256_v33 = vmul.f32 %v2192_v18, %v5342_v4  ;;  %2899 = vpow2.f32 %v1828_v57  ;;  %5343 = vst [vmem:[#allocation58_spill] sm:$0xff] %v4528_v23  ;;  %v1830_v59 = vmul.f32 1.442695, %v1707_v47  ;;  %v874_v31 = vmul.f32 %v4518_v20, %v746_v25  ;;  %v5346_v52 = vld [vmem:[#allocation31_spill] sm:$0xff]  ;;  %v364_v57 = vpop.f32.mrf.mxu2 }
 0x211   :  { %2523 = vmatmul.f32.gmra.mxu2 %v2254_v29  ;;  %2588 = vmatmul.f32.gmra.mxu3 %v2255_v62  ;;  %v2257_v38 = vmul.f32 %v2193_v28, %v5344_v55  ;;  %v4533_v43 = vmul.f32 0.70710677, %v4514_v42  ;;  %v1042_v35 = vmul.f32 1.0614054, %v5345_v16  ;;  %v4537_v40 = vmul.f32 %v4522_v46, %v747_v54 }
 0x212   :  { %2396 = vmatmul.f32.gmra.mxu0 %v2256_v33  ;;  %2901 = vrcp.f32 %v748_v0  ;;  %v1043_v41 = vmul.f32 1.0614054, %v5346_v52  ;;  %v1044_v61 = vmul.f32 1.0614054, %v3944_v32  ;;  %v4541_v47 = vmul.f32 %v2890_v39, %v937_v19 }
 0x213   :  { %2461 = vmatmul.f32.gmra.mxu1 %v2257_v38  ;;  %v1644_v14 = vsub.f32 0.0, %v620_v60  ;;  %v621_v25 = vand.u32 2147483647, %v4533_v43  ;;  %v1106_v15 = vadd.f32 -1.4531521, %v1042_v35  ;;  %v4546_v37 = vmul.f32 0.5, %v235_v63  ;;  %v429_v38 = vpop.f32.mrf.mxu3 }
 0x214   :  { %v4544_v27 = vpop.eup %2897  ;;  %v1107_v24 = vadd.f32 -1.4531521, %v1043_v41  ;;  %v1108_v54 = vadd.f32 -1.4531521, %v1044_v61  ;;  %v4549_v22 = vadd.f32 %v364_v57, %v3114_v2  ;;  %v1045_v39 = vmul.f32 1.0614054, %v3954_v21 }
 0x215   :  { %5347 = vst [vmem:[#allocation87_spill] sm:$0xff] %v4546_v37  ;;  %v685_v34 = vmul.f32 0.3275911, %v621_v25  ;;  %v1645_v18 = vsub.f32 0.0, %v621_v25  ;;  %v1170_v44 = vmul.f32 %v1106_v15, %v5345_v16  ;;  %v938_v29 = vsub.f32 2.0, %v874_v31 }
 0x216   :  { %5348 = vst [vmem:[#allocation89_spill] sm:$0xff] %v4549_v22  ;;  %v4553_v19 = vpop.eup %2899  ;;  %v939_v62 = vsub.f32 2.0, %v4537_v40  ;;  %v1171_v28 = vmul.f32 %v1107_v24, %v5346_v52  ;;  %v1172_v63 = vmul.f32 %v1108_v54, %v3944_v32  ;;  %v1708_v4 = vmul.f32 %v1644_v14, %v620_v60 }
 0x217   :  { %v749_v33 = vadd.f32 1.0, %v685_v34  ;;  %v1234_v55 = vadd.f32 1.4214138, %v1170_v44  ;;  %v1109_v2 = vadd.f32 -1.4531521, %v1045_v39  ;;  %2903 = vpow2.f32 %v1830_v59 }
 0x218   :  { %v2902_v35 = vpop.eup %2901  ;;  %v1235_v41 = vadd.f32 1.4214138, %v1171_v28  ;;  %v1236_v61 = vadd.f32 1.4214138, %v1172_v63  ;;  %v4559_v57 = vmul.f32 0.70710677, %v4549_v22  ;;  %v1709_v31 = vmul.f32 %v1645_v18, %v621_v25 }
 0x219   :  { %2905 = vrcp.f32 %v749_v33  ;;  %v1298_v40 = vmul.f32 %v1234_v55, %v5345_v16  ;;  %v1173_v15 = vmul.f32 %v1109_v2, %v3954_v21  ;;  %v4569_v59 = vadd.f32 %v429_v38, %v3122_v6 }
 0x21a   :  { %5349 = vst [vmem:[#allocation88_spill] sm:$0xff] %v4559_v57  ;;  %v1299_v24 = vmul.f32 %v1235_v41, %v5346_v52  ;;  %v1300_v60 = vmul.f32 %v1236_v61, %v3944_v32  ;;  %v4566_v14 = vand.u32 2147483647, %v4559_v57  ;;  %v876_v54 = vmul.f32 %v2902_v35, %v748_v0 }
 0x21b   :  { %5350 = vst [vmem:[#allocation90_spill] sm:$0xff] %v4569_v59  ;;  %v1832_v34 = vmul.f32 1.442695, %v1708_v4  ;;  %v1362_v44 = vadd.f32 -0.28449672, %v1298_v40  ;;  %v4572_v25 = vmul.f32 %v4518_v20, %v938_v29  ;;  %v4576_v55 = vmul.f32 0.5, %v4514_v42 }
 0x21c   :  { %v1237_v39 = vadd.f32 1.4214138, %v1173_v15  ;;  %v1363_v18 = vadd.f32 -0.28449672, %v1299_v24  ;;  %v1364_v28 = vadd.f32 -0.28449672, %v1300_v60 }
 0x21d   :  { %v686_v63 = vmul.f32 0.3275911, %v4566_v14  ;;  %5351 = vst [vmem:[#allocation42_spill] sm:$0xff] %v4576_v55  ;;  %v1834_v2 = vmul.f32 1.442695, %v1709_v31  ;;  %v1426_v41 = vmul.f32 %v1362_v44, %v5345_v16  ;;  %v4580_v38 = vpop.eup %2903  ;;  %v940_v40 = vsub.f32 2.0, %v876_v54 }
 0x21e   :  { %v1301_v6 = vmul.f32 %v1237_v39, %v3954_v21  ;;  %v1427_v0 = vmul.f32 %v1363_v18, %v5346_v52  ;;  %v1428_v4 = vmul.f32 %v1364_v28, %v3944_v32  ;;  %v4585_v29 = vmul.f32 0.70710677, %v4569_v59  ;;  %v5353_v31 = vld [vmem:[#allocation18_spill] sm:$0xff]  ;;  %v5354_v39 = vld [vmem:[#allocation19_spill] sm:$0xff] }
 0x21f   :  { %v750_v20 = vadd.f32 1.0, %v686_v63  ;;  %v2906_v61 = vpop.eup %2905  ;;  %2907 = vpow2.f32 %v1832_v34  ;;  %v1490_v42 = vadd.f32 0.2548296, %v1426_v41  ;;  %vm2002_vm2 = vcmp.ge.f32.partialorder %v5353_v31, 0.0  ;;  %v5355_v18 = vld [vmem:[#allocation47_spill] sm:$0xff] }
 0x220   :  { %5352 = vst [vmem:[#allocation44_spill] sm:$0xff] %v4585_v29  ;;  %v1365_v15 = vadd.f32 -0.28449672, %v1301_v6  ;;  %v877_v24 = vmul.f32 %v2906_v61, %v749_v33  ;;  %v1491_v60 = vadd.f32 0.2548296, %v1427_v0  ;;  %vm2003_vm3 = vcmp.ge.f32.partialorder %v5354_v39, 0.0 }
 0x221   :  { %v1492_v44 = vadd.f32 0.2548296, %v1428_v4  ;;  %2909 = vrcp.f32 %v750_v20  ;;  %vm2004_vm4 = vcmp.ge.f32.partialorder %v5355_v18, 0.0  ;;  %v1554_v28 = vmul.f32 %v1490_v42, %v5345_v16  ;;  %v5356_v0 = vld [vmem:[#allocation66_spill] sm:$0xff]  ;;  %v5357_v42 = vld [vmem:[#allocation16_spill] sm:$0xff] }
 0x222   :  { %v1429_v63 = vmul.f32 %v1365_v15, %v3954_v21  ;;  %v623_v59 = vand.u32 2147483647, %v4585_v29  ;;  %v1046_v54 = vmul.f32 1.0614054, %v3994_v51  ;;  %v4595_v34 = vmul.f32 %v4522_v46, %v939_v62  ;;  %v5358_v29 = vld [vmem:[#allocation26_spill] sm:$0xff] }
 0x223   :  { %2911 = vpow2.f32 %v1834_v2  ;;  %v1555_v33 = vmul.f32 %v1491_v60, %v5346_v52  ;;  %v1556_v41 = vmul.f32 %v1492_v44, %v3944_v32  ;;  %v4599_v6 = vmul.f32 %v2902_v35, %v940_v40 }
 0x224   :  { %v1874_v4 = vmul.f32 %v5356_v0, %v1554_v28  ;;  %v1493_v22 = vadd.f32 0.2548296, %v1429_v63  ;;  %v687_v16 = vmul.f32 0.3275911, %v623_v59  ;;  %vm2005_vm5 = vcmp.ge.f32.partialorder %v5357_v42, 0.0 }
 0x225   :  { %v941_v15 = vsub.f32 2.0, %v877_v24  ;;  %v1875_v57 = vmul.f32 %v5358_v29, %v1555_v33  ;;  %v1876_v55 = vmul.f32 %v3952_v8, %v1556_v41  ;;  %v1646_v46 = vsub.f32 0.0, %v4566_v14  ;;  %v4606_v62 = vpop.eup %2907 }
 0x226   :  { %v1938_v52 = vsub.f32 1.0, %v1874_v4  ;;  %v1557_v32 = vmul.f32 %v1493_v22, %v3954_v21  ;;  %v751_v35 = vadd.f32 1.0, %v687_v16  ;;  %v1110_v2 = vadd.f32 -1.4531521, %v1046_v54 }
 0x227   :  { %v2910_v40 = vpop.eup %2909  ;;  %v1939_v60 = vsub.f32 1.0, %v1875_v57  ;;  %v1940_v44 = vsub.f32 1.0, %v1876_v55  ;;  %v1647_v28 = vsub.f32 0.0, %v623_v59  ;;  %v1047_v63 = vmul.f32 1.0614054, %v4011_v5 }
 0x228   :  { %v2066_v24 = vsub.f32 0.0, %v1938_v52  ;;  %v1877_v29 = vmul.f32 %v3964_v49, %v1557_v32  ;;  %v878_v33 = vmul.f32 %v2910_v40, %v750_v20  ;;  %2913 = vrcp.f32 %v751_v35 }
 0x229   :  { %v4611_v8 = vpop.eup %2911  ;;  %v2067_v41 = vsub.f32 0.0, %v1939_v60  ;;  %v2068_v0 = vsub.f32 0.0, %v1940_v44  ;;  %v4614_v4 = vmul.f32 %v1646_v46, %v4566_v14  ;;  %v1174_v21 = vmul.f32 %v1110_v2, %v3994_v51 }
 0x22a   :  { %v4617_v22 = vmul.f32 %v2906_v61, %v941_v15  ;;  %v2130_v57 = vsel %vm2002_vm2, %v1938_v52, %v2066_v24  ;;  %v1941_v55 = vsub.f32 1.0, %v1877_v29  ;;  %v1111_v54 = vadd.f32 -1.4531521, %v1047_v63  ;;  %v5359_v61 = vld [vmem:[#allocation15_spill] sm:$0xff]  ;;  %v5360_v24 = vld [vmem:[#allocation49_spill] sm:$0xff] }
 0x22b   :  { %v2194_v16 = vadd.f32 1.0, %v2130_v57  ;;  %v2131_v49 = vsel %vm2003_vm3, %v1939_v60, %v2067_v41  ;;  %v2132_v20 = vsel %vm2004_vm4, %v1940_v44, %v2068_v0  ;;  %v4625_v32 = vmul.f32 %v1647_v28, %v623_v59  ;;  %v5361_v60 = vld [vmem:[#allocation62_spill] sm:$0xff] }
 0x22c   :  { %v2195_v14 = vadd.f32 1.0, %v2131_v49  ;;  %v2196_v46 = vadd.f32 1.0, %v2132_v20  ;;  %v2069_v37 = vsub.f32 0.0, %v1941_v55  ;;  %v942_v2 = vsub.f32 2.0, %v878_v33 }
 0x22d   :  { %v2258_v15 = vmul.f32 %v2194_v16, %v5359_v61  ;;  %v1238_v23 = vadd.f32 1.4214138, %v1174_v21  ;;  %v1175_v31 = vmul.f32 %v1111_v54, %v4011_v5  ;;  %v1048_v52 = vmul.f32 1.0614054, %v4055_v48  ;;  %v5362_v16 = vld [vmem:[#allocation64_spill] sm:$0xff] }
 0x22e   :  { %v2914_v63 = vpop.eup %2913  ;;  %v2259_v39 = vmul.f32 %v2195_v14, %v5360_v24  ;;  %v2260_v29 = vmul.f32 %v2196_v46, %v5361_v60  ;;  %v2133_v59 = vsel %vm2005_vm5, %v1941_v55, %v2069_v37  ;;  %v1049_v18 = vmul.f32 1.0614054, %v4077_v56 }
 0x22f   :  { %2526 = vmatmul.f32.gmra.mxu2 %v2258_v15  ;;  %v2197_v44 = vadd.f32 1.0, %v2133_v59  ;;  %v879_v28 = vmul.f32 %v2914_v63, %v751_v35  ;;  %v1302_v33 = vmul.f32 %v1238_v23, %v3994_v51  ;;  %v1239_v41 = vadd.f32 1.4214138, %v1175_v31 }
 0x230   :  { %2591 = vmatmul.f32.gmra.mxu3 %v2259_v39  ;;  %2399 = vmatmul.f32.gmra.mxu0 %v2260_v29  ;;  %v4636_v0 = vmul.f32 %v2910_v40, %v942_v2  ;;  %v1112_v21 = vadd.f32 -1.4531521, %v1048_v52  ;;  %v1113_v57 = vadd.f32 -1.4531521, %v1049_v18  ;;  %v1050_v54 = vmul.f32 1.0614054, %v4105_v10 }
 0x231   :  { %v2261_v49 = vmul.f32 %v2197_v44, %v5362_v16  ;;  %v943_v42 = vsub.f32 2.0, %v879_v28  ;;  %v1366_v37 = vadd.f32 -0.28449672, %v1302_v33  ;;  %v1303_v55 = vmul.f32 %v1239_v41, %v4011_v5  ;;  %v5363_v18 = vld [vmem:[#allocation97_spill] sm:$0xff]  ;;  %v5364_v16 = vld [vmem:[#allocation98_spill] sm:$0xff] }
 0x232   :  { %v1176_v20 = vmul.f32 %v1112_v21, %v4055_v48  ;;  %v1177_v35 = vmul.f32 %v1113_v57, %v4077_v56  ;;  %v1114_v23 = vadd.f32 -1.4531521, %v1050_v54  ;;  %v1051_v14 = vmul.f32 1.0614054, %v4176_v1 }
 0x233   :  { %2464 = vmatmul.f32.gmra.mxu1 %v2261_v49  ;;  %v4644_v40 = vmul.f32 %v2914_v63, %v943_v42  ;;  %v1430_v46 = vmul.f32 %v1366_v37, %v3994_v51  ;;  %v1367_v2 = vadd.f32 -0.28449672, %v1303_v55  ;;  %v1052_v61 = vmul.f32 1.0614054, %v4186_v12 }
 0x234   :  { %v1240_v15 = vadd.f32 1.4214138, %v1176_v20  ;;  %v1241_v31 = vadd.f32 1.4214138, %v1177_v35  ;;  %v1178_v52 = vmul.f32 %v1114_v23, %v4105_v10  ;;  %v1115_v24 = vadd.f32 -1.4531521, %v1051_v14 }
 0x235   :  { %v1494_v39 = vadd.f32 0.2548296, %v1430_v46  ;;  %v1431_v60 = vmul.f32 %v1367_v2, %v4011_v5  ;;  %v1116_v29 = vadd.f32 -1.4531521, %v1052_v61  ;;  %v1053_v59 = vmul.f32 1.0614054, %v4193_v36 }
 0x236   :  { %vm2006_vm6 = vcmp.ge.f32.partialorder %v5363_v18, 0.0  ;;  %v1304_v63 = vmul.f32 %v1240_v15, %v4055_v48  ;;  %v1305_v44 = vmul.f32 %v1241_v31, %v4077_v56  ;;  %v1242_v28 = vadd.f32 1.4214138, %v1178_v52  ;;  %v5365_v20 = vld [vmem:[#allocation28_spill] sm:$0xff]  ;;  %v5366_v52 = vld [vmem:[#allocation29_spill] sm:$0xff] }
 0x237   :  { %v1179_v33 = vmul.f32 %v1115_v24, %v4176_v1  ;;  %v1558_v41 = vmul.f32 %v1494_v39, %v3994_v51  ;;  %v1495_v21 = vadd.f32 0.2548296, %v1431_v60  ;;  %v1180_v57 = vmul.f32 %v1116_v29, %v4186_v12 }
 0x238   :  { %v1117_v54 = vadd.f32 -1.4531521, %v1053_v59  ;;  %vm2007_vm7 = vcmp.ge.f32.partialorder %v5364_v16, 0.0  ;;  %v1368_v49 = vadd.f32 -0.28449672, %v1304_v63  ;;  %v1306_v37 = vmul.f32 %v1242_v28, %v4105_v10  ;;  %v5368_v28 = vld [vmem:[#allocation23_spill] sm:$0xff] }
 0x239   :  { %v1369_v42 = vadd.f32 -0.28449672, %v1305_v44  ;;  %v1243_v55 = vadd.f32 1.4214138, %v1179_v33  ;;  %v1878_v35 = vmul.f32 %v5365_v20, %v1558_v41  ;;  %v1559_v23 = vmul.f32 %v1495_v21, %v4011_v5  ;;  %v5367_v44 = vld [vmem:[#allocation32_spill] sm:$0xff] }
 0x23a   :  { %v1244_v14 = vadd.f32 1.4214138, %v1180_v57  ;;  %v1181_v46 = vmul.f32 %v1117_v54, %v4193_v36  ;;  %v1432_v51 = vmul.f32 %v1368_v49, %v4055_v48  ;;  %v1370_v61 = vadd.f32 -0.28449672, %v1306_v37 }
 0x23b   :  { %v1433_v2 = vmul.f32 %v1369_v42, %v4077_v56  ;;  %v1307_v15 = vmul.f32 %v1243_v55, %v4176_v1  ;;  %v1942_v31 = vsub.f32 1.0, %v1878_v35  ;;  %v1879_v24 = vmul.f32 %v5366_v52, %v1559_v23 }
 0x23c   :  { %v1308_v39 = vmul.f32 %v1244_v14, %v4186_v12  ;;  %v1245_v60 = vadd.f32 1.4214138, %v1181_v46  ;;  %v1496_v29 = vadd.f32 0.2548296, %v1432_v51  ;;  %v1434_v5 = vmul.f32 %v1370_v61, %v4105_v10  ;;  %v5369_v14 = vld [vmem:[#allocation24_spill] sm:$0xff]  ;;  %v5370_v51 = vld [vmem:[#allocation33_spill] sm:$0xff] }
 0x23d   :  { %v1497_v59 = vadd.f32 0.2548296, %v1433_v2  ;;  %v1371_v63 = vadd.f32 -0.28449672, %v1307_v15  ;;  %vm2008_vm8 = vcmp.ge.f32.partialorder %v5367_v44, 0.0  ;;  %vm2009_vm9 = vcmp.ge.f32.partialorder %v5368_v28, 0.0 }
 0x23e   :  { %v2070_v33 = vsub.f32 0.0, %v1942_v31  ;;  %v1943_v41 = vsub.f32 1.0, %v1879_v24  ;;  %v1372_v21 = vadd.f32 -0.28449672, %v1308_v39  ;;  %v1309_v57 = vmul.f32 %v1245_v60, %v4193_v36  ;;  %v5371_v61 = vld [vmem:[#allocation43_spill] sm:$0xff]  ;;  %v5373_v39 = vld [vmem:[#allocation56_spill] sm:$0xff] }
 0x23f   :  { %v1560_v54 = vmul.f32 %v1496_v29, %v4055_v48  ;;  %v1561_v49 = vmul.f32 %v1497_v59, %v4077_v56  ;;  %v1498_v42 = vadd.f32 0.2548296, %v1434_v5  ;;  %v1435_v37 = vmul.f32 %v1371_v63, %v4176_v1  ;;  %v5374_v63 = vld [vmem:[#allocation36_spill] sm:$0xff]  ;;  %v5381_v44 = vld [vmem:[#allocation65_spill] sm:$0xff] }
 0x240   :  { %v2134_v55 = vsel %vm2006_vm6, %v1942_v31, %v2070_v33  ;;  %v2071_v20 = vsub.f32 0.0, %v1943_v41  ;;  %v1436_v35 = vmul.f32 %v1372_v21, %v4186_v12  ;;  %v1373_v23 = vadd.f32 -0.28449672, %v1309_v57  ;;  %v5372_v31 = vld [vmem:[#allocation68_spill] sm:$0xff]  ;;  %v5375_v33 = vld [vmem:[#allocation71_spill] sm:$0xff]  ;;  %v5376_v57 = vld [vmem:[#allocation57_spill] sm:$0xff] }
 0x241   :  { %vm2010_vm10 = vcmp.ge.f32.partialorder %v5369_v14, 0.0  ;;  %v2198_v46 = vadd.f32 1.0, %v2134_v55  ;;  %v1880_v2 = vmul.f32 %v5370_v51, %v1560_v54  ;;  %v1881_v15 = vmul.f32 %v5371_v61, %v1561_v49  ;;  %v5377_v55 = vld [vmem:[#allocation30_spill] sm:$0xff] }
 0x242   :  { %v1562_v48 = vmul.f32 %v1498_v42, %v4105_v10  ;;  %v2135_v56 = vsel %vm2007_vm7, %v1943_v41, %v2071_v20  ;;  %v1499_v52 = vadd.f32 0.2548296, %v1435_v37  ;;  %v1500_v24 = vadd.f32 0.2548296, %v1436_v35  ;;  %v5378_v35 = vld [vmem:[#allocation77_spill] sm:$0xff] }
 0x243   :  { %v1437_v18 = vmul.f32 %v1373_v23, %v4193_v36  ;;  %vm2011_vm11 = vcmp.ge.f32.partialorder %v5372_v31, 0.0  ;;  %v2262_v60 = vmul.f32 %v2198_v46, %v5373_v39  ;;  %v2199_v29 = vadd.f32 1.0, %v2135_v56  ;;  %v5379_v46 = vld [vmem:[#allocation46_spill] sm:$0xff]  ;;  %v5383_v31 = vld [vmem:[#allocation67_spill] sm:$0xff] }
 0x244   :  { %v1944_v59 = vsub.f32 1.0, %v1880_v2  ;;  %v1945_v5 = vsub.f32 1.0, %v1881_v15  ;;  %vm2012_vm12 = vcmp.ge.f32.partialorder %v5374_v63, 0.0  ;;  %v1882_v21 = vmul.f32 %v5375_v33, %v1562_v48 }
 0x245   :  { %v1563_v10 = vmul.f32 %v1499_v52, %v4176_v1  ;;  %v1564_v16 = vmul.f32 %v1500_v24, %v4186_v12  ;;  %v1501_v41 = vadd.f32 0.2548296, %v1437_v18  ;;  %2529 = vmatmul.f32.gmra.mxu2 %v2262_v60  ;;  %v2263_v54 = vmul.f32 %v2199_v29, %v5376_v57  ;;  %v5380_v29 = vld [vmem:[#allocation59_spill] sm:$0xff] }
 0x246   :  { %v2072_v49 = vsub.f32 0.0, %v1944_v59  ;;  %v2073_v42 = vsub.f32 0.0, %v1945_v5  ;;  %v1054_v37 = vmul.f32 1.0614054, %v4244_v9  ;;  %vm2013_vm13 = vcmp.ge.f32.partialorder %v5377_v55, 0.0 }
 0x247   :  { %v1946_v20 = vsub.f32 1.0, %v1882_v21  ;;  %v1883_v23 = vmul.f32 %v5378_v35, %v1563_v10  ;;  %v1884_v51 = vmul.f32 %v5379_v46, %v1564_v16  ;;  %v1565_v2 = vmul.f32 %v1501_v41, %v4193_v36  ;;  %2594 = vmatmul.f32.gmra.mxu3 %v2263_v54 }
 0x248   :  { %v2136_v1 = vsel %vm2008_vm8, %v1944_v59, %v2072_v49  ;;  %v2137_v12 = vsel %vm2009_vm9, %v1945_v5, %v2073_v42  ;;  %v1118_v61 = vadd.f32 -1.4531521, %v1054_v37  ;;  %v1055_v15 = vmul.f32 1.0614054, %v4255_v17  ;;  %v5382_v42 = vld [vmem:[#allocation38_spill] sm:$0xff] }
 0x249   :  { %v2200_v48 = vadd.f32 1.0, %v2136_v1  ;;  %v2201_v56 = vadd.f32 1.0, %v2137_v12  ;;  %v2074_v52 = vsub.f32 0.0, %v1946_v20  ;;  %v1947_v24 = vsub.f32 1.0, %v1883_v23 }
 0x24a   :  { %v1948_v18 = vsub.f32 1.0, %v1884_v51  ;;  %v1885_v39 = vmul.f32 %v4207_v3, %v1565_v2  ;;  %v1182_v60 = vmul.f32 %v1118_v61, %v4244_v9  ;;  %v1119_v36 = vadd.f32 -1.4531521, %v1055_v15 }
 0x24b   :  { %v2264_v33 = vmul.f32 %v2200_v48, %v5380_v29  ;;  %v2265_v59 = vmul.f32 %v2201_v56, %v5381_v44  ;;  %v2138_v28 = vsel %vm2010_vm10, %v1946_v20, %v2074_v52  ;;  %v2075_v5 = vsub.f32 0.0, %v1947_v24  ;;  %v5384_v48 = vld [vmem:[#allocation35_spill] sm:$0xff] }
 0x24c   :  { %v2202_v21 = vadd.f32 1.0, %v2138_v28  ;;  %v2076_v10 = vsub.f32 0.0, %v1948_v18  ;;  %v1949_v16 = vsub.f32 1.0, %v1885_v39  ;;  %v1246_v41 = vadd.f32 1.4214138, %v1182_v60 }
 0x24d   :  { %2402 = vmatmul.f32.gmra.mxu0 %v2264_v33  ;;  %2467 = vmatmul.f32.gmra.mxu1 %v2265_v59  ;;  %v2139_v3 = vsel %vm2011_vm11, %v1947_v24, %v2075_v5  ;;  %v1183_v57 = vmul.f32 %v1119_v36, %v4255_v17  ;;  %v1056_v54 = vmul.f32 1.0614054, %v4315_v13  ;;  %v1057_v49 = vmul.f32 1.0614054, %v4318_v30  ;;  %v5385_v36 = vld [vmem:[#allocation78_spill] sm:$0xff] }
 0x24e   :  { %v2266_v37 = vmul.f32 %v2202_v21, %v5382_v42  ;;  %v2203_v14 = vadd.f32 1.0, %v2139_v3  ;;  %v2140_v20 = vsel %vm2012_vm12, %v1948_v18, %v2076_v10  ;;  %v2077_v35 = vsub.f32 0.0, %v1949_v16  ;;  %v5386_v33 = vld [vmem:[#allocation74_spill] sm:$0xff] }
 0x24f   :  { %v2204_v23 = vadd.f32 1.0, %v2140_v20  ;;  %v1310_v46 = vmul.f32 %v1246_v41, %v4244_v9  ;;  %v1247_v51 = vadd.f32 1.4214138, %v1183_v57  ;;  %v1120_v2 = vadd.f32 -1.4531521, %v1056_v54 }
 0x250   :  { %2532 = vmatmul.f32.gmra.mxu2 %v2266_v37  ;;  %v2267_v1 = vmul.f32 %v2203_v14, %v5383_v31  ;;  %v2141_v12 = vsel %vm2013_vm13, %v1949_v16, %v2077_v35  ;;  %v1121_v61 = vadd.f32 -1.4531521, %v1057_v49  ;;  %v1058_v15 = vmul.f32 1.0614054, %v4355_v11  ;;  %v5387_v49 = vld [vmem:[#allocation34_spill] sm:$0xff] }
 0x251   :  { %v2268_v56 = vmul.f32 %v2204_v23, %v5384_v48  ;;  %v2205_v52 = vadd.f32 1.0, %v2141_v12  ;;  %v1374_v63 = vadd.f32 -0.28449672, %v1310_v46  ;;  %v1311_v24 = vmul.f32 %v1247_v51, %v4255_v17 }
 0x252   :  { %2597 = vmatmul.f32.gmra.mxu3 %v2267_v1  ;;  %v1184_v18 = vmul.f32 %v1120_v2, %v4315_v13  ;;  %v1185_v39 = vmul.f32 %v1121_v61, %v4318_v30  ;;  %v1122_v60 = vadd.f32 -1.4531521, %v1058_v15  ;;  %v1059_v29 = vmul.f32 1.0614054, %v5385_v36  ;;  %v5388_v2 = vld [vmem:[#allocation39_spill] sm:$0xff]  ;;  %v5389_v15 = vld [vmem:[#allocation76_spill] sm:$0xff] }
 0x253   :  { %v2269_v55 = vmul.f32 %v2205_v52, %v5386_v33  ;;  %v1438_v44 = vmul.f32 %v1374_v63, %v4244_v9  ;;  %v1375_v59 = vadd.f32 -0.28449672, %v1311_v24  ;;  %v1060_v28 = vmul.f32 1.0614054, %v4422_v53 }
 0x254   :  { %v1248_v5 = vadd.f32 1.4214138, %v1184_v18  ;;  %v1249_v21 = vadd.f32 1.4214138, %v1185_v39  ;;  %v1186_v10 = vmul.f32 %v1122_v60, %v4355_v11  ;;  %v1123_v16 = vadd.f32 -1.4531521, %v1059_v29 }
 0x255   :  { %2405 = vmatmul.f32.gmra.mxu0 %v2268_v56  ;;  %2470 = vmatmul.f32.gmra.mxu1 %v2269_v55  ;;  %v1502_v41 = vadd.f32 0.2548296, %v1438_v44  ;;  %v1439_v3 = vmul.f32 %v1375_v59, %v4255_v17  ;;  %v1124_v57 = vadd.f32 -1.4531521, %v1060_v28  ;;  %v1061_v54 = vmul.f32 1.0614054, %v4429_v58 }
 0x256   :  { %vm2014_vm14 = vcmp.ge.f32.partialorder %v5387_v49, 0.0  ;;  %v1312_v42 = vmul.f32 %v1248_v5, %v4315_v13  ;;  %v1313_v37 = vmul.f32 %v1249_v21, %v4318_v30  ;;  %v1250_v14 = vadd.f32 1.4214138, %v1186_v10  ;;  %v5390_v29 = vld [vmem:[#allocation99_spill] sm:$0xff]  ;;  %v5391_v21 = vld [vmem:[#allocation52_spill] sm:$0xff]  ;;  %v5392_v10 = vld [vmem:[#allocation53_spill] sm:$0xff] }
 0x257   :  { %v1187_v20 = vmul.f32 %v1123_v16, %v5385_v36  ;;  %v1566_v35 = vmul.f32 %v1502_v41, %v4244_v9  ;;  %v1503_v23 = vadd.f32 0.2548296, %v1439_v3  ;;  %v1188_v46 = vmul.f32 %v1124_v57, %v4422_v53 }
 0x258   :  { %v1125_v51 = vadd.f32 -1.4531521, %v1061_v54  ;;  %vm2015_vm15 = vcmp.ge.f32.partialorder %v5388_v2, 0.0  ;;  %v1376_v31 = vadd.f32 -0.28449672, %v1312_v42  ;;  %v1314_v12 = vmul.f32 %v1250_v14, %v4355_v11 }
 0x259   :  { %v1377_v1 = vadd.f32 -0.28449672, %v1313_v37  ;;  %v1251_v61 = vadd.f32 1.4214138, %v1187_v20  ;;  %v1886_v48 = vmul.f32 %v5389_v15, %v1566_v35  ;;  %v1567_v56 = vmul.f32 %v1503_v23, %v4255_v17 }
 0x25a   :  { %v1252_v52 = vadd.f32 1.4214138, %v1188_v46  ;;  %v1189_v63 = vmul.f32 %v1125_v51, %v4429_v58  ;;  %v1440_v9 = vmul.f32 %v1376_v31, %v4315_v13  ;;  %v1378_v18 = vadd.f32 -0.28449672, %v1314_v12  ;;  %v5393_v51 = vld [vmem:[#allocation79_spill] sm:$0xff] }
 0x25b   :  { %v1441_v24 = vmul.f32 %v1377_v1, %v4318_v30  ;;  %v1315_v39 = vmul.f32 %v1251_v61, %v5385_v36  ;;  %v1950_v60 = vsub.f32 1.0, %v1886_v48  ;;  %v1887_v33 = vmul.f32 %v5390_v29, %v1567_v56  ;;  %v5394_v1 = vld [vmem:[#allocation61_spill] sm:$0xff]  ;;  %v5395_v61 = vld [vmem:[#allocation70_spill] sm:$0xff] }
 0x25c   :  { %v1316_v55 = vmul.f32 %v1252_v52, %v4422_v53  ;;  %v1253_v44 = vadd.f32 1.4214138, %v1189_v63  ;;  %v1504_v59 = vadd.f32 0.2548296, %v1440_v9  ;;  %v1442_v17 = vmul.f32 %v1378_v18, %v4355_v11  ;;  %v5396_v52 = vld [vmem:[#allocation50_spill] sm:$0xff]  ;;  %v5397_v63 = vld [vmem:[#allocation40_spill] sm:$0xff] }
 0x25d   :  { %v1505_v28 = vadd.f32 0.2548296, %v1441_v24  ;;  %v1379_v5 = vadd.f32 -0.28449672, %v1315_v39  ;;  %vm2016_vm0 = vcmp.ge.f32.partialorder %v5391_v21, 0.0  ;;  %vm2017_vm1 = vcmp.ge.f32.partialorder %v5392_v10, 0.0 }
 0x25e   :  { %v2078_v16 = vsub.f32 0.0, %v1950_v60  ;;  %v1951_v41 = vsub.f32 1.0, %v1887_v33  ;;  %v1380_v3 = vadd.f32 -0.28449672, %v1316_v55  ;;  %v1317_v57 = vmul.f32 %v1253_v44, %v4429_v58  ;;  %v5399_v29 = vld [vmem:[#allocation45_spill] sm:$0xff]  ;;  %v5400_v44 = vld [vmem:[#allocation48_spill] sm:$0xff] }
 0x25f   :  { %v1568_v54 = vmul.f32 %v1504_v59, %v4315_v13  ;;  %v1569_v42 = vmul.f32 %v1505_v28, %v4318_v30  ;;  %v1506_v37 = vadd.f32 0.2548296, %v1442_v17  ;;  %v1443_v14 = vmul.f32 %v1379_v5, %v5385_v36  ;;  %v5401_v5 = vld [vmem:[#allocation25_spill] sm:$0xff]  ;;  %v5408_v21 = vld [vmem:[#allocation54_spill] sm:$0xff] }
 0x260   :  { %v2142_v20 = vsel %vm2014_vm14, %v1950_v60, %v2078_v16  ;;  %v2079_v35 = vsub.f32 0.0, %v1951_v41  ;;  %v1444_v23 = vmul.f32 %v1380_v3, %v4422_v53  ;;  %v1381_v46 = vadd.f32 -0.28449672, %v1317_v57  ;;  %v5398_v60 = vld [vmem:[#allocation55_spill] sm:$0xff]  ;;  %v5403_v57 = vld [vmem:[#allocation92_spill] sm:$0xff] }
 0x261   :  { %vm2018_vm2 = vcmp.ge.f32.partialorder %v5393_v51, 0.0  ;;  %v2206_v31 = vadd.f32 1.0, %v2142_v20  ;;  %v1888_v12 = vmul.f32 %v5394_v1, %v1568_v54  ;;  %v1889_v15 = vmul.f32 %v5395_v61, %v1569_v42  ;;  %v5404_v42 = vld [vmem:[#allocation80_spill] sm:$0xff] }
 0x262   :  { %v1570_v13 = vmul.f32 %v1506_v37, %v4355_v11  ;;  %v2143_v30 = vsel %vm2015_vm15, %v1951_v41, %v2079_v35  ;;  %v1507_v48 = vadd.f32 0.2548296, %v1443_v14  ;;  %v1508_v56 = vadd.f32 0.2548296, %v1444_v23  ;;  %v5402_v41 = vld [vmem:[#allocation72_spill] sm:$0xff]  ;;  %v5405_v35 = vld [vmem:[#allocation41_spill] sm:$0xff] }
 0x263   :  { %v1445_v49 = vmul.f32 %v1381_v46, %v4429_v58  ;;  %vm2019_vm3 = vcmp.ge.f32.partialorder %v5396_v52, 0.0  ;;  %v2270_v9 = vmul.f32 %v2206_v31, %v5397_v63  ;;  %v2207_v24 = vadd.f32 1.0, %v2143_v30  ;;  %v5410_v52 = vld [vmem:[#allocation63_spill] sm:$0xff] }
 0x264   :  { %v1952_v18 = vsub.f32 1.0, %v1888_v12  ;;  %v1953_v39 = vsub.f32 1.0, %v1889_v15  ;;  %vm2020_vm4 = vcmp.ge.f32.partialorder %v5398_v60, 0.0  ;;  %v1890_v33 = vmul.f32 %v5399_v29, %v1570_v13  ;;  %v5406_v15 = vld [vmem:[#allocation91_spill] sm:$0xff] }
 0x265   :  { %v1571_v11 = vmul.f32 %v1507_v48, %v5385_v36  ;;  %v1572_v2 = vmul.f32 %v1508_v56, %v4422_v53  ;;  %v1509_v55 = vadd.f32 0.2548296, %v1445_v49  ;;  %2535 = vmatmul.f32.gmra.mxu2 %v2270_v9  ;;  %v2271_v59 = vmul.f32 %v2207_v24, %v5400_v44  ;;  %v5407_v48 = vld [vmem:[#allocation60_spill] sm:$0xff] }
 0x266   :  { %v2080_v28 = vsub.f32 0.0, %v1952_v18  ;;  %v2081_v17 = vsub.f32 0.0, %v1953_v39  ;;  %v1062_v16 = vmul.f32 1.0614054, %v5401_v5  ;;  %vm2021_vm5 = vcmp.ge.f32.partialorder %v5402_v41, 0.0 }
 0x267   :  { %v1954_v3 = vsub.f32 1.0, %v1890_v33  ;;  %v1891_v54 = vmul.f32 %v5403_v57, %v1571_v11  ;;  %v1892_v37 = vmul.f32 %v5404_v42, %v1572_v2  ;;  %v1573_v14 = vmul.f32 %v1509_v55, %v4429_v58  ;;  %2600 = vmatmul.f32.gmra.mxu3 %v2271_v59  ;;  %v5409_v55 = vld [vmem:[#allocation69_spill] sm:$0xff] }
 0x268   :  { %v2144_v53 = vsel %vm2016_vm0, %v1952_v18, %v2080_v28  ;;  %v2145_v36 = vsel %vm2017_vm1, %v1953_v39, %v2081_v17  ;;  %v1126_v20 = vadd.f32 -1.4531521, %v1062_v16  ;;  %v1063_v23 = vmul.f32 1.0614054, %v5405_v35 }
 0x269   :  { %v2208_v46 = vadd.f32 1.0, %v2144_v53  ;;  %v2209_v31 = vadd.f32 1.0, %v2145_v36  ;;  %v2082_v1 = vsub.f32 0.0, %v1954_v3  ;;  %v1955_v12 = vsub.f32 1.0, %v1891_v54  ;;  %v5411_v53 = vld [vmem:[#allocation75_spill] sm:$0xff] }
 0x26a   :  { %v1956_v61 = vsub.f32 1.0, %v1892_v37  ;;  %v1893_v13 = vmul.f32 %v5406_v15, %v1573_v14  ;;  %v1190_v30 = vmul.f32 %v1126_v20, %v5401_v5  ;;  %v1127_v58 = vadd.f32 -1.4531521, %v1063_v23 }
 0x26b   :  { %v2272_v56 = vmul.f32 %v2208_v46, %v5407_v48  ;;  %v2273_v49 = vmul.f32 %v2209_v31, %v5408_v21  ;;  %v2146_v10 = vsel %vm2018_vm2, %v1954_v3, %v2082_v1  ;;  %v2083_v63 = vsub.f32 0.0, %v1955_v12 }
 0x26c   :  { %v2210_v9 = vadd.f32 1.0, %v2146_v10  ;;  %v2084_v24 = vsub.f32 0.0, %v1956_v61  ;;  %v1957_v18 = vsub.f32 1.0, %v1893_v13  ;;  %v1254_v39 = vadd.f32 1.4214138, %v1190_v30 }
 0x26d   :  { %2408 = vmatmul.f32.gmra.mxu0 %v2272_v56  ;;  %2473 = vmatmul.f32.gmra.mxu1 %v2273_v49  ;;  %v2147_v29 = vsel %vm2019_vm3, %v1955_v12, %v2083_v63  ;;  %v1191_v33 = vmul.f32 %v1127_v58, %v5405_v35  ;;  %v1064_v11 = vmul.f32 1.0614054, %v4504_v45  ;;  %v1065_v2 = vmul.f32 1.0614054, %v4541_v47 }
 0x26e   :  { %v2274_v44 = vmul.f32 %v2210_v9, %v5409_v55  ;;  %v2211_v51 = vadd.f32 1.0, %v2147_v29  ;;  %v2148_v59 = vsel %vm2020_vm4, %v1956_v61, %v2084_v24  ;;  %v2085_v28 = vsub.f32 0.0, %v1957_v18  ;;  %v5412_v61 = vld [vmem:[#allocation100_spill] sm:$0xff]  ;;  %v5413_v24 = vld [vmem:[#allocation73_spill] sm:$0xff] }
 0x26f   :  { %v2212_v17 = vadd.f32 1.0, %v2148_v59  ;;  %v1318_v16 = vmul.f32 %v1254_v39, %v5401_v5  ;;  %v1255_v3 = vadd.f32 1.4214138, %v1191_v33  ;;  %v1128_v57 = vadd.f32 -1.4531521, %v1064_v11 }
 0x270   :  { %2538 = vmatmul.f32.gmra.mxu2 %v2274_v44  ;;  %v2275_v54 = vmul.f32 %v2211_v51, %v5410_v52  ;;  %v2149_v42 = vsel %vm2021_vm5, %v1957_v18, %v2085_v28  ;;  %v1129_v37 = vadd.f32 -1.4531521, %v1065_v2  ;;  %v1066_v14 = vmul.f32 1.0614054, %v4572_v25  ;;  %v5414_v51 = vld [vmem:[#allocation101_spill] sm:$0xff] }
 0x271   :  { %v2276_v36 = vmul.f32 %v2212_v17, %v5411_v53  ;;  %v2213_v20 = vadd.f32 1.0, %v2149_v42  ;;  %v1382_v60 = vadd.f32 -0.28449672, %v1318_v16  ;;  %v1319_v23 = vmul.f32 %v1255_v3, %v5405_v35  ;;  %v5415_v3 = vld [vmem:[#allocation86_spill] sm:$0xff] }
 0x272   :  { %2603 = vmatmul.f32.gmra.mxu3 %v2275_v54  ;;  %v1192_v46 = vmul.f32 %v1128_v57, %v4504_v45  ;;  %v1193_v31 = vmul.f32 %v1129_v37, %v4541_v47  ;;  %v1130_v1 = vadd.f32 -1.4531521, %v1066_v14  ;;  %v1067_v12 = vmul.f32 1.0614054, %v4595_v34 }
 0x273   :  { %v2277_v41 = vmul.f32 %v2213_v20, %v5412_v61  ;;  %v1446_v15 = vmul.f32 %v1382_v60, %v5401_v5  ;;  %v1383_v13 = vadd.f32 -0.28449672, %v1319_v23  ;;  %v1068_v30 = vmul.f32 1.0614054, %v4599_v6  ;;  %v5416_v20 = vld [vmem:[#allocation20_spill] sm:$0xff]  ;;  %v2373_v61 = vpop.f32.mrf.mxu0 }
 0x274   :  { %v1256_v58 = vadd.f32 1.4214138, %v1192_v46  ;;  %v1257_v48 = vadd.f32 1.4214138, %v1193_v31  ;;  %v1194_v56 = vmul.f32 %v1130_v1, %v4572_v25  ;;  %v1131_v21 = vadd.f32 -1.4531521, %v1067_v12 }
 0x275   :  { %2411 = vmatmul.f32.gmra.mxu0 %v2276_v36  ;;  %2476 = vmatmul.f32.gmra.mxu1 %v2277_v41  ;;  %v1510_v49 = vadd.f32 0.2548296, %v1446_v15  ;;  %v1447_v10 = vmul.f32 %v1383_v13, %v5405_v35  ;;  %v1132_v63 = vadd.f32 -1.4531521, %v1068_v30  ;;  %v1069_v9 = vmul.f32 1.0614054, %v4617_v22  ;;  %v2438_v41 = vpop.f32.mrf.mxu1 }
 0x276   :  { %vm2022_vm6 = vcmp.ge.f32.partialorder %v5413_v24, 0.0  ;;  %v1320_v18 = vmul.f32 %v1256_v58, %v4504_v45  ;;  %v1321_v39 = vmul.f32 %v1257_v48, %v4541_v47  ;;  %v1258_v29 = vadd.f32 1.4214138, %v1194_v56  ;;  %v5417_v15 = vld [vmem:[#allocation81_spill] sm:$0xff]  ;;  %v5418_v13 = vld [vmem:[#allocation84_spill] sm:$0xff] }
 0x277   :  { %v1195_v33 = vmul.f32 %v1131_v21, %v4595_v34  ;;  %v1574_v11 = vmul.f32 %v1510_v49, %v5401_v5  ;;  %v1511_v2 = vadd.f32 0.2548296, %v1447_v10  ;;  %v1196_v55 = vmul.f32 %v1132_v63, %v4599_v6 }
 0x278   :  { %v1133_v44 = vadd.f32 -1.4531521, %v1069_v9  ;;  %vm2023_vm7 = vcmp.ge.f32.partialorder %v5414_v51, 0.0  ;;  %v1384_v59 = vadd.f32 -0.28449672, %v1320_v18  ;;  %v1322_v17 = vmul.f32 %v1258_v29, %v4572_v25 }
 0x279   :  { %v1385_v28 = vadd.f32 -0.28449672, %v1321_v39  ;;  %v1259_v16 = vadd.f32 1.4214138, %v1195_v33  ;;  %v1894_v57 = vmul.f32 %v5415_v3, %v1574_v11  ;;  %v1575_v52 = vmul.f32 %v1511_v2, %v5405_v35  ;;  %v5419_v33 = vld [vmem:[#allocation51_spill] sm:$0xff] }
 0x27a   :  { %v1260_v54 = vadd.f32 1.4214138, %v1196_v55  ;;  %v1197_v42 = vmul.f32 %v1133_v44, %v4617_v22  ;;  %v1448_v5 = vmul.f32 %v1384_v59, %v4504_v45  ;;  %v1386_v14 = vadd.f32 -0.28449672, %v1322_v17  ;;  %v5420_v17 = vld [vmem:[#allocation17_spill] sm:$0xff] }
 0x27b   :  { %v1449_v37 = vmul.f32 %v1385_v28, %v4541_v47  ;;  %v1323_v53 = vmul.f32 %v1259_v16, %v4595_v34  ;;  %v1958_v36 = vsub.f32 1.0, %v1894_v57  ;;  %v1895_v60 = vmul.f32 %v5416_v20, %v1575_v52  ;;  %v5421_v16 = vld [vmem:[#allocation83_spill] sm:$0xff] }
 0x27c   :  { %v1324_v23 = vmul.f32 %v1260_v54, %v4599_v6  ;;  %v1261_v46 = vadd.f32 1.4214138, %v1197_v42  ;;  %v1512_v31 = vadd.f32 0.2548296, %v1448_v5  ;;  %v1450_v35 = vmul.f32 %v1386_v14, %v4572_v25  ;;  %v5422_v42 = vld [vmem:[#allocation82_spill] sm:$0xff] }
 0x27d   :  { %v1513_v1 = vadd.f32 0.2548296, %v1449_v37  ;;  %v1387_v12 = vadd.f32 -0.28449672, %v1323_v53  ;;  %vm2024_vm8 = vcmp.ge.f32.partialorder %v5417_v15, 0.0  ;;  %vm2025_vm9 = vcmp.ge.f32.partialorder %v5418_v13, 0.0 }
 0x27e   :  { %v2086_v30 = vsub.f32 0.0, %v1958_v36  ;;  %v1959_v58 = vsub.f32 1.0, %v1895_v60  ;;  %v1388_v48 = vadd.f32 -0.28449672, %v1324_v23  ;;  %v1325_v56 = vmul.f32 %v1261_v46, %v4617_v22 }
 0x27f   :  { %v1576_v21 = vmul.f32 %v1512_v31, %v4504_v45  ;;  %v1577_v49 = vmul.f32 %v1513_v1, %v4541_v47  ;;  %v1514_v10 = vadd.f32 0.2548296, %v1450_v35  ;;  %v1451_v63 = vmul.f32 %v1387_v12, %v4595_v34  ;;  %v4844_v47 = vld [vmem:[%s4921_s4] ss:$0 sm:$0xff]  ;;  %v2376_v31 = vpop.f32.mrf.mxu0  ;;  %v2441_v1 = vpop.f32.mrf.mxu1  ;;  %s3055_s4 = smov [#allocation10]  }
 0x280   :  { %v2150_v9 = vsel %vm2022_vm6, %v1958_v36, %v2086_v30  ;;  %v2087_v18 = vsub.f32 0.0, %v1959_v58  ;;  %v1452_v39 = vmul.f32 %v1388_v48, %v4599_v6  ;;  %v1389_v29 = vadd.f32 -0.28449672, %v1325_v56  ;;  %v2503_v30 = vpop.f32.mrf.mxu2  ;;  %v5423_v56 = vld [vmem:[#allocation85_spill] sm:$0xff]  ;;  %s2636_s15 = sshll.u32 %s3055_s4, 4  ;;  %s2637_s15 = int_to_ptr.vmem [resolvable:$true] %s2636_s15 }
 0x281   :  { %vm2026_vm10 = vcmp.ge.f32.partialorder %v5419_v33, 0.0  ;;  %v2214_v11 = vadd.f32 1.0, %v2150_v9  ;;  %v1896_v2 = vmul.f32 %v4502_v7, %v1576_v21  ;;  %v1897_v55 = vmul.f32 %v4544_v27, %v1577_v49  ;;  %v5424_v21 = vld [vmem:[#allocation93_spill] sm:$0xff] }
 0x282   :  { %v1578_v45 = vmul.f32 %v1514_v10, %v4572_v25  ;;  %v2151_v24 = vsel %vm2023_vm7, %v1959_v58, %v2087_v18  ;;  %v1515_v44 = vadd.f32 0.2548296, %v1451_v63  ;;  %v1516_v59 = vadd.f32 0.2548296, %v1452_v39 }
 0x283   :  { %v1453_v28 = vmul.f32 %v1389_v29, %v4617_v22  ;;  %vm2027_vm11 = vcmp.ge.f32.partialorder %v5420_v17, 0.0  ;;  %v2278_v7 = vmul.f32 %v2214_v11, %v5421_v16  ;;  %v2215_v3 = vadd.f32 1.0, %v2151_v24  ;;  %v5425_v17 = vld [vmem:[#allocation58_spill] sm:$0xff] }
 0x284   :  { %v1960_v27 = vsub.f32 1.0, %v1896_v2  ;;  %v1961_v57 = vsub.f32 1.0, %v1897_v55  ;;  %vm2028_vm12 = vcmp.ge.f32.partialorder %v4506_v26, 0.0  ;;  %v1898_v25 = vmul.f32 %v4553_v19, %v1578_v45 }
 0x285   :  { %v1579_v52 = vmul.f32 %v1515_v44, %v4595_v34  ;;  %v1580_v51 = vmul.f32 %v1516_v59, %v4599_v6  ;;  %v1517_v54 = vadd.f32 0.2548296, %v1453_v28  ;;  %2541 = vmatmul.f32.gmra.mxu2 %v2278_v7  ;;  %v2279_v5 = vmul.f32 %v2215_v3, %v5422_v42 }
 0x286   :  { %v2088_v37 = vsub.f32 0.0, %v1960_v27  ;;  %v2089_v14 = vsub.f32 0.0, %v1961_v57  ;;  %v2374_v53 = vadd.f32 %v4844_v47, %v2373_v61  ;;  %vm2029_vm13 = vcmp.ge.f32.partialorder %v4533_v43, 0.0 }
 0x287   :  { %v1962_v36 = vsub.f32 1.0, %v1898_v25  ;;  %v1899_v20 = vmul.f32 %v4580_v38, %v1579_v52  ;;  %v1900_v60 = vmul.f32 %v4606_v62, %v1580_v51  ;;  %v1581_v19 = vmul.f32 %v1517_v54, %v4617_v22  ;;  %2606 = vmatmul.f32.gmra.mxu3 %v2279_v5  ;;  %v2568_v62 = vpop.f32.mrf.mxu3  ;;  %v2444_v25 = vpop.f32.mrf.mxu1  ;;  %v5426_v52 = vld [vmem:[#allocation87_spill] sm:$0xff] }
 0x288   :  { %v2152_v34 = vsel %vm2024_vm8, %v1960_v27, %v2088_v37  ;;  %v2153_v6 = vsel %vm2025_vm9, %v1961_v57, %v2089_v14  ;;  %v2439_v23 = vadd.f32 %v2438_v41, %v2374_v53  ;;  %v1070_v46 = vmul.f32 1.0614054, %v4636_v0  ;;  %v2506_v42 = vpop.f32.mrf.mxu2  ;;  %v5427_v53 = vld [vmem:[#allocation42_spill] sm:$0xff] }
 0x289   :  { %v2216_v35 = vadd.f32 1.0, %v2152_v34  ;;  %v2217_v12 = vadd.f32 1.0, %v2153_v6  ;;  %v2090_v61 = vsub.f32 0.0, %v1962_v36  ;;  %v1963_v38 = vsub.f32 1.0, %v1899_v20 }
 0x28a   :  { %v1964_v58 = vsub.f32 1.0, %v1900_v60  ;;  %v1901_v22 = vmul.f32 %v4611_v8, %v1581_v19  ;;  %v1134_v48 = vadd.f32 -1.4531521, %v1070_v46  ;;  %v1071_v15 = vmul.f32 1.0614054, %v4644_v40 }
 0x28b   :  { %v2280_v13 = vmul.f32 %v2216_v35, %v5423_v56  ;;  %v2281_v41 = vmul.f32 %v2217_v12, %v5424_v21  ;;  %v2154_v49 = vsel %vm2026_vm10, %v1962_v36, %v2090_v61  ;;  %v2091_v10 = vsub.f32 0.0, %v1963_v38 }
 0x28c   :  { %v2218_v63 = vadd.f32 1.0, %v2154_v49  ;;  %v2092_v9 = vsub.f32 0.0, %v1964_v58  ;;  %v1965_v18 = vsub.f32 1.0, %v1901_v22  ;;  %v1198_v39 = vmul.f32 %v1134_v48, %v4636_v0 }
 0x28d   :  { %2414 = vmatmul.f32.gmra.mxu0 %v2280_v13  ;;  %2479 = vmatmul.f32.gmra.mxu1 %v2281_v41  ;;  %v2155_v8 = vsel %vm2027_vm11, %v1963_v38, %v2091_v10  ;;  %v1135_v29 = vadd.f32 -1.4531521, %v1071_v15  ;;  %v2377_v11 = vadd.f32 %v4844_v47, %v2376_v31  ;;  %v2504_v2 = vadd.f32 %v2503_v30, %v2439_v23  ;;  %v5428_v10 = vld [vmem:[#allocation88_spill] sm:$0xff] }
 0x28e   :  { %v2282_v55 = vmul.f32 %v2218_v63, %v4494_v50  ;;  %v2219_v45 = vadd.f32 1.0, %v2155_v8  ;;  %v2156_v33 = vsel %vm2028_vm12, %v1964_v58, %v2092_v9  ;;  %v2093_v24 = vsub.f32 0.0, %v1965_v18  ;;  %v2379_v50 = vpop.f32.mrf.mxu0 }
 0x28f   :  { %v1836_v44 = vmul.f32 1.442695, %v4614_v4  ;;  %v2220_v59 = vadd.f32 1.0, %v2156_v33  ;;  %v1262_v28 = vadd.f32 1.4214138, %v1198_v39  ;;  %v1199_v16 = vmul.f32 %v1135_v29, %v4644_v40  ;;  %v2571_v5 = vpop.f32.mrf.mxu3  ;;  %v5431_v33 = vld [vmem:[#allocation90_spill] sm:$0xff] }
 0x290   :  { %2544 = vmatmul.f32.gmra.mxu2 %v2282_v55  ;;  %v2283_v7 = vmul.f32 %v2219_v45, %v5425_v17  ;;  %v2157_v3 = vsel %vm2029_vm13, %v1965_v18, %v2093_v24  ;;  %v2442_v27 = vadd.f32 %v2441_v1, %v2377_v11  ;;  %v2569_v57 = vadd.f32 %v2568_v62, %v2504_v2  ;;  %v2447_v1 = vpop.f32.mrf.mxu1  ;;  %v2509_v61 = vpop.f32.mrf.mxu2  ;;  %v5429_v11 = vld [vmem:[#allocation89_spill] sm:$0xff]  ;;  %v5430_v2 = vld [vmem:[#allocation44_spill] sm:$0xff] }
 0x291   :  { %v2284_v26 = vmul.f32 %v2220_v59, %v5426_v52  ;;  %v2221_v51 = vadd.f32 1.0, %v2157_v3  ;;  %v1326_v54 = vmul.f32 %v1262_v28, %v4636_v0  ;;  %v1263_v4 = vadd.f32 1.4214138, %v1199_v16 }
 0x292   :  { %v1838_v37 = vmul.f32 1.442695, %v4625_v32  ;;  %2609 = vmatmul.f32.gmra.mxu3 %v2283_v7  ;;  %2616 = vst [vmem:[#allocation10] sm:$0xff] %v2569_v57  ;;  %v2507_v14 = vadd.f32 %v2506_v42, %v2442_v27  ;;  %2915 = vpow2.f32 %v1836_v44  ;;  %v2380_v60 = vadd.f32 %v4844_v47, %v2379_v50 }
 0x293   :  { %v2285_v43 = vmul.f32 %v2221_v51, %v5427_v53  ;;  %v1390_v36 = vadd.f32 -0.28449672, %v1326_v54  ;;  %v1327_v20 = vmul.f32 %v1263_v4, %v4644_v40  ;;  %vm2030_vm14 = vcmp.ge.f32.partialorder %v5428_v10, 0.0 }
 0x294   :  { %v2572_v19 = vadd.f32 %v2571_v5, %v2507_v14  ;;  %2917 = vpow2.f32 %v1838_v37  ;;  %v2445_v46 = vadd.f32 %v2444_v25, %v2380_v60  ;;  %vm2031_vm15 = vcmp.ge.f32.partialorder %v5430_v2, 0.0 }
 0x295   :  { %2417 = vmatmul.f32.gmra.mxu0 %v2284_v26  ;;  %2482 = vmatmul.f32.gmra.mxu1 %v2285_v43  ;;  %v1454_v34 = vmul.f32 %v1390_v36, %v4636_v0  ;;  %v1391_v6 = vadd.f32 -0.28449672, %v1327_v20  ;;  %v495_v24 = vmul.f32 0.5, %v5431_v33 }
 0x296   :  { %2617 = vst [vmem:[#allocation10 + $0x8] sm:$0xff] %v2572_v19  ;;  %v2382_v31 = vpop.f32.mrf.mxu0  ;;  %v2510_v62 = vadd.f32 %v2509_v61, %v2445_v46 }
 0x297   :  { %v1518_v32 = vadd.f32 0.2548296, %v1454_v34  ;;  %v1455_v23 = vmul.f32 %v1391_v6, %v4644_v40  ;;  %v2574_v38 = vpop.f32.mrf.mxu3  ;;  %v2383_v15 = vadd.f32 %v4844_v47, %v2382_v31 }
 0x298   :  { %v2916_v30 = vpop.eup %2915  ;;  %v2575_v56 = vadd.f32 %v2574_v38, %v2510_v62  ;;  %v2450_v9 = vpop.f32.mrf.mxu1 }
 0x299   :  { %v1582_v35 = vmul.f32 %v1518_v32, %v4636_v0  ;;  %v1519_v12 = vadd.f32 0.2548296, %v1455_v23  ;;  %v2448_v0 = vadd.f32 %v2447_v1, %v2383_v15  ;;  %v2512_v8 = vpop.f32.mrf.mxu2 }
 0x29a   :  { %v2918_v48 = vpop.eup %2917  ;;  %2618 = vst [vmem:[#allocation10 + $0x10] sm:$0xff] %v2575_v56 }
 0x29b   :  { %v1902_v58 = vmul.f32 %v2916_v30, %v1582_v35  ;;  %v1583_v22 = vmul.f32 %v1519_v12, %v4644_v40  ;;  %v494_v40 = vmul.f32 0.5, %v5429_v11  ;;  %v2513_v45 = vadd.f32 %v2512_v8, %v2448_v0 }
 0x29d   :  { %v1966_v13 = vsub.f32 1.0, %v1902_v58  ;;  %v1903_v21 = vmul.f32 %v2918_v48, %v1583_v22 }
 0x29e   :  { %v2385_v63 = vpop.f32.mrf.mxu0 }
 0x29f   :  { %v2094_v41 = vsub.f32 0.0, %v1966_v13  ;;  %v1967_v49 = vsub.f32 1.0, %v1903_v21  ;;  %v2577_v29 = vpop.f32.mrf.mxu3  ;;  %v2386_v16 = vadd.f32 %v4844_v47, %v2385_v63 }
 0x2a0   :  { %v2578_v17 = vadd.f32 %v2577_v29, %v2513_v45  ;;  %v2453_v57 = vpop.f32.mrf.mxu1 }
 0x2a1   :  { %v2158_v18 = vsel %vm2030_vm14, %v1966_v13, %v2094_v41  ;;  %v2095_v39 = vsub.f32 0.0, %v1967_v49  ;;  %v2451_v3 = vadd.f32 %v2450_v9, %v2386_v16  ;;  %v2515_v50 = vpop.f32.mrf.mxu2 }
 0x2a2   :  { %v2222_v55 = vadd.f32 1.0, %v2158_v18  ;;  %2619 = vst [vmem:[#allocation10 + $0x18] sm:$0xff] %v2578_v17 }
 0x2a3   :  { %v2159_v44 = vsel %vm2031_vm15, %v1967_v49, %v2095_v39  ;;  %v2516_v52 = vadd.f32 %v2515_v50, %v2451_v3 }
 0x2a4   :  { %v2286_v59 = vmul.f32 %v2222_v55, %v494_v40  ;;  %v2223_v28 = vadd.f32 1.0, %v2159_v44 }
 0x2a6   :  { %2547 = vmatmul.f32.gmra.mxu2 %v2286_v59  ;;  %v2287_v7 = vmul.f32 %v2223_v28, %v495_v24  ;;  %v2388_v27 = vpop.f32.mrf.mxu0 }
 0x2a7   :  { %v2580_v25 = vpop.f32.mrf.mxu3  ;;  %v2389_v26 = vadd.f32 %v4844_v47, %v2388_v27 }
 0x2a8   :  { %2612 = vmatmul.f32.gmra.mxu3 %v2287_v7  ;;  %v2581_v51 = vadd.f32 %v2580_v25, %v2516_v52  ;;  %v2456_v42 = vpop.f32.mrf.mxu1 }
 0x2a9   :  { %v2454_v54 = vadd.f32 %v2453_v57, %v2389_v26  ;;  %v2518_v5 = vpop.f32.mrf.mxu2 }
 0x2aa   :  { %2620 = vst [vmem:[#allocation10 + $0x20] sm:$0xff] %v2581_v51 }
 0x2ab   :  { %v2519_v14 = vadd.f32 %v2518_v5, %v2454_v54 }
 0x2ae   :  { %v2391_v4 = vpop.f32.mrf.mxu0 }
 0x2af   :  { %v2583_v37 = vpop.f32.mrf.mxu3  ;;  %v2392_v53 = vadd.f32 %v4844_v47, %v2391_v4 }
 0x2b0   :  { %v2584_v43 = vadd.f32 %v2583_v37, %v2519_v14  ;;  %v2459_v60 = vpop.f32.mrf.mxu1 }
 0x2b1   :  { %v2457_v36 = vadd.f32 %v2456_v42, %v2392_v53  ;;  %v2521_v19 = vpop.f32.mrf.mxu2 }
 0x2b2   :  { %2621 = vst [vmem:[#allocation10 + $0x28] sm:$0xff] %v2584_v43 }
 0x2b3   :  { %v2522_v6 = vadd.f32 %v2521_v19, %v2457_v36 }
 0x2b6   :  { %v2394_v20 = vpop.f32.mrf.mxu0 }
 0x2b7   :  { %v2586_v34 = vpop.f32.mrf.mxu3  ;;  %v2395_v32 = vadd.f32 %v4844_v47, %v2394_v20 }
 0x2b8   :  { %v2587_v23 = vadd.f32 %v2586_v34, %v2522_v6  ;;  %v2462_v61 = vpop.f32.mrf.mxu1 }
 0x2b9   :  { %v2460_v46 = vadd.f32 %v2459_v60, %v2395_v32  ;;  %v2524_v1 = vpop.f32.mrf.mxu2 }
 0x2ba   :  { %2622 = vst [vmem:[#allocation10 + $0x30] sm:$0xff] %v2587_v23 }
 0x2bb   :  { %v2525_v12 = vadd.f32 %v2524_v1, %v2460_v46 }
 0x2be   :  { %v2397_v31 = vpop.f32.mrf.mxu0 }
 0x2bf   :  { %v2589_v35 = vpop.f32.mrf.mxu3  ;;  %v2398_v38 = vadd.f32 %v4844_v47, %v2397_v31 }
 0x2c0   :  { %v2590_v30 = vadd.f32 %v2589_v35, %v2525_v12  ;;  %v2465_v21 = vpop.f32.mrf.mxu1 }
 0x2c1   :  { %v2463_v62 = vadd.f32 %v2462_v61, %v2398_v38  ;;  %v2527_v22 = vpop.f32.mrf.mxu2 }
 0x2c2   :  { %2623 = vst [vmem:[#allocation10 + $0x38] sm:$0xff] %v2590_v30 }
 0x2c3   :  { %v2528_v15 = vadd.f32 %v2527_v22, %v2463_v62 }
 0x2c6   :  { %v2400_v58 = vpop.f32.mrf.mxu0 }
 0x2c7   :  { %v2592_v48 = vpop.f32.mrf.mxu3  ;;  %v2401_v56 = vadd.f32 %v4844_v47, %v2400_v58 }
 0x2c8   :  { %v2593_v13 = vadd.f32 %v2592_v48, %v2528_v15 }
 0x2c9   :  { %v2466_v41 = vadd.f32 %v2465_v21, %v2401_v56  ;;  %v2530_v10 = vpop.f32.mrf.mxu2 }
 0x2ca   :  { %2624 = vst [vmem:[#allocation10 + $0x40] sm:$0xff] %v2593_v13  ;;  %v2468_v39 = vpop.f32.mrf.mxu1 }
 0x2cb   :  { %v2531_v63 = vadd.f32 %v2530_v10, %v2466_v41 }
 0x2ce   :  { %v2403_v49 = vpop.f32.mrf.mxu0 }
 0x2cf   :  { %v2595_v0 = vpop.f32.mrf.mxu3  ;;  %v2404_v9 = vadd.f32 %v4844_v47, %v2403_v49 }
 0x2d0   :  { %v2596_v18 = vadd.f32 %v2595_v0, %v2531_v63 }
 0x2d1   :  { %v2469_v8 = vadd.f32 %v2468_v39, %v2404_v9 }
 0x2d2   :  { %2625 = vst [vmem:[#allocation10 + $0x48] sm:$0xff] %v2596_v18  ;;  %v2471_v33 = vpop.f32.mrf.mxu1 }
 0x2d3   :  { %v2533_v29 = vpop.f32.mrf.mxu2 }
 0x2d4   :  { %v2534_v11 = vadd.f32 %v2533_v29, %v2469_v8 }
 0x2d6   :  { %v2406_v55 = vpop.f32.mrf.mxu0 }
 0x2d7   :  { %v2598_v40 = vpop.f32.mrf.mxu3  ;;  %v2407_v45 = vadd.f32 %v4844_v47, %v2406_v55 }
 0x2d8   :  { %v2599_v2 = vadd.f32 %v2598_v40, %v2534_v11 }
 0x2d9   :  { %v2472_v24 = vadd.f32 %v2471_v33, %v2407_v45 }
 0x2da   :  { %2626 = vst [vmem:[#allocation10 + $0x50] sm:$0xff] %v2599_v2 }
 0x2e8   :  { %v2536_v44 = vpop.f32.mrf.mxu2 }
 0x2e9   :  { %v2537_v59 = vadd.f32 %v2536_v44, %v2472_v24 }
 0x2ea   :  { %v2409_v28 = vpop.f32.mrf.mxu0  ;;  %v2601_v16 = vpop.f32.mrf.mxu3 }
 0x2eb   :  { %v2602_v17 = vadd.f32 %v2601_v16, %v2537_v59  ;;  %v2410_v7 = vadd.f32 %v4844_v47, %v2409_v28  ;;  %v2474_v3 = vpop.f32.mrf.mxu1 }
 0x2ed   :  { %2627 = vst [vmem:[#allocation10 + $0x58] sm:$0xff] %v2602_v17  ;;  %v2475_v27 = vadd.f32 %v2474_v3, %v2410_v7 }
 0x2f2   :  { %v2412_v26 = vpop.f32.mrf.mxu0 }
 0x2f3   :  { %v2539_v57 = vpop.f32.mrf.mxu2  ;;  %v2413_v51 = vadd.f32 %v4844_v47, %v2412_v26  ;;  %v2477_v54 = vpop.f32.mrf.mxu1 }
 0x2f4   :  { %v2540_v50 = vadd.f32 %v2539_v57, %v2475_v27 }
 0x2f5   :  { %v2604_v25 = vpop.f32.mrf.mxu3  ;;  %v2478_v4 = vadd.f32 %v2477_v54, %v2413_v51 }
 0x2f6   :  { %v2605_v52 = vadd.f32 %v2604_v25, %v2540_v50 }
 0x2f8   :  { %2628 = vst [vmem:[#allocation10 + $0x60] sm:$0xff] %v2605_v52 }
 0x308   :  { %v2542_v42 = vpop.f32.mrf.mxu2 }
 0x309   :  { %v2543_v5 = vadd.f32 %v2542_v42, %v2478_v4 }
 0x30a   :  { %v2415_v37 = vpop.f32.mrf.mxu0  ;;  %v2607_v14 = vpop.f32.mrf.mxu3 }
 0x30b   :  { %v2608_v53 = vadd.f32 %v2607_v14, %v2543_v5  ;;  %v2416_v43 = vadd.f32 %v4844_v47, %v2415_v37  ;;  %v2480_v36 = vpop.f32.mrf.mxu1 }
 0x30d   :  { %2629 = vst [vmem:[#allocation10 + $0x68] sm:$0xff] %v2608_v53  ;;  %v2481_v20 = vadd.f32 %v2480_v36, %v2416_v43 }
 0x312   :  { %v2418_v32 = vpop.f32.mrf.mxu0 }
 0x313   :  { %v2545_v60 = vpop.f32.mrf.mxu2  ;;  %v2419_v23 = vadd.f32 %v4844_v47, %v2418_v32  ;;  %v2483_v46 = vpop.f32.mrf.mxu1 }
 0x314   :  { %v2546_v19 = vadd.f32 %v2545_v60, %v2481_v20 }
 0x315   :  { %v2610_v34 = vpop.f32.mrf.mxu3  ;;  %v2484_v31 = vadd.f32 %v2483_v46, %v2419_v23 }
 0x316   :  { %v2611_v6 = vadd.f32 %v2610_v34, %v2546_v19 }
 0x318   :  { %2630 = vst [vmem:[#allocation10 + $0x70] sm:$0xff] %v2611_v6 }
 0x329   :  { %v2548_v1 = vpop.f32.mrf.mxu2 }
 0x32a   :  { %v2549_v35 = vadd.f32 %v2548_v1, %v2484_v31 }
 0x32b   :  { %v2613_v12 = vpop.f32.mrf.mxu3 }
 0x32c   :  { %v2614_v61 = vadd.f32 %v2613_v12, %v2549_v35 }
 0x32e   :  { %2631 = vst [vmem:[#allocation10 + $0x78] sm:$0xff] %v2614_v61 }
 0x32f   :  { %2644 = dma.vmem_to_hbm [thread:$0]  %s2637_s15, 2048, %s2639_s18, [#allocation4], %s3051_s30, %s3051_s30, %s3052_s6  }
 0x330   :  { %3045 = dma.done.wait [#allocation4], 2048  }
 0x331   :  { %3046 = vsyncadd [#allocation4], 4294965248 }
 0x332   :  { %2649 = vsyncpa [#allocation3], 1 }
 0x333   :  { %2650 = vsyncpa [#allocation6], 1 }
 0x334   :  { %2651 = vsyncpa [#allocation9], 1 }
 0x335   :  { %2652 = vsyncpa [#allocation4], 1 }

</bundles_post_ra>
